<compile_context>
chip_gen: v7x
topology: tpu7x:2x2x1
jax: 0.10.0
libtpu: 0.0.40
codegen_flags: <defaults>
</compile_context>

<pallas_src>
from functools import partial

import jax
import jax.numpy as jnp
from jax.experimental import pallas as pl
from jax.experimental.pallas import tpu as pltpu


# ----------------------------------------------------------------------------
# Kernel 1: get_abs_depth elementwise hot path
#   rel   = 1 - postprocess(depth)            (postprocess: x/2 + 0.5)
#   abs   = rel * (dmax - dmin) + dmin        (to_abs_depth, per-batch minmax)
#   abs[postprocess(silhou) < 0.5] = 0        (silhouette masking)
# ----------------------------------------------------------------------------
def _abs_depth_kernel(minmax_ref, depth_ref, silhou_ref, out_ref):
    n = pl.program_id(0)
    d = depth_ref[0, 0]                       # (th, W)
    s = silhou_ref[0, 0]                      # (th, W)
    rel = 1.0 - (d * 0.5 + 0.5)               # 1 - postprocess(depth)
    dmin = minmax_ref[n, 0]                   # scalar reads from SMEM
    dmax = minmax_ref[n, 1]
    absd = rel * (dmax - dmin) + dmin         # to_abs_depth
    sil = s * 0.5 + 0.5                       # postprocess(silhou)
    out_ref[0, 0] = jnp.where(sil < 0.5, 0.0, absd)


def abs_depth(depth, depth_minmax, silhou):
    N, C, H, W = depth.shape
    # Tile H so there are >2 grid steps (pipelining / 2-TC balance on v7x),
    # while keeping blocks large (per-step overhead dominates tiny tiles).
    th = H // 2 if (H % 16 == 0) else H
    return pl.pallas_call(
        _abs_depth_kernel,
        out_shape=jax.ShapeDtypeStruct((N, C, H, W), jnp.float32),
        grid=(N, H // th),
        in_specs=[
            pl.BlockSpec(memory_space=pltpu.MemorySpace.SMEM),            # (N,2)
            pl.BlockSpec((1, 1, th, W), lambda n, t: (n, 0, t, 0)),       # depth
            pl.BlockSpec((1, 1, th, W), lambda n, t: (n, 0, t, 0)),       # silhou
        ],
        out_specs=pl.BlockSpec((1, 1, th, W), lambda n, t: (n, 0, t, 0)),
        compiler_params=pltpu.CompilerParams(
            dimension_semantics=("parallel", "parallel")),
    )(depth_minmax, depth, silhou)


# ----------------------------------------------------------------------------
# Kernel 2: fully fused net2 (stand-in for Uresnet, 1->C->C->C->1 channels)
#
# Layout: activations are (C, HW2) with the flattened spatial map on the LANE
# axis.  Each spatial row is stored with one trailing zero "gap" lane
# (row stride WS = W + 1), so a 3x3 tap is a constant flat shift
# s = dh*WS + dw read from a zero-halo'd VMEM scratch -- the gap lanes and the
# halo provide exact zero 'same'-padding with no im2col and no per-tap masks.
# Gap lanes are re-zeroed (one mask multiply) after each layer.
# ----------------------------------------------------------------------------
def _net2_fused_kernel(x_ref, gap_ref, w1_ref, b1_ref, w2_ref, b2_ref,
                       w3_ref, b3_ref, w4_ref, b4_ref, out_ref, pad_ref,
                       *, WS, P, C):
    f32 = jnp.float32
    HW2 = x_ref.shape[-1]

    # Zero the halo'd scratch; halo regions stay zero, interior is overwritten
    # per layer.  (Re-done every grid step so 'parallel' scheduling is safe.)
    pad_ref[...] = jnp.zeros(pad_ref.shape, f32)

    gap = gap_ref[...]                          # (1, HW2): 1 on pixels, 0 on gaps
    offs = [(kh - 1) * WS + (kw - 1) for kh in range(3) for kw in range(3)]

    # ---- layer 1: 1 -> C, ReLU (Cin=1 -> broadcast outer product, VPU) ----
    pad_ref[0:1, P:P + HW2] = x_ref[0]
    acc = jnp.zeros((C, HW2), f32)
    for t, s in enumerate(offs):
        xs = pad_ref[0:1, P + s:P + s + HW2]    # (1, HW2)
        acc = acc + w1_ref[t] * xs              # (C,1)*(1,HW2) -> (C,HW2)
    h1 = jnp.maximum(acc + b1_ref[...], 0.0) * gap

    # ---- layer 2: C -> C, ReLU (MXU, bf16 operands, f32 accumulate) ----
    pad_ref[0:C, P:P + HW2] = h1
    acc = jnp.zeros((C, HW2), f32)
    for t, s in enumerate(offs):
        xs = pad_ref[0:C, P + s:P + s + HW2].astype(jnp.bfloat16)
        acc = acc + jnp.dot(w2_ref[t], xs, preferred_element_type=f32)
    h2 = jnp.maximum(acc + b2_ref[...], 0.0) * gap

    # ---- layer 3: C -> C, + residual(h1), ReLU ----
    pad_ref[0:C, P:P + HW2] = h2
    acc = jnp.zeros((C, HW2), f32)
    for t, s in enumerate(offs):
        xs = pad_ref[0:C, P + s:P + s + HW2].astype(jnp.bfloat16)
        acc = acc + jnp.dot(w3_ref[t], xs, preferred_element_type=f32)
    h3 = jnp.maximum(acc + b3_ref[...] + h1, 0.0) * gap

    # ---- layer 4: C -> 1 (per-channel weights, sublane reduce) ----
    pad_ref[0:C, P:P + HW2] = h3
    acc = jnp.zeros((C, HW2), f32)
    for t, s in enumerate(offs):
        xs = pad_ref[0:C, P + s:P + s + HW2]    # (C, HW2)
        acc = acc + w4_ref[t] * xs              # (C,1)*(C,HW2)
    out = jnp.sum(acc, axis=0, keepdims=True) + b4_ref[...]   # (1, HW2)
    out_ref[0] = out.astype(out_ref.dtype)      # lane-dense store over HW2


def init_net2_params(key, cmid=8):
    ks = jax.random.split(key, 4)

    def w(k, shape):
        fan_in = shape[0] * shape[1] * shape[2]
        return jax.random.normal(k, shape, jnp.float32) * (1.0 / jnp.sqrt(fan_in))

    return {
        "w1": w(ks[0], (3, 3, 1, cmid)),    "b1": jnp.zeros((cmid,), jnp.float32),
        "w2": w(ks[1], (3, 3, cmid, cmid)), "b2": jnp.zeros((cmid,), jnp.float32),
        "w3": w(ks[2], (3, 3, cmid, cmid)), "b3": jnp.zeros((cmid,), jnp.float32),
        "w4": w(ks[3], (3, 3, cmid, 1)),    "b4": jnp.zeros((1,), jnp.float32),
    }


def net2_forward(params, sph_nchw):
    """Fused 4-layer conv net on (N,1,Hp,Wp) spherical maps."""
    N, _, Hp, Wp = sph_nchw.shape
    C = params["w1"].shape[-1]
    WS = Wp + 1                           # row stride incl. one zero gap lane
    HW2 = Hp * WS                         # flattened, row-gapped spatial size
    P = ((WS + 1 + 127) // 128) * 128     # vertical-halo size (>= WS+1), aligned
    PADW = HW2 + 2 * P                    # scratch width (fits VMEM even at 160x160)

    # Row-gapped flat input: append one zero column per row, flatten spatial.
    x = jnp.pad(sph_nchw, ((0, 0), (0, 0), (0, 0), (0, 1)))     # (N,1,Hp,WS)
    x = x.reshape(N, 1, HW2).astype(jnp.float32)

    # Gap mask: 1.0 on real pixels, 0.0 on the per-row gap lane.
    col = jnp.arange(HW2, dtype=jnp.int32) % WS
    gap_mask = (col < Wp).astype(jnp.float32).reshape(1, HW2)

    def tapw(w):   # (3, 3, Cin, Cout) -> (9, Cout, Cin)
        return jnp.transpose(w.reshape(9, w.shape[2], w.shape[3]), (0, 2, 1))

    w1 = tapw(params["w1"]).astype(jnp.float32)              # (9, C, 1)
    w2 = tapw(params["w2"]).astype(jnp.bfloat16)              # (9, C, C)
    w3 = tapw(params["w3"]).astype(jnp.bfloat16)              # (9, C, C)
    w4 = params["w4"].reshape(9, C, 1).astype(jnp.float32)    # (9, C, 1)
    b1 = params["b1"].reshape(C, 1).astype(jnp.float32)
    b2 = params["b2"].reshape(C, 1).astype(jnp.float32)
    b3 = params["b3"].reshape(C, 1).astype(jnp.float32)
    b4 = params["b4"].reshape(1, 1).astype(jnp.float32)

    kernel = partial(_net2_fused_kernel, WS=WS, P=P, C=C)

    out = pl.pallas_call(
        kernel,
        out_shape=jax.ShapeDtypeStruct((N, 1, HW2), jnp.float32),
        grid=(N,),
        in_specs=[
            pl.BlockSpec((1, 1, HW2), lambda n: (n, 0, 0)),      # x (flat, gapped)
            pl.BlockSpec((1, HW2), lambda n: (0, 0)),            # gap mask
            pl.BlockSpec((9, C, 1), lambda n: (0, 0, 0)),        # w1
            pl.BlockSpec((C, 1), lambda n: (0, 0)),              # b1
            pl.BlockSpec((9, C, C), lambda n: (0, 0, 0)),        # w2 (bf16)
            pl.BlockSpec((C, 1), lambda n: (0, 0)),              # b2
            pl.BlockSpec((9, C, C), lambda n: (0, 0, 0)),        # w3 (bf16)
            pl.BlockSpec((C, 1), lambda n: (0, 0)),              # b3
            pl.BlockSpec((9, C, 1), lambda n: (0, 0, 0)),        # w4
            pl.BlockSpec((1, 1), lambda n: (0, 0)),              # b4
        ],
        out_specs=pl.BlockSpec((1, 1, HW2), lambda n: (n, 0, 0)),
        scratch_shapes=[pltpu.VMEM((C, PADW), jnp.float32)],     # zero-halo buffer
        compiler_params=pltpu.CompilerParams(
            dimension_semantics=("parallel",)),
        # NOTE: at the real Uresnet channel widths, raise vmem_limit_bytes and
        # re-derive tiling for v7x's 64 MiB VMEM; not needed for this net.
    )(x, gap_mask, w1, b1, w2, b2, w3, b3, w4, b4)

    # Drop the gap lanes, back to (N, 1, Hp, Wp).
    return out.reshape(N, 1, Hp, WS)[..., :Wp]


# ----------------------------------------------------------------------------
# sph_pad: wrap along width, edge (replicate) along height (cf. Model.preprocess)
# ----------------------------------------------------------------------------
def sph_pad(sph_nchw, margin):
    x = jnp.pad(sph_nchw, ((0, 0), (0, 0), (0, 0), (margin, margin)), mode="wrap")
    x = jnp.pad(x, ((0, 0), (0, 0), (margin, margin), (0, 0)), mode="edge")
    return x


# ----------------------------------------------------------------------------
# Net.forward
# ----------------------------------------------------------------------------
def net_forward(params, out1_depth, out1_depth_minmax, silhou, spherical_depth,
                padding_margin=4):
    # get_abs_depth()
    pred_abs_depth = abs_depth(out1_depth, out1_depth_minmax, silhou)
    pred_abs_depth = jnp.transpose(pred_abs_depth, (0, 1, 3, 2))   # .permute(0,1,3,2)
    pred_abs_depth = jnp.flip(pred_abs_depth, axis=2)              # torch.flip(., [2])

    # TODO(synk): proj = Camera_back_projection_layer(pred_abs_depth); proj*50 omitted.

    # load_offline branch of the forward: sph_in = input_struct.spherical_depth
    sph_in = sph_pad(spherical_depth, padding_margin)

    out_2_spherical = net2_forward(params, sph_in)

    return {
        "pred_abs_depth": pred_abs_depth,
        "pred_sph_partial": sph_in,
        "pred_sph_full": out_2_spherical,
    }


if __name__ == "__main__":
    key = jax.random.PRNGKey(0)
    kd, kmin, kmax, ks, ksph, kp = jax.random.split(key, 6)

    N, H, W = 2, 16, 16          # depth / silhouette resolution (real model: 480x480)
    S = 16                       # spherical map size (real model: 128)
    margin = 4                   # padding_margin (real model: 16)

    out1_depth = jax.random.normal(kd, (N, 1, H, W), jnp.float32)         # net1 'depth'
    dmin = jax.random.uniform(kmin, (N, 1), minval=0.2, maxval=0.4)
    dmax = dmin + jax.random.uniform(kmax, (N, 1), minval=0.2, maxval=0.4)
    out1_depth_minmax = jnp.concatenate([dmin, dmax], axis=1)             # (N, 2)
    silhou = jax.random.normal(ks, (N, 1, H, W), jnp.float32)
    spherical_depth = jax.random.uniform(ksph, (N, 1, S, S), jnp.float32)

    params = init_net2_params(kp, cmid=8)

    fwd = jax.jit(net_forward, static_argnames=("padding_margin",))
    out = fwd(params, out1_depth, out1_depth_minmax, silhou, spherical_depth,
              padding_margin=margin)
    jax.block_until_ready(out)

    assert out["pred_abs_depth"].shape == (N, 1, W, H)
    assert out["pred_sph_partial"].shape == (N, 1, S + 2 * margin, S + 2 * margin)
    assert out["pred_sph_full"].shape == (N, 1, S + 2 * margin, S + 2 * margin)
    print("KERNEL_OK")
</pallas_src>

<mosaic_0001>
module attributes {stable_mosaic.version = 11 : i64} {
  func.func @_abs_depth_kernel(%arg0: i32, %arg1: i32, %arg2: memref<2x2xf32, #tpu.memory_space<smem>>, %arg3: memref<1x1x8x16xf32, #tpu.memory_space<vmem>>, %arg4: memref<1x1x8x16xf32, #tpu.memory_space<vmem>>, %arg5: memref<1x1x8x16xf32, #tpu.memory_space<vmem>>) attributes {dimension_semantics = [#tpu.dimension_semantics<parallel>, #tpu.dimension_semantics<parallel>], iteration_bounds = array<i64: 2, 2>, scalar_prefetch = 0 : i64, scratch_operands = 0 : i64, tpu.core_type = #tpu.core_type<tc>, window_params = [{transform_indices = @transform_0, window_bounds = array<i64: 2, 2>}, {transform_indices = @transform_1, window_bounds = array<i64: 1, 1, 8, 16>}, {transform_indices = @transform_2, window_bounds = array<i64: 1, 1, 8, 16>}, {transform_indices = @transform_3, window_bounds = array<i64: 1, 1, 8, 16>}]} {
    %c0 = arith.constant 0 : index
    %c0_0 = arith.constant 0 : index
    %c0_1 = arith.constant 0 : index
    %c0_2 = arith.constant 0 : index
    %0 = vector.load %arg3[%c0, %c0_0, %c0_1, %c0_2] : memref<1x1x8x16xf32, #tpu.memory_space<vmem>>, vector<1x1x8x16xf32>
    %1 = vector.shape_cast %0 : vector<1x1x8x16xf32> to vector<8x16xf32>
    %c0_3 = arith.constant 0 : index
    %c0_4 = arith.constant 0 : index
    %c0_5 = arith.constant 0 : index
    %c0_6 = arith.constant 0 : index
    %2 = vector.load %arg4[%c0_3, %c0_4, %c0_5, %c0_6] : memref<1x1x8x16xf32, #tpu.memory_space<vmem>>, vector<1x1x8x16xf32>
    %3 = vector.shape_cast %2 : vector<1x1x8x16xf32> to vector<8x16xf32>
    %cst = arith.constant 5.000000e-01 : f32
    %4 = vector.broadcast %cst : f32 to vector<8x16xf32>
    %5 = arith.mulf %1, %4 : vector<8x16xf32>
    %cst_7 = arith.constant 5.000000e-01 : f32
    %6 = vector.broadcast %cst_7 : f32 to vector<8x16xf32>
    %7 = arith.addf %5, %6 : vector<8x16xf32>
    %cst_8 = arith.constant 1.000000e+00 : f32
    %8 = vector.broadcast %cst_8 : f32 to vector<8x16xf32>
    %9 = arith.subf %8, %7 : vector<8x16xf32>
    %10 = arith.index_cast %arg0 : i32 to index
    %c0_9 = arith.constant 0 : index
    %11 = memref.load %arg2[%10, %c0_9] : memref<2x2xf32, #tpu.memory_space<smem>>
    %12 = arith.index_cast %arg0 : i32 to index
    %c1 = arith.constant 1 : index
    %13 = memref.load %arg2[%12, %c1] : memref<2x2xf32, #tpu.memory_space<smem>>
    %14 = arith.subf %13, %11 : f32
    %15 = vector.broadcast %14 : f32 to vector<8x16xf32>
    %16 = arith.mulf %9, %15 : vector<8x16xf32>
    %17 = vector.broadcast %11 : f32 to vector<8x16xf32>
    %18 = arith.addf %16, %17 : vector<8x16xf32>
    %cst_10 = arith.constant 5.000000e-01 : f32
    %19 = vector.broadcast %cst_10 : f32 to vector<8x16xf32>
    %20 = arith.mulf %3, %19 : vector<8x16xf32>
    %cst_11 = arith.constant 5.000000e-01 : f32
    %21 = vector.broadcast %cst_11 : f32 to vector<8x16xf32>
    %22 = arith.addf %20, %21 : vector<8x16xf32>
    %cst_12 = arith.constant 5.000000e-01 : f32
    %23 = vector.broadcast %cst_12 : f32 to vector<8x16xf32>
    %24 = arith.cmpf olt, %22, %23 : vector<8x16xf32>
    %cst_13 = arith.constant 0.000000e+00 : f32
    %25 = vector.broadcast %cst_13 : f32 to vector<8x16xf32>
    %26 = arith.select %24, %25, %18 : vector<8x16xi1>, vector<8x16xf32>
    %c0_14 = arith.constant 0 : index
    %c0_15 = arith.constant 0 : index
    %c0_16 = arith.constant 0 : index
    %c0_17 = arith.constant 0 : index
    %27 = vector.load %arg5[%c0_14, %c0_15, %c0_16, %c0_17] : memref<1x1x8x16xf32, #tpu.memory_space<vmem>>, vector<1x1x8x16xf32>
    %28 = vector.shape_cast %27 : vector<1x1x8x16xf32> to vector<8x16xf32>
    %29 = vector.shape_cast %26 : vector<8x16xf32> to vector<1x1x8x16xf32>
    tpu.vector_store %arg5[%c0_14, %c0_15, %c0_16, %c0_17], %29 {strides = array<i32>} : memref<1x1x8x16xf32, #tpu.memory_space<vmem>>, vector<1x1x8x16xf32>,
    return
  }
  func.func @transform_0(%arg0: i32, %arg1: i32) -> (i32, i32) {
    %c0_i32 = arith.constant 0 : i32
    %c0_i32_0 = arith.constant 0 : i32
    %c0_i32_1 = arith.constant 0 : i32
    return %c0_i32, %c0_i32_0 : i32, i32
  }
  func.func @transform_1(%arg0: i32, %arg1: i32) -> (i32, i32, i32, i32) {
    %c0_i32 = arith.constant 0 : i32
    %c0_i32_0 = arith.constant 0 : i32
    %c0_i32_1 = arith.constant 0 : i32
    return %arg0, %c0_i32, %arg1, %c0_i32_0 : i32, i32, i32, i32
  }
  func.func @transform_2(%arg0: i32, %arg1: i32) -> (i32, i32, i32, i32) {
    %c0_i32 = arith.constant 0 : i32
    %c0_i32_0 = arith.constant 0 : i32
    %c0_i32_1 = arith.constant 0 : i32
    return %arg0, %c0_i32, %arg1, %c0_i32_0 : i32, i32, i32, i32
  }
  func.func @transform_3(%arg0: i32, %arg1: i32) -> (i32, i32, i32, i32) {
    %c0_i32 = arith.constant 0 : i32
    %c0_i32_0 = arith.constant 0 : i32
    %c0_i32_1 = arith.constant 0 : i32
    return %arg0, %c0_i32, %arg1, %c0_i32_0 : i32, i32, i32, i32
  }
}

module attributes {stable_mosaic.version = 11 : i64} {
  func.func @_net2_fused_kernel(%arg0: i32, %arg1: memref<1x1x600xf32, #tpu.memory_space<vmem>>, %arg2: memref<1x600xf32, #tpu.memory_space<vmem>>, %arg3: memref<9x8x1xf32, #tpu.memory_space<vmem>>, %arg4: memref<8x1xf32, #tpu.memory_space<vmem>>, %arg5: memref<9x8x8xbf16, #tpu.memory_space<vmem>>, %arg6: memref<8x1xf32, #tpu.memory_space<vmem>>, %arg7: memref<9x8x8xbf16, #tpu.memory_space<vmem>>, %arg8: memref<8x1xf32, #tpu.memory_space<vmem>>, %arg9: memref<9x8x1xf32, #tpu.memory_space<vmem>>, %arg10: memref<1x1xf32, #tpu.memory_space<vmem>>, %arg11: memref<1x1x600xf32, #tpu.memory_space<vmem>>, %arg12: memref<8x856xf32, #tpu.memory_space<vmem>>) attributes {dimension_semantics = [#tpu.dimension_semantics<parallel>], iteration_bounds = array<i64: 2>, scalar_prefetch = 0 : i64, scratch_operands = 1 : i64, tpu.core_type = #tpu.core_type<tc>, window_params = [{transform_indices = @transform_0, window_bounds = array<i64: 1, 1, 600>}, {pipeline_mode = #tpu.pipeline_mode<synchronous>, transform_indices = @transform_1, window_bounds = array<i64: 1, 600>}, {pipeline_mode = #tpu.pipeline_mode<synchronous>, transform_indices = @transform_2, window_bounds = array<i64: 9, 8, 1>}, {pipeline_mode = #tpu.pipeline_mode<synchronous>, transform_indices = @transform_3, window_bounds = array<i64: 8, 1>}, {pipeline_mode = #tpu.pipeline_mode<synchronous>, transform_indices = @transform_4, window_bounds = array<i64: 9, 8, 8>}, {pipeline_mode = #tpu.pipeline_mode<synchronous>, transform_indices = @transform_5, window_bounds = array<i64: 8, 1>}, {pipeline_mode = #tpu.pipeline_mode<synchronous>, transform_indices = @transform_6, window_bounds = array<i64: 9, 8, 8>}, {pipeline_mode = #tpu.pipeline_mode<synchronous>, transform_indices = @transform_7, window_bounds = array<i64: 8, 1>}, {pipeline_mode = #tpu.pipeline_mode<synchronous>, transform_indices = @transform_8, window_bounds = array<i64: 9, 8, 1>}, {pipeline_mode = #tpu.pipeline_mode<synchronous>, transform_indices = @transform_9, window_bounds = array<i64: 1, 1>}, {transform_indices = @transform_10, window_bounds = array<i64: 1, 1, 600>}]} {
    %cst = arith.constant 0.000000e+00 : f32
    %0 = vector.broadcast %cst : f32 to vector<8x856xf32>
    %c0 = arith.constant 0 : index
    %c0_0 = arith.constant 0 : index
    %1 = vector.load %arg12[%c0, %c0_0] : memref<8x856xf32, #tpu.memory_space<vmem>>, vector<8x856xf32>
    tpu.vector_store %arg12[%c0, %c0_0], %0 {strides = array<i32>} : memref<8x856xf32, #tpu.memory_space<vmem>>, vector<8x856xf32>,
    %c0_1 = arith.constant 0 : index
    %c0_2 = arith.constant 0 : index
    %2 = vector.load %arg2[%c0_1, %c0_2] : memref<1x600xf32, #tpu.memory_space<vmem>>, vector<1x600xf32>
    %c0_3 = arith.constant 0 : index
    %c0_4 = arith.constant 0 : index
    %c0_5 = arith.constant 0 : index
    %3 = vector.load %arg1[%c0_3, %c0_4, %c0_5] : memref<1x1x600xf32, #tpu.memory_space<vmem>>, vector<1x1x600xf32>
    %4 = vector.shape_cast %3 : vector<1x1x600xf32> to vector<1x600xf32>
    %c0_6 = arith.constant 0 : index
    %c128 = arith.constant 128 : index
    %5 = vector.load %arg12[%c0_6, %c128] : memref<8x856xf32, #tpu.memory_space<vmem>>, vector<1x600xf32>
    tpu.vector_store %arg12[%c0_6, %c128], %4 {strides = array<i32>} : memref<8x856xf32, #tpu.memory_space<vmem>>, vector<1x600xf32>,
    %cst_7 = arith.constant 0.000000e+00 : f32
    %6 = vector.broadcast %cst_7 : f32 to vector<8x600xf32>
    %c0_8 = arith.constant 0 : index
    %c102 = arith.constant 102 : index
    %7 = vector.load %arg12[%c0_8, %c102] : memref<8x856xf32, #tpu.memory_space<vmem>>, vector<1x600xf32>
    %c0_9 = arith.constant 0 : index
    %c0_10 = arith.constant 0 : index
    %c0_11 = arith.constant 0 : index
    %8 = vector.load %arg3[%c0_9, %c0_10, %c0_11] : memref<9x8x1xf32, #tpu.memory_space<vmem>>, vector<1x8x1xf32>
    %9 = vector.shape_cast %8 : vector<1x8x1xf32> to vector<8x1xf32>
    %10 = vector.broadcast %9 : vector<8x1xf32> to vector<8x600xf32>
    %11 = vector.broadcast %7 : vector<1x600xf32> to vector<8x600xf32>
    %12 = arith.mulf %10, %11 : vector<8x600xf32>
    %13 = arith.addf %6, %12 : vector<8x600xf32>
    %c0_12 = arith.constant 0 : index
    %c103 = arith.constant 103 : index
    %14 = vector.load %arg12[%c0_12, %c103] : memref<8x856xf32, #tpu.memory_space<vmem>>, vector<1x600xf32>
    %c1 = arith.constant 1 : index
    %c0_13 = arith.constant 0 : index
    %c0_14 = arith.constant 0 : index
    %15 = vector.load %arg3[%c1, %c0_13, %c0_14] : memref<9x8x1xf32, #tpu.memory_space<vmem>>, vector<1x8x1xf32>
    %16 = vector.shape_cast %15 : vector<1x8x1xf32> to vector<8x1xf32>
    %17 = vector.broadcast %16 : vector<8x1xf32> to vector<8x600xf32>
    %18 = vector.broadcast %14 : vector<1x600xf32> to vector<8x600xf32>
    %19 = arith.mulf %17, %18 : vector<8x600xf32>
    %20 = arith.addf %13, %19 : vector<8x600xf32>
    %c0_15 = arith.constant 0 : index
    %c104 = arith.constant 104 : index
    %21 = vector.load %arg12[%c0_15, %c104] : memref<8x856xf32, #tpu.memory_space<vmem>>, vector<1x600xf32>
    %c2 = arith.constant 2 : index
    %c0_16 = arith.constant 0 : index
    %c0_17 = arith.constant 0 : index
    %22 = vector.load %arg3[%c2, %c0_16, %c0_17] : memref<9x8x1xf32, #tpu.memory_space<vmem>>, vector<1x8x1xf32>
    %23 = vector.shape_cast %22 : vector<1x8x1xf32> to vector<8x1xf32>
    %24 = vector.broadcast %23 : vector<8x1xf32> to vector<8x600xf32>
    %25 = vector.broadcast %21 : vector<1x600xf32> to vector<8x600xf32>
    %26 = arith.mulf %24, %25 : vector<8x600xf32>
    %27 = arith.addf %20, %26 : vector<8x600xf32>
    %c0_18 = arith.constant 0 : index
    %c127 = arith.constant 127 : index
    %28 = vector.load %arg12[%c0_18, %c127] : memref<8x856xf32, #tpu.memory_space<vmem>>, vector<1x600xf32>
    %c3 = arith.constant 3 : index
    %c0_19 = arith.constant 0 : index
    %c0_20 = arith.constant 0 : index
    %29 = vector.load %arg3[%c3, %c0_19, %c0_20] : memref<9x8x1xf32, #tpu.memory_space<vmem>>, vector<1x8x1xf32>
    %30 = vector.shape_cast %29 : vector<1x8x1xf32> to vector<8x1xf32>
    %31 = vector.broadcast %30 : vector<8x1xf32> to vector<8x600xf32>
    %32 = vector.broadcast %28 : vector<1x600xf32> to vector<8x600xf32>
    %33 = arith.mulf %31, %32 : vector<8x600xf32>
    %34 = arith.addf %27, %33 : vector<8x600xf32>
    %c0_21 = arith.constant 0 : index
    %c128_22 = arith.constant 128 : index
    %35 = vector.load %arg12[%c0_21, %c128_22] : memref<8x856xf32, #tpu.memory_space<vmem>>, vector<1x600xf32>
    %c4 = arith.constant 4 : index
    %c0_23 = arith.constant 0 : index
    %c0_24 = arith.constant 0 : index
    %36 = vector.load %arg3[%c4, %c0_23, %c0_24] : memref<9x8x1xf32, #tpu.memory_space<vmem>>, vector<1x8x1xf32>
    %37 = vector.shape_cast %36 : vector<1x8x1xf32> to vector<8x1xf32>
    %38 = vector.broadcast %37 : vector<8x1xf32> to vector<8x600xf32>
    %39 = vector.broadcast %35 : vector<1x600xf32> to vector<8x600xf32>
    %40 = arith.mulf %38, %39 : vector<8x600xf32>
    %41 = arith.addf %34, %40 : vector<8x600xf32>
    %c0_25 = arith.constant 0 : index
    %c129 = arith.constant 129 : index
    %42 = vector.load %arg12[%c0_25, %c129] : memref<8x856xf32, #tpu.memory_space<vmem>>, vector<1x600xf32>
    %c5 = arith.constant 5 : index
    %c0_26 = arith.constant 0 : index
    %c0_27 = arith.constant 0 : index
    %43 = vector.load %arg3[%c5, %c0_26, %c0_27] : memref<9x8x1xf32, #tpu.memory_space<vmem>>, vector<1x8x1xf32>
    %44 = vector.shape_cast %43 : vector<1x8x1xf32> to vector<8x1xf32>
    %45 = vector.broadcast %44 : vector<8x1xf32> to vector<8x600xf32>
    %46 = vector.broadcast %42 : vector<1x600xf32> to vector<8x600xf32>
    %47 = arith.mulf %45, %46 : vector<8x600xf32>
    %48 = arith.addf %41, %47 : vector<8x600xf32>
    %c0_28 = arith.constant 0 : index
    %c152 = arith.constant 152 : index
    %49 = vector.load %arg12[%c0_28, %c152] : memref<8x856xf32, #tpu.memory_space<vmem>>, vector<1x600xf32>
    %c6 = arith.constant 6 : index
    %c0_29 = arith.constant 0 : index
    %c0_30 = arith.constant 0 : index
    %50 = vector.load %arg3[%c6, %c0_29, %c0_30] : memref<9x8x1xf32, #tpu.memory_space<vmem>>, vector<1x8x1xf32>
    %51 = vector.shape_cast %50 : vector<1x8x1xf32> to vector<8x1xf32>
    %52 = vector.broadcast %51 : vector<8x1xf32> to vector<8x600xf32>
    %53 = vector.broadcast %49 : vector<1x600xf32> to vector<8x600xf32>
    %54 = arith.mulf %52, %53 : vector<8x600xf32>
    %55 = arith.addf %48, %54 : vector<8x600xf32>
    %c0_31 = arith.constant 0 : index
    %c153 = arith.constant 153 : index
    %56 = vector.load %arg12[%c0_31, %c153] : memref<8x856xf32, #tpu.memory_space<vmem>>, vector<1x600xf32>
    %c7 = arith.constant 7 : index
    %c0_32 = arith.constant 0 : index
    %c0_33 = arith.constant 0 : index
    %57 = vector.load %arg3[%c7, %c0_32, %c0_33] : memref<9x8x1xf32, #tpu.memory_space<vmem>>, vector<1x8x1xf32>
    %58 = vector.shape_cast %57 : vector<1x8x1xf32> to vector<8x1xf32>
    %59 = vector.broadcast %58 : vector<8x1xf32> to vector<8x600xf32>
    %60 = vector.broadcast %56 : vector<1x600xf32> to vector<8x600xf32>
    %61 = arith.mulf %59, %60 : vector<8x600xf32>
    %62 = arith.addf %55, %61 : vector<8x600xf32>
    %c0_34 = arith.constant 0 : index
    %c154 = arith.constant 154 : index
    %63 = vector.load %arg12[%c0_34, %c154] : memref<8x856xf32, #tpu.memory_space<vmem>>, vector<1x600xf32>
    %c8 = arith.constant 8 : index
    %c0_35 = arith.constant 0 : index
    %c0_36 = arith.constant 0 : index
    %64 = vector.load %arg3[%c8, %c0_35, %c0_36] : memref<9x8x1xf32, #tpu.memory_space<vmem>>, vector<1x8x1xf32>
    %65 = vector.shape_cast %64 : vector<1x8x1xf32> to vector<8x1xf32>
    %66 = vector.broadcast %65 : vector<8x1xf32> to vector<8x600xf32>
    %67 = vector.broadcast %63 : vector<1x600xf32> to vector<8x600xf32>
    %68 = arith.mulf %66, %67 : vector<8x600xf32>
    %69 = arith.addf %62, %68 : vector<8x600xf32>
    %c0_37 = arith.constant 0 : index
    %c0_38 = arith.constant 0 : index
    %70 = vector.load %arg4[%c0_37, %c0_38] : memref<8x1xf32, #tpu.memory_space<vmem>>, vector<8x1xf32>
    %71 = vector.broadcast %70 : vector<8x1xf32> to vector<8x600xf32>
    %72 = arith.addf %69, %71 : vector<8x600xf32>
    %cst_39 = arith.constant 0.000000e+00 : f32
    %73 = vector.broadcast %cst_39 : f32 to vector<8x600xf32>
    %74 = arith.maximumf %72, %73 : vector<8x600xf32>
    %75 = vector.broadcast %2 : vector<1x600xf32> to vector<8x600xf32>
    %76 = arith.mulf %74, %75 : vector<8x600xf32>
    %c0_40 = arith.constant 0 : index
    %c128_41 = arith.constant 128 : index
    %77 = vector.load %arg12[%c0_40, %c128_41] : memref<8x856xf32, #tpu.memory_space<vmem>>, vector<8x600xf32>
    tpu.vector_store %arg12[%c0_40, %c128_41], %76 {strides = array<i32>} : memref<8x856xf32, #tpu.memory_space<vmem>>, vector<8x600xf32>,
    %cst_42 = arith.constant 0.000000e+00 : f32
    %78 = vector.broadcast %cst_42 : f32 to vector<8x600xf32>
    %c0_43 = arith.constant 0 : index
    %c102_44 = arith.constant 102 : index
    %79 = vector.load %arg12[%c0_43, %c102_44] : memref<8x856xf32, #tpu.memory_space<vmem>>, vector<8x600xf32>
    %80 = arith.truncf %79 : vector<8x600xf32> to vector<8x600xbf16>
    %c0_45 = arith.constant 0 : index
    %c0_46 = arith.constant 0 : index
    %c0_47 = arith.constant 0 : index
    %81 = vector.load %arg5[%c0_45, %c0_46, %c0_47] : memref<9x8x8xbf16, #tpu.memory_space<vmem>>, vector<1x8x8xbf16>
    %82 = vector.shape_cast %81 : vector<1x8x8xbf16> to vector<8x8xbf16>
    %cst_48 = arith.constant dense<0.000000e+00> : vector<8x600xf32>
    %83 = tpu.matmul %82, %80, %cst_48 {dimension_numbers = #tpu.dot_dimension_numbers<[1], [0], [0], [1], [0, 0, 1, 1], [], []>} : vector<8x8xbf16>, vector<8x600xbf16>, vector<8x600xf32> -> vector<8x600xf32>
    %84 = arith.addf %78, %83 : vector<8x600xf32>
    %c0_49 = arith.constant 0 : index
    %c103_50 = arith.constant 103 : index
    %85 = vector.load %arg12[%c0_49, %c103_50] : memref<8x856xf32, #tpu.memory_space<vmem>>, vector<8x600xf32>
    %86 = arith.truncf %85 : vector<8x600xf32> to vector<8x600xbf16>
    %c1_51 = arith.constant 1 : index
    %c0_52 = arith.constant 0 : index
    %c0_53 = arith.constant 0 : index
    %87 = vector.load %arg5[%c1_51, %c0_52, %c0_53] : memref<9x8x8xbf16, #tpu.memory_space<vmem>>, vector<1x8x8xbf16>
    %88 = vector.shape_cast %87 : vector<1x8x8xbf16> to vector<8x8xbf16>
    %cst_54 = arith.constant dense<0.000000e+00> : vector<8x600xf32>
    %89 = tpu.matmul %88, %86, %cst_54 {dimension_numbers = #tpu.dot_dimension_numbers<[1], [0], [0], [1], [0, 0, 1, 1], [], []>} : vector<8x8xbf16>, vector<8x600xbf16>, vector<8x600xf32> -> vector<8x600xf32>
    %90 = arith.addf %84, %89 : vector<8x600xf32>
    %c0_55 = arith.constant 0 : index
    %c104_56 = arith.constant 104 : index
    %91 = vector.load %arg12[%c0_55, %c104_56] : memref<8x856xf32, #tpu.memory_space<vmem>>, vector<8x600xf32>
    %92 = arith.truncf %91 : vector<8x600xf32> to vector<8x600xbf16>
    %c2_57 = arith.constant 2 : index
    %c0_58 = arith.constant 0 : index
    %c0_59 = arith.constant 0 : index
    %93 = vector.load %arg5[%c2_57, %c0_58, %c0_59] : memref<9x8x8xbf16, #tpu.memory_space<vmem>>, vector<1x8x8xbf16>
    %94 = vector.shape_cast %93 : vector<1x8x8xbf16> to vector<8x8xbf16>
    %cst_60 = arith.constant dense<0.000000e+00> : vector<8x600xf32>
    %95 = tpu.matmul %94, %92, %cst_60 {dimension_numbers = #tpu.dot_dimension_numbers<[1], [0], [0], [1], [0, 0, 1, 1], [], []>} : vector<8x8xbf16>, vector<8x600xbf16>, vector<8x600xf32> -> vector<8x600xf32>
    %96 = arith.addf %90, %95 : vector<8x600xf32>
    %c0_61 = arith.constant 0 : index
    %c127_62 = arith.constant 127 : index
    %97 = vector.load %arg12[%c0_61, %c127_62] : memref<8x856xf32, #tpu.memory_space<vmem>>, vector<8x600xf32>
    %98 = arith.truncf %97 : vector<8x600xf32> to vector<8x600xbf16>
    %c3_63 = arith.constant 3 : index
    %c0_64 = arith.constant 0 : index
    %c0_65 = arith.constant 0 : index
    %99 = vector.load %arg5[%c3_63, %c0_64, %c0_65] : memref<9x8x8xbf16, #tpu.memory_space<vmem>>, vector<1x8x8xbf16>
    %100 = vector.shape_cast %99 : vector<1x8x8xbf16> to vector<8x8xbf16>
    %cst_66 = arith.constant dense<0.000000e+00> : vector<8x600xf32>
    %101 = tpu.matmul %100, %98, %cst_66 {dimension_numbers = #tpu.dot_dimension_numbers<[1], [0], [0], [1], [0, 0, 1, 1], [], []>} : vector<8x8xbf16>, vector<8x600xbf16>, vector<8x600xf32> -> vector<8x600xf32>
    %102 = arith.addf %96, %101 : vector<8x600xf32>
    %c0_67 = arith.constant 0 : index
    %c128_68 = arith.constant 128 : index
    %103 = vector.load %arg12[%c0_67, %c128_68] : memref<8x856xf32, #tpu.memory_space<vmem>>, vector<8x600xf32>
    %104 = arith.truncf %103 : vector<8x600xf32> to vector<8x600xbf16>
    %c4_69 = arith.constant 4 : index
    %c0_70 = arith.constant 0 : index
    %c0_71 = arith.constant 0 : index
    %105 = vector.load %arg5[%c4_69, %c0_70, %c0_71] : memref<9x8x8xbf16, #tpu.memory_space<vmem>>, vector<1x8x8xbf16>
    %106 = vector.shape_cast %105 : vector<1x8x8xbf16> to vector<8x8xbf16>
    %cst_72 = arith.constant dense<0.000000e+00> : vector<8x600xf32>
    %107 = tpu.matmul %106, %104, %cst_72 {dimension_numbers = #tpu.dot_dimension_numbers<[1], [0], [0], [1], [0, 0, 1, 1], [], []>} : vector<8x8xbf16>, vector<8x600xbf16>, vector<8x600xf32> -> vector<8x600xf32>
    %108 = arith.addf %102, %107 : vector<8x600xf32>
    %c0_73 = arith.constant 0 : index
    %c129_74 = arith.constant 129 : index
    %109 = vector.load %arg12[%c0_73, %c129_74] : memref<8x856xf32, #tpu.memory_space<vmem>>, vector<8x600xf32>
    %110 = arith.truncf %109 : vector<8x600xf32> to vector<8x600xbf16>
    %c5_75 = arith.constant 5 : index
    %c0_76 = arith.constant 0 : index
    %c0_77 = arith.constant 0 : index
    %111 = vector.load %arg5[%c5_75, %c0_76, %c0_77] : memref<9x8x8xbf16, #tpu.memory_space<vmem>>, vector<1x8x8xbf16>
    %112 = vector.shape_cast %111 : vector<1x8x8xbf16> to vector<8x8xbf16>
    %cst_78 = arith.constant dense<0.000000e+00> : vector<8x600xf32>
    %113 = tpu.matmul %112, %110, %cst_78 {dimension_numbers = #tpu.dot_dimension_numbers<[1], [0], [0], [1], [0, 0, 1, 1], [], []>} : vector<8x8xbf16>, vector<8x600xbf16>, vector<8x600xf32> -> vector<8x600xf32>
    %114 = arith.addf %108, %113 : vector<8x600xf32>
    %c0_79 = arith.constant 0 : index
    %c152_80 = arith.constant 152 : index
    %115 = vector.load %arg12[%c0_79, %c152_80] : memref<8x856xf32, #tpu.memory_space<vmem>>, vector<8x600xf32>
    %116 = arith.truncf %115 : vector<8x600xf32> to vector<8x600xbf16>
    %c6_81 = arith.constant 6 : index
    %c0_82 = arith.constant 0 : index
    %c0_83 = arith.constant 0 : index
    %117 = vector.load %arg5[%c6_81, %c0_82, %c0_83] : memref<9x8x8xbf16, #tpu.memory_space<vmem>>, vector<1x8x8xbf16>
    %118 = vector.shape_cast %117 : vector<1x8x8xbf16> to vector<8x8xbf16>
    %cst_84 = arith.constant dense<0.000000e+00> : vector<8x600xf32>
    %119 = tpu.matmul %118, %116, %cst_84 {dimension_numbers = #tpu.dot_dimension_numbers<[1], [0], [0], [1], [0, 0, 1, 1], [], []>} : vector<8x8xbf16>, vector<8x600xbf16>, vector<8x600xf32> -> vector<8x600xf32>
    %120 = arith.addf %114, %119 : vector<8x600xf32>
    %c0_85 = arith.constant 0 : index
    %c153_86 = arith.constant 153 : index
    %121 = vector.load %arg12[%c0_85, %c153_86] : memref<8x856xf32, #tpu.memory_space<vmem>>, vector<8x600xf32>
    %122 = arith.truncf %121 : vector<8x600xf32> to vector<8x600xbf16>
    %c7_87 = arith.constant 7 : index
    %c0_88 = arith.constant 0 : index
    %c0_89 = arith.constant 0 : index
    %123 = vector.load %arg5[%c7_87, %c0_88, %c0_89] : memref<9x8x8xbf16, #tpu.memory_space<vmem>>, vector<1x8x8xbf16>
    %124 = vector.shape_cast %123 : vector<1x8x8xbf16> to vector<8x8xbf16>
    %cst_90 = arith.constant dense<0.000000e+00> : vector<8x600xf32>
    %125 = tpu.matmul %124, %122, %cst_90 {dimension_numbers = #tpu.dot_dimension_numbers<[1], [0], [0], [1], [0, 0, 1, 1], [], []>} : vector<8x8xbf16>, vector<8x600xbf16>, vector<8x600xf32> -> vector<8x600xf32>
    %126 = arith.addf %120, %125 : vector<8x600xf32>
    %c0_91 = arith.constant 0 : index
    %c154_92 = arith.constant 154 : index
    %127 = vector.load %arg12[%c0_91, %c154_92] : memref<8x856xf32, #tpu.memory_space<vmem>>, vector<8x600xf32>
    %128 = arith.truncf %127 : vector<8x600xf32> to vector<8x600xbf16>
    %c8_93 = arith.constant 8 : index
    %c0_94 = arith.constant 0 : index
    %c0_95 = arith.constant 0 : index
    %129 = vector.load %arg5[%c8_93, %c0_94, %c0_95] : memref<9x8x8xbf16, #tpu.memory_space<vmem>>, vector<1x8x8xbf16>
    %130 = vector.shape_cast %129 : vector<1x8x8xbf16> to vector<8x8xbf16>
    %cst_96 = arith.constant dense<0.000000e+00> : vector<8x600xf32>
    %131 = tpu.matmul %130, %128, %cst_96 {dimension_numbers = #tpu.dot_dimension_numbers<[1], [0], [0], [1], [0, 0, 1, 1], [], []>} : vector<8x8xbf16>, vector<8x600xbf16>, vector<8x600xf32> -> vector<8x600xf32>
    %132 = arith.addf %126, %131 : vector<8x600xf32>
    %c0_97 = arith.constant 0 : index
    %c0_98 = arith.constant 0 : index
    %133 = vector.load %arg6[%c0_97, %c0_98] : memref<8x1xf32, #tpu.memory_space<vmem>>, vector<8x1xf32>
    %134 = vector.broadcast %133 : vector<8x1xf32> to vector<8x600xf32>
    %135 = arith.addf %132, %134 : vector<8x600xf32>
    %cst_99 = arith.constant 0.000000e+00 : f32
    %136 = vector.broadcast %cst_99 : f32 to vector<8x600xf32>
    %137 = arith.maximumf %135, %136 : vector<8x600xf32>
    %138 = vector.broadcast %2 : vector<1x600xf32> to vector<8x600xf32>
    %139 = arith.mulf %137, %138 : vector<8x600xf32>
    %c0_100 = arith.constant 0 : index
    %c128_101 = arith.constant 128 : index
    %140 = vector.load %arg12[%c0_100, %c128_101] : memref<8x856xf32, #tpu.memory_space<vmem>>, vector<8x600xf32>
    tpu.vector_store %arg12[%c0_100, %c128_101], %139 {strides = array<i32>} : memref<8x856xf32, #tpu.memory_space<vmem>>, vector<8x600xf32>,
    %cst_102 = arith.constant 0.000000e+00 : f32
    %141 = vector.broadcast %cst_102 : f32 to vector<8x600xf32>
    %c0_103 = arith.constant 0 : index
    %c102_104 = arith.constant 102 : index
    %142 = vector.load %arg12[%c0_103, %c102_104] : memref<8x856xf32, #tpu.memory_space<vmem>>, vector<8x600xf32>
    %143 = arith.truncf %142 : vector<8x600xf32> to vector<8x600xbf16>
    %c0_105 = arith.constant 0 : index
    %c0_106 = arith.constant 0 : index
    %c0_107 = arith.constant 0 : index
    %144 = vector.load %arg7[%c0_105, %c0_106, %c0_107] : memref<9x8x8xbf16, #tpu.memory_space<vmem>>, vector<1x8x8xbf16>
    %145 = vector.shape_cast %144 : vector<1x8x8xbf16> to vector<8x8xbf16>
    %cst_108 = arith.constant dense<0.000000e+00> : vector<8x600xf32>
    %146 = tpu.matmul %145, %143, %cst_108 {dimension_numbers = #tpu.dot_dimension_numbers<[1], [0], [0], [1], [0, 0, 1, 1], [], []>} : vector<8x8xbf16>, vector<8x600xbf16>, vector<8x600xf32> -> vector<8x600xf32>
    %147 = arith.addf %141, %146 : vector<8x600xf32>
    %c0_109 = arith.constant 0 : index
    %c103_110 = arith.constant 103 : index
    %148 = vector.load %arg12[%c0_109, %c103_110] : memref<8x856xf32, #tpu.memory_space<vmem>>, vector<8x600xf32>
    %149 = arith.truncf %148 : vector<8x600xf32> to vector<8x600xbf16>
    %c1_111 = arith.constant 1 : index
    %c0_112 = arith.constant 0 : index
    %c0_113 = arith.constant 0 : index
    %150 = vector.load %arg7[%c1_111, %c0_112, %c0_113] : memref<9x8x8xbf16, #tpu.memory_space<vmem>>, vector<1x8x8xbf16>
    %151 = vector.shape_cast %150 : vector<1x8x8xbf16> to vector<8x8xbf16>
    %cst_114 = arith.constant dense<0.000000e+00> : vector<8x600xf32>
    %152 = tpu.matmul %151, %149, %cst_114 {dimension_numbers = #tpu.dot_dimension_numbers<[1], [0], [0], [1], [0, 0, 1, 1], [], []>} : vector<8x8xbf16>, vector<8x600xbf16>, vector<8x600xf32> -> vector<8x600xf32>
    %153 = arith.addf %147, %152 : vector<8x600xf32>
    %c0_115 = arith.constant 0 : index
    %c104_116 = arith.constant 104 : index
    %154 = vector.load %arg12[%c0_115, %c104_116] : memref<8x856xf32, #tpu.memory_space<vmem>>, vector<8x600xf32>
    %155 = arith.truncf %154 : vector<8x600xf32> to vector<8x600xbf16>
    %c2_117 = arith.constant 2 : index
    %c0_118 = arith.constant 0 : index
    %c0_119 = arith.constant 0 : index
    %156 = vector.load %arg7[%c2_117, %c0_118, %c0_119] : memref<9x8x8xbf16, #tpu.memory_space<vmem>>, vector<1x8x8xbf16>
    %157 = vector.shape_cast %156 : vector<1x8x8xbf16> to vector<8x8xbf16>
    %cst_120 = arith.constant dense<0.000000e+00> : vector<8x600xf32>
    %158 = tpu.matmul %157, %155, %cst_120 {dimension_numbers = #tpu.dot_dimension_numbers<[1], [0], [0], [1], [0, 0, 1, 1], [], []>} : vector<8x8xbf16>, vector<8x600xbf16>, vector<8x600xf32> -> vector<8x600xf32>
    %159 = arith.addf %153, %158 : vector<8x600xf32>
    %c0_121 = arith.constant 0 : index
    %c127_122 = arith.constant 127 : index
    %160 = vector.load %arg12[%c0_121, %c127_122] : memref<8x856xf32, #tpu.memory_space<vmem>>, vector<8x600xf32>
    %161 = arith.truncf %160 : vector<8x600xf32> to vector<8x600xbf16>
    %c3_123 = arith.constant 3 : index
    %c0_124 = arith.constant 0 : index
    %c0_125 = arith.constant 0 : index
    %162 = vector.load %arg7[%c3_123, %c0_124, %c0_125] : memref<9x8x8xbf16, #tpu.memory_space<vmem>>, vector<1x8x8xbf16>
    %163 = vector.shape_cast %162 : vector<1x8x8xbf16> to vector<8x8xbf16>
    %cst_126 = arith.constant dense<0.000000e+00> : vector<8x600xf32>
    %164 = tpu.matmul %163, %161, %cst_126 {dimension_numbers = #tpu.dot_dimension_numbers<[1], [0], [0], [1], [0, 0, 1, 1], [], []>} : vector<8x8xbf16>, vector<8x600xbf16>, vector<8x600xf32> -> vector<8x600xf32>
    %165 = arith.addf %159, %164 : vector<8x600xf32>
    %c0_127 = arith.constant 0 : index
    %c128_128 = arith.constant 128 : index
    %166 = vector.load %arg12[%c0_127, %c128_128] : memref<8x856xf32, #tpu.memory_space<vmem>>, vector<8x600xf32>
    %167 = arith.truncf %166 : vector<8x600xf32> to vector<8x600xbf16>
    %c4_129 = arith.constant 4 : index
    %c0_130 = arith.constant 0 : index
    %c0_131 = arith.constant 0 : index
    %168 = vector.load %arg7[%c4_129, %c0_130, %c0_131] : memref<9x8x8xbf16, #tpu.memory_space<vmem>>, vector<1x8x8xbf16>
    %169 = vector.shape_cast %168 : vector<1x8x8xbf16> to vector<8x8xbf16>
    %cst_132 = arith.constant dense<0.000000e+00> : vector<8x600xf32>
    %170 = tpu.matmul %169, %167, %cst_132 {dimension_numbers = #tpu.dot_dimension_numbers<[1], [0], [0], [1], [0, 0, 1, 1], [], []>} : vector<8x8xbf16>, vector<8x600xbf16>, vector<8x600xf32> -> vector<8x600xf32>
    %171 = arith.addf %165, %170 : vector<8x600xf32>
    %c0_133 = arith.constant 0 : index
    %c129_134 = arith.constant 129 : index
    %172 = vector.load %arg12[%c0_133, %c129_134] : memref<8x856xf32, #tpu.memory_space<vmem>>, vector<8x600xf32>
    %173 = arith.truncf %172 : vector<8x600xf32> to vector<8x600xbf16>
    %c5_135 = arith.constant 5 : index
    %c0_136 = arith.constant 0 : index
    %c0_137 = arith.constant 0 : index
    %174 = vector.load %arg7[%c5_135, %c0_136, %c0_137] : memref<9x8x8xbf16, #tpu.memory_space<vmem>>, vector<1x8x8xbf16>
    %175 = vector.shape_cast %174 : vector<1x8x8xbf16> to vector<8x8xbf16>
    %cst_138 = arith.constant dense<0.000000e+00> : vector<8x600xf32>
    %176 = tpu.matmul %175, %173, %cst_138 {dimension_numbers = #tpu.dot_dimension_numbers<[1], [0], [0], [1], [0, 0, 1, 1], [], []>} : vector<8x8xbf16>, vector<8x600xbf16>, vector<8x600xf32> -> vector<8x600xf32>
    %177 = arith.addf %171, %176 : vector<8x600xf32>
    %c0_139 = arith.constant 0 : index
    %c152_140 = arith.constant 152 : index
    %178 = vector.load %arg12[%c0_139, %c152_140] : memref<8x856xf32, #tpu.memory_space<vmem>>, vector<8x600xf32>
    %179 = arith.truncf %178 : vector<8x600xf32> to vector<8x600xbf16>
    %c6_141 = arith.constant 6 : index
    %c0_142 = arith.constant 0 : index
    %c0_143 = arith.constant 0 : index
    %180 = vector.load %arg7[%c6_141, %c0_142, %c0_143] : memref<9x8x8xbf16, #tpu.memory_space<vmem>>, vector<1x8x8xbf16>
    %181 = vector.shape_cast %180 : vector<1x8x8xbf16> to vector<8x8xbf16>
    %cst_144 = arith.constant dense<0.000000e+00> : vector<8x600xf32>
    %182 = tpu.matmul %181, %179, %cst_144 {dimension_numbers = #tpu.dot_dimension_numbers<[1], [0], [0], [1], [0, 0, 1, 1], [], []>} : vector<8x8xbf16>, vector<8x600xbf16>, vector<8x600xf32> -> vector<8x600xf32>
    %183 = arith.addf %177, %182 : vector<8x600xf32>
    %c0_145 = arith.constant 0 : index
    %c153_146 = arith.constant 153 : index
    %184 = vector.load %arg12[%c0_145, %c153_146] : memref<8x856xf32, #tpu.memory_space<vmem>>, vector<8x600xf32>
    %185 = arith.truncf %184 : vector<8x600xf32> to vector<8x600xbf16>
    %c7_147 = arith.constant 7 : index
    %c0_148 = arith.constant 0 : index
    %c0_149 = arith.constant 0 : index
    %186 = vector.load %arg7[%c7_147, %c0_148, %c0_149] : memref<9x8x8xbf16, #tpu.memory_space<vmem>>, vector<1x8x8xbf16>
    %187 = vector.shape_cast %186 : vector<1x8x8xbf16> to vector<8x8xbf16>
    %cst_150 = arith.constant dense<0.000000e+00> : vector<8x600xf32>
    %188 = tpu.matmul %187, %185, %cst_150 {dimension_numbers = #tpu.dot_dimension_numbers<[1], [0], [0], [1], [0, 0, 1, 1], [], []>} : vector<8x8xbf16>, vector<8x600xbf16>, vector<8x600xf32> -> vector<8x600xf32>
    %189 = arith.addf %183, %188 : vector<8x600xf32>
    %c0_151 = arith.constant 0 : index
    %c154_152 = arith.constant 154 : index
    %190 = vector.load %arg12[%c0_151, %c154_152] : memref<8x856xf32, #tpu.memory_space<vmem>>, vector<8x600xf32>
    %191 = arith.truncf %190 : vector<8x600xf32> to vector<8x600xbf16>
    %c8_153 = arith.constant 8 : index
    %c0_154 = arith.constant 0 : index
    %c0_155 = arith.constant 0 : index
    %192 = vector.load %arg7[%c8_153, %c0_154, %c0_155] : memref<9x8x8xbf16, #tpu.memory_space<vmem>>, vector<1x8x8xbf16>
    %193 = vector.shape_cast %192 : vector<1x8x8xbf16> to vector<8x8xbf16>
    %cst_156 = arith.constant dense<0.000000e+00> : vector<8x600xf32>
    %194 = tpu.matmul %193, %191, %cst_156 {dimension_numbers = #tpu.dot_dimension_numbers<[1], [0], [0], [1], [0, 0, 1, 1], [], []>} : vector<8x8xbf16>, vector<8x600xbf16>, vector<8x600xf32> -> vector<8x600xf32>
    %195 = arith.addf %189, %194 : vector<8x600xf32>
    %c0_157 = arith.constant 0 : index
    %c0_158 = arith.constant 0 : index
    %196 = vector.load %arg8[%c0_157, %c0_158] : memref<8x1xf32, #tpu.memory_space<vmem>>, vector<8x1xf32>
    %197 = vector.broadcast %196 : vector<8x1xf32> to vector<8x600xf32>
    %198 = arith.addf %195, %197 : vector<8x600xf32>
    %199 = arith.addf %198, %76 : vector<8x600xf32>
    %cst_159 = arith.constant 0.000000e+00 : f32
    %200 = vector.broadcast %cst_159 : f32 to vector<8x600xf32>
    %201 = arith.maximumf %199, %200 : vector<8x600xf32>
    %202 = vector.broadcast %2 : vector<1x600xf32> to vector<8x600xf32>
    %203 = arith.mulf %201, %202 : vector<8x600xf32>
    %c0_160 = arith.constant 0 : index
    %c128_161 = arith.constant 128 : index
    %204 = vector.load %arg12[%c0_160, %c128_161] : memref<8x856xf32, #tpu.memory_space<vmem>>, vector<8x600xf32>
    tpu.vector_store %arg12[%c0_160, %c128_161], %203 {strides = array<i32>} : memref<8x856xf32, #tpu.memory_space<vmem>>, vector<8x600xf32>,
    %cst_162 = arith.constant 0.000000e+00 : f32
    %205 = vector.broadcast %cst_162 : f32 to vector<8x600xf32>
    %c0_163 = arith.constant 0 : index
    %c102_164 = arith.constant 102 : index
    %206 = vector.load %arg12[%c0_163, %c102_164] : memref<8x856xf32, #tpu.memory_space<vmem>>, vector<8x600xf32>
    %c0_165 = arith.constant 0 : index
    %c0_166 = arith.constant 0 : index
    %c0_167 = arith.constant 0 : index
    %207 = vector.load %arg9[%c0_165, %c0_166, %c0_167] : memref<9x8x1xf32, #tpu.memory_space<vmem>>, vector<1x8x1xf32>
    %208 = vector.shape_cast %207 : vector<1x8x1xf32> to vector<8x1xf32>
    %209 = vector.broadcast %208 : vector<8x1xf32> to vector<8x600xf32>
    %210 = arith.mulf %209, %206 : vector<8x600xf32>
    %211 = arith.addf %205, %210 : vector<8x600xf32>
    %c0_168 = arith.constant 0 : index
    %c103_169 = arith.constant 103 : index
    %212 = vector.load %arg12[%c0_168, %c103_169] : memref<8x856xf32, #tpu.memory_space<vmem>>, vector<8x600xf32>
    %c1_170 = arith.constant 1 : index
    %c0_171 = arith.constant 0 : index
    %c0_172 = arith.constant 0 : index
    %213 = vector.load %arg9[%c1_170, %c0_171, %c0_172] : memref<9x8x1xf32, #tpu.memory_space<vmem>>, vector<1x8x1xf32>
    %214 = vector.shape_cast %213 : vector<1x8x1xf32> to vector<8x1xf32>
    %215 = vector.broadcast %214 : vector<8x1xf32> to vector<8x600xf32>
    %216 = arith.mulf %215, %212 : vector<8x600xf32>
    %217 = arith.addf %211, %216 : vector<8x600xf32>
    %c0_173 = arith.constant 0 : index
    %c104_174 = arith.constant 104 : index
    %218 = vector.load %arg12[%c0_173, %c104_174] : memref<8x856xf32, #tpu.memory_space<vmem>>, vector<8x600xf32>
    %c2_175 = arith.constant 2 : index
    %c0_176 = arith.constant 0 : index
    %c0_177 = arith.constant 0 : index
    %219 = vector.load %arg9[%c2_175, %c0_176, %c0_177] : memref<9x8x1xf32, #tpu.memory_space<vmem>>, vector<1x8x1xf32>
    %220 = vector.shape_cast %219 : vector<1x8x1xf32> to vector<8x1xf32>
    %221 = vector.broadcast %220 : vector<8x1xf32> to vector<8x600xf32>
    %222 = arith.mulf %221, %218 : vector<8x600xf32>
    %223 = arith.addf %217, %222 : vector<8x600xf32>
    %c0_178 = arith.constant 0 : index
    %c127_179 = arith.constant 127 : index
    %224 = vector.load %arg12[%c0_178, %c127_179] : memref<8x856xf32, #tpu.memory_space<vmem>>, vector<8x600xf32>
    %c3_180 = arith.constant 3 : index
    %c0_181 = arith.constant 0 : index
    %c0_182 = arith.constant 0 : index
    %225 = vector.load %arg9[%c3_180, %c0_181, %c0_182] : memref<9x8x1xf32, #tpu.memory_space<vmem>>, vector<1x8x1xf32>
    %226 = vector.shape_cast %225 : vector<1x8x1xf32> to vector<8x1xf32>
    %227 = vector.broadcast %226 : vector<8x1xf32> to vector<8x600xf32>
    %228 = arith.mulf %227, %224 : vector<8x600xf32>
    %229 = arith.addf %223, %228 : vector<8x600xf32>
    %c0_183 = arith.constant 0 : index
    %c128_184 = arith.constant 128 : index
    %230 = vector.load %arg12[%c0_183, %c128_184] : memref<8x856xf32, #tpu.memory_space<vmem>>, vector<8x600xf32>
    %c4_185 = arith.constant 4 : index
    %c0_186 = arith.constant 0 : index
    %c0_187 = arith.constant 0 : index
    %231 = vector.load %arg9[%c4_185, %c0_186, %c0_187] : memref<9x8x1xf32, #tpu.memory_space<vmem>>, vector<1x8x1xf32>
    %232 = vector.shape_cast %231 : vector<1x8x1xf32> to vector<8x1xf32>
    %233 = vector.broadcast %232 : vector<8x1xf32> to vector<8x600xf32>
    %234 = arith.mulf %233, %230 : vector<8x600xf32>
    %235 = arith.addf %229, %234 : vector<8x600xf32>
    %c0_188 = arith.constant 0 : index
    %c129_189 = arith.constant 129 : index
    %236 = vector.load %arg12[%c0_188, %c129_189] : memref<8x856xf32, #tpu.memory_space<vmem>>, vector<8x600xf32>
    %c5_190 = arith.constant 5 : index
    %c0_191 = arith.constant 0 : index
    %c0_192 = arith.constant 0 : index
    %237 = vector.load %arg9[%c5_190, %c0_191, %c0_192] : memref<9x8x1xf32, #tpu.memory_space<vmem>>, vector<1x8x1xf32>
    %238 = vector.shape_cast %237 : vector<1x8x1xf32> to vector<8x1xf32>
    %239 = vector.broadcast %238 : vector<8x1xf32> to vector<8x600xf32>
    %240 = arith.mulf %239, %236 : vector<8x600xf32>
    %241 = arith.addf %235, %240 : vector<8x600xf32>
    %c0_193 = arith.constant 0 : index
    %c152_194 = arith.constant 152 : index
    %242 = vector.load %arg12[%c0_193, %c152_194] : memref<8x856xf32, #tpu.memory_space<vmem>>, vector<8x600xf32>
    %c6_195 = arith.constant 6 : index
    %c0_196 = arith.constant 0 : index
    %c0_197 = arith.constant 0 : index
    %243 = vector.load %arg9[%c6_195, %c0_196, %c0_197] : memref<9x8x1xf32, #tpu.memory_space<vmem>>, vector<1x8x1xf32>
    %244 = vector.shape_cast %243 : vector<1x8x1xf32> to vector<8x1xf32>
    %245 = vector.broadcast %244 : vector<8x1xf32> to vector<8x600xf32>
    %246 = arith.mulf %245, %242 : vector<8x600xf32>
    %247 = arith.addf %241, %246 : vector<8x600xf32>
    %c0_198 = arith.constant 0 : index
    %c153_199 = arith.constant 153 : index
    %248 = vector.load %arg12[%c0_198, %c153_199] : memref<8x856xf32, #tpu.memory_space<vmem>>, vector<8x600xf32>
    %c7_200 = arith.constant 7 : index
    %c0_201 = arith.constant 0 : index
    %c0_202 = arith.constant 0 : index
    %249 = vector.load %arg9[%c7_200, %c0_201, %c0_202] : memref<9x8x1xf32, #tpu.memory_space<vmem>>, vector<1x8x1xf32>
    %250 = vector.shape_cast %249 : vector<1x8x1xf32> to vector<8x1xf32>
    %251 = vector.broadcast %250 : vector<8x1xf32> to vector<8x600xf32>
    %252 = arith.mulf %251, %248 : vector<8x600xf32>
    %253 = arith.addf %247, %252 : vector<8x600xf32>
    %c0_203 = arith.constant 0 : index
    %c154_204 = arith.constant 154 : index
    %254 = vector.load %arg12[%c0_203, %c154_204] : memref<8x856xf32, #tpu.memory_space<vmem>>, vector<8x600xf32>
    %c8_205 = arith.constant 8 : index
    %c0_206 = arith.constant 0 : index
    %c0_207 = arith.constant 0 : index
    %255 = vector.load %arg9[%c8_205, %c0_206, %c0_207] : memref<9x8x1xf32, #tpu.memory_space<vmem>>, vector<1x8x1xf32>
    %256 = vector.shape_cast %255 : vector<1x8x1xf32> to vector<8x1xf32>
    %257 = vector.broadcast %256 : vector<8x1xf32> to vector<8x600xf32>
    %258 = arith.mulf %257, %254 : vector<8x600xf32>
    %259 = arith.addf %253, %258 : vector<8x600xf32>
    %cst_208 = arith.constant dense<0.000000e+00> : vector<600xf32>
    %260 = vector.multi_reduction <add>, %259, %cst_208 [0] : vector<8x600xf32> to vector<600xf32>
    %261 = vector.shape_cast %260 : vector<600xf32> to vector<1x600xf32>
    %c0_209 = arith.constant 0 : index
    %c0_210 = arith.constant 0 : index
    %262 = vector.load %arg10[%c0_209, %c0_210] : memref<1x1xf32, #tpu.memory_space<vmem>>, vector<1x1xf32>
    %263 = vector.broadcast %262 : vector<1x1xf32> to vector<1x600xf32>
    %264 = arith.addf %261, %263 : vector<1x600xf32>
    %c0_211 = arith.constant 0 : index
    %c0_212 = arith.constant 0 : index
    %c0_213 = arith.constant 0 : index
    %265 = vector.load %arg11[%c0_211, %c0_212, %c0_213] : memref<1x1x600xf32, #tpu.memory_space<vmem>>, vector<1x1x600xf32>
    %266 = vector.shape_cast %265 : vector<1x1x600xf32> to vector<1x600xf32>
    %267 = vector.shape_cast %264 : vector<1x600xf32> to vector<1x1x600xf32>
    tpu.vector_store %arg11[%c0_211, %c0_212, %c0_213], %267 {strides = array<i32>} : memref<1x1x600xf32, #tpu.memory_space<vmem>>, vector<1x1x600xf32>,
    return
  }
  func.func @transform_0(%arg0: i32) -> (i32, i32, i32) {
    %c0_i32 = arith.constant 0 : i32
    %c0_i32_0 = arith.constant 0 : i32
    %c0_i32_1 = arith.constant 0 : i32
    return %arg0, %c0_i32, %c0_i32_0 : i32, i32, i32
  }
  func.func @transform_1(%arg0: i32) -> (i32, i32) {
    %c0_i32 = arith.constant 0 : i32
    %c0_i32_0 = arith.constant 0 : i32
    %c0_i32_1 = arith.constant 0 : i32
    return %c0_i32, %c0_i32_0 : i32, i32
  }
  func.func @transform_2(%arg0: i32) -> (i32, i32, i32) {
    %c0_i32 = arith.constant 0 : i32
    %c0_i32_0 = arith.constant 0 : i32
    %c0_i32_1 = arith.constant 0 : i32
    %c0_i32_2 = arith.constant 0 : i32
    return %c0_i32, %c0_i32_0, %c0_i32_1 : i32, i32, i32
  }
  func.func @transform_3(%arg0: i32) -> (i32, i32) {
    %c0_i32 = arith.constant 0 : i32
    %c0_i32_0 = arith.constant 0 : i32
    %c0_i32_1 = arith.constant 0 : i32
    return %c0_i32, %c0_i32_0 : i32, i32
  }
  func.func @transform_4(%arg0: i32) -> (i32, i32, i32) {
    %c0_i32 = arith.constant 0 : i32
    %c0_i32_0 = arith.constant 0 : i32
    %c0_i32_1 = arith.constant 0 : i32
    %c0_i32_2 = arith.constant 0 : i32
    return %c0_i32, %c0_i32_0, %c0_i32_1 : i32, i32, i32
  }
  func.func @transform_5(%arg0: i32) -> (i32, i32) {
    %c0_i32 = arith.constant 0 : i32
    %c0_i32_0 = arith.constant 0 : i32
    %c0_i32_1 = arith.constant 0 : i32
    return %c0_i32, %c0_i32_0 : i32, i32
  }
  func.func @transform_6(%arg0: i32) -> (i32, i32, i32) {
    %c0_i32 = arith.constant 0 : i32
    %c0_i32_0 = arith.constant 0 : i32
    %c0_i32_1 = arith.constant 0 : i32
    %c0_i32_2 = arith.constant 0 : i32
    return %c0_i32, %c0_i32_0, %c0_i32_1 : i32, i32, i32
  }
  func.func @transform_7(%arg0: i32) -> (i32, i32) {
    %c0_i32 = arith.constant 0 : i32
    %c0_i32_0 = arith.constant 0 : i32
    %c0_i32_1 = arith.constant 0 : i32
    return %c0_i32, %c0_i32_0 : i32, i32
  }
  func.func @transform_8(%arg0: i32) -> (i32, i32, i32) {
    %c0_i32 = arith.constant 0 : i32
    %c0_i32_0 = arith.constant 0 : i32
    %c0_i32_1 = arith.constant 0 : i32
    %c0_i32_2 = arith.constant 0 : i32
    return %c0_i32, %c0_i32_0, %c0_i32_1 : i32, i32, i32
  }
  func.func @transform_9(%arg0: i32) -> (i32, i32) {
    %c0_i32 = arith.constant 0 : i32
    %c0_i32_0 = arith.constant 0 : i32
    %c0_i32_1 = arith.constant 0 : i32
    return %c0_i32, %c0_i32_0 : i32, i32
  }
  func.func @transform_10(%arg0: i32) -> (i32, i32, i32) {
    %c0_i32 = arith.constant 0 : i32
    %c0_i32_0 = arith.constant 0 : i32
    %c0_i32_1 = arith.constant 0 : i32
    return %arg0, %c0_i32, %c0_i32_0 : i32, i32, i32
  }
}

</mosaic_0001>

<bundles_post_ra>
// kernel: net_forward.2
= control target key start
LH: loop header
LB: loop body
LE: loop exit
PB: predicated region body
PF: predicated region fallthrough
CT: control target
= control target key end

     0   :  { %8 = vsyncpa [#allocation3], 0  ;;  %s531_s12 = smov 0   ;;  %s533_s13 = smov 0   ;;  %s616_s0 = inlined_call_operand.vmem [shape: f32[2,2], index: 0, kind: input, shape index: {}]   ;;  %s617_s1 = inlined_call_operand.vmem [shape: f32[2,1,16,16], index: 1, kind: input, shape index: {}]   ;;  %s618_s2 = inlined_call_operand.vmem [shape: f32[2,1,16,16], index: 2, kind: input, shape index: {}]   ;;  %s619_s3 = inlined_call_operand.vmem [shape: f32[2,1,16,16], index: 3, kind: output, shape index: {}]  }
   0x1   :  { %s535_s14 = smov 0   ;;  %s537_s15 = smov 0  }
   0x2   :  { %s539_s16 = smov 0  }
   0x3 LB: > { %s384_s17 = sadd.s32 4294967295, %s508_s16   ;;  %s23_s18 = sadd.s32 1, %s500_s14  ;;  %s508_s16 = sphi %s539_s16, %s14_s16   ;;  %s504_s15 = sphi %s537_s15, %s625_s15   ;;  %s500_s14 = sphi %s535_s14, %s624_s14   ;;  %s496_s13 = sphi %s533_s13, %s623_s13   ;;  %s492_s12 = sphi %s531_s12, %s622_s12  }
   0x4   : > { %p24_p0 = scmp.ge.s32.totalorder %s23_s18, 2  ;;  %s26_s19 = sadd.s32 1, %s504_s15 }
   0x5   : > { %p386_p1 = scmp.ge.s32.totalorder %s508_s16, 1  ;;  %p136_p2 = scmp.lt.s32.totalorder %s508_s16, 5 }
   0x6   : > { %s627_s18 = smov (%p24_p0, %s23_s18), 0  ;;  %s629_s19 = smov (!%p24_p0, %s26_s19), %s504_s15 }
   0x7   : > { %p564_p3 = pnand %p386_p1, %p136_p2  ;;  %p28_p4 = scmp.ge.s32.totalorder %s629_s19, 2 }
   0x8   : > { %p568_p5 = scmp.eq.s32.totalorder %s384_s17, 0  ;;  %s149_s24 = sshll.u32 %s616_s0, 4  ;;  %s150_s24 = int_to_ptr.vmem [resolvable:$true] %s149_s24 }
   0x9   : > { %p404_p6 = pneg %p564_p3  ;;  %s631_s19 = smov (%p28_p4, %s629_s19), 0 }
   0xa   : > { %s451_s25 = scalar_lea.vmem %s150_s24, 32  ;;  %p459_p12 = scmp.lt.s32.totalorder %s150_s24, %s150_s24 }
   0xb   : > { %p405_p7 = pnand %p568_p5, %p404_p6  ;;  %p452_p8 = scmp.ne.s32.totalorder %s150_s24, %s451_s25 }
   0xc   : > { %p460_p13 = scmp.lt.s32.totalorder %s451_s25, %s451_s25 }
   0xd   : > { %p453_p9 = pneg %p405_p7 }
   0xe   : > { %p461_p0 = por %p460_p13, %p459_p12 }
   0xf   : > { %p454_p10 = pnand %p453_p9, %p452_p8 }
  0x11   : > { %p455_p11 = pneg %p454_p10 }
  0x13   : > { %p462_p1 = pnand %p461_p0, %p455_p11 }
  0x15   : > { %465 = shalt.err (!%p462_p1)
}
  0x16   : > { %s510_s26 = smov [#allocation2]   ;;  %184 = sbr.rel (%p564_p3) target bundleno = 52 (0x34), region = 32 }
  0x17   : > { %407 = dma.vmem_to_smem (!%p405_p7), %s150_s24, 32, %s510_s26, [#allocation3]  }
  0x1d   : > { %487 = dma.done.wait (%p568_p5), [#allocation3], 32  }
  0x1e   : > { %489 = vsyncadd (%p568_p5), [#allocation3], 4294967264 }
  0x1f   : > { %190 = sfence }
  0x20   : > { %p223_p2 = scmp.lt.s32.totalorder %s496_s13, 1  ;;  %p225_p4 = scmp.lt.s32.totalorder %s492_s12, 1  ;;  %vm265_vm1 = vcmask 130048  }
  0x21   : > { %s397_s27 = sshll.u32 %s496_s13, 7 }
  0x22   : > { %s633_s13 = smov (!%p223_p2, %s496_s13), 1  ;;  %s635_s12 = smov (!%p225_p4, %s492_s12), 1 }
  0x23   : > { %s391_s28 = sshll.u32 %s633_s13, 1  ;;  %s253_s29 = sld [smem:[#allocation2 + %s397_s27]] }
  0x24   : > { %s228_s30 = sadd.s32 %s391_s28, %s635_s12  ;;  %s254_s4 = sadd.s32 1, %s397_s27 }
  0x25   : > { %s392_s5 = sshll.u32 %s228_s30, 3  ;;  %s255_s6 = sld [smem:[#allocation2 + %s254_s4]] }
  0x26   : > { %s230_s9 = scalar_lea.vmem %s617_s1, %s392_s5  ;;  %s238_s17 = scalar_lea.vmem %s618_s2, %s392_s5 }
  0x27   : > { %v247_v0 = vld [vmem:[%s230_s9] sm:$0xff]  ;;  %s246_s21 = scalar_lea.vmem %s619_s3, %s392_s5 }
  0x28   : > { %v248_v1 = vld [vmem:[%s238_s17] sm:$0xff]  ;;  %v249_v2 = vmul.f32 0.5, %v247_v0 }
  0x29   : > { %v261_v3 = vmul.f32 0.5, %v248_v1  ;;  %v259_v8 = vstv %s253_s29 }
  0x2a   : > { %v250_v4 = vadd.f32 0.5, %v249_v2 }
  0x2b   : > { %s256_s20 = ssub.f32 %s255_s6, %s253_s29  ;;  %v262_v5 = vadd.f32 0.5, %v261_v3 }
  0x2c   : > { %v251_v6 = vsub.f32 1.0, %v250_v4 }
  0x2d   : > { %v257_v7 = vstv %s256_s20  ;;  %vm263_vm0 = vcmp.lt.f32.partialorder %v262_v5, 0.5 }
  0x2e   : > { %v258_v9 = vmul.f32 %v257_v7, %v251_v6 }
  0x30   : > { %v260_v10 = vadd.f32 %v259_v8, %v258_v9 }
  0x32   : > { %v264_v11 = vsel %vm263_vm0, 0.0, %v260_v10 }
  0x33   : > { %266 = vst.msk [vmem:[%s246_s21] sm:$0xff] %vm265_vm1, %v264_v11 }
  0x34 PF: > { %s14_s16 = sadd.s32 1, %s508_s16   ;;  %s622_s12 = smov %s500_s14 }
  0x35   : > { %p11_p3 = scmp.ge.s32.totalorder %s14_s16, 6   ;;  %s623_s13 = smov %s504_s15 }
  0x36   : > { %s624_s14 = smov %s627_s18  ;;  %s625_s15 = smov %s631_s19 }
  0x37   :  { %13 = sbr.rel (!%p11_p3) target bundleno = 3 (0x3), region = 70 }
  0x3e   :  { %294 = vsyncpa [#allocation3], 1 }
  0x3f   :  { %296 = vsyncpa [#allocation3 + $0x1], 1 }

// kernel: net_forward.3
= control target key start
LH: loop header
LB: loop body
LE: loop exit
PB: predicated region body
PF: predicated region fallthrough
CT: control target
= control target key end

     0   :  { %s4833_s15 = smov 0   ;;  %s6063_s0 = inlined_call_operand.vmem [shape: f32[2,1,600], index: 0, kind: input, shape index: {}]   ;;  %s6064_s1 = inlined_call_operand.vmem [shape: f32[1,600], index: 1, kind: input, shape index: {}]   ;;  %s6065_s2 = inlined_call_operand.vmem [shape: f32[9,8,1], index: 2, kind: input, shape index: {}]   ;;  %s6066_s3 = inlined_call_operand.vmem [shape: f32[8,1], index: 3, kind: input, shape index: {}]   ;;  %s6067_s4 = inlined_call_operand.vmem [shape: bf16[9,8,8], index: 4, kind: input, shape index: {}]   ;;  %s6068_s5 = inlined_call_operand.vmem [shape: f32[8,1], index: 5, kind: input, shape index: {}]   ;;  %s6069_s6 = inlined_call_operand.vmem [shape: bf16[9,8,8], index: 6, kind: input, shape index: {}]   ;;  %s6070_s7 = inlined_call_operand.vmem [shape: f32[8,1], index: 7, kind: input, shape index: {}]   ;;  %s6071_s8 = inlined_call_operand.vmem [shape: f32[9,8,1], index: 8, kind: input, shape index: {}]   ;;  %s6072_s9 = inlined_call_operand.<no memory space> [shape: f32[1,1], index: 9, kind: input, shape index: {}]   ;;  %s6073_s10 = inlined_call_operand.vmem [shape: f32[2,1,600], index: 10, kind: output, shape index: {}]  }
   0x1   :  { %v15_v0 = vstv %s6072_s9 }
   0x2   :  { %16 = vst [vmem:[#allocation3] sm:$0x1] %v15_v0 }
   0x3 LB: > { %s4446_s16 = sadd.s32 4294967295, %s4755_s15   ;;  %p4450_p0 = scmp.ge.s32.totalorder %s4755_s15, 1  ;;  %s4755_s15 = sphi %s4833_s15, %s22_s15  }
   0x4   : > { %p313_p1 = scmp.lt.s32.totalorder %s4755_s15, 3 }
   0x6   : > { %p314_p2 = pnand %p4450_p0, %p313_p1 }
   0x7   : > { %v4451_v1 = vld [vmem:[%s6065_s2 + $0x8] sm:$0xff] (!%p314_p2)  ;;  %v4453_v2 = vld [vmem:[%s6065_s2 + $0x18] sm:$0xff] (!%p314_p2)  ;;  %p349_p3 = scmp.lt.s32.totalorder (!%p314_p2), %s4446_s16, 1  ;;  %v4757_v3 = vmov (!%p314_p2), 0   ;;  %v368_v4 = vlaneseq (!%p314_p2)  ;;  %v4758_v5 = vmov (!%p314_p2), 0.0   ;;  %v4452_v6 = vld [vmem:[%s6065_s2 + $0x10] sm:$0xff] (!%p314_p2) }
   0x8   : > { %317 = sbr.rel (%p314_p2) target bundleno = 1694 (0x69e), region = 60  ;;  %4745 = vset.pattern.permute.xlu0 (!%p314_p2), %v4757_v3  ;;  %4746 = vset.pattern.permute.xlu1 (!%p314_p2), %v4757_v3  ;;  %359 = vst [vmem:[#allocation2 + $0x8] sm:$0xff] (!%p314_p2), %v4758_v5  ;;  %360 = vst [vmem:[#allocation2 + $0x10] sm:$0xff] (!%p314_p2), %v4758_v5  ;;  %v4454_v7 = vld [vmem:[%s6065_s2 + $0x20] sm:$0xff] (!%p314_p2)  ;;  %v4455_v10 = vld [vmem:[%s6065_s2 + $0x28] sm:$0xff] (!%p314_p2)  ;;  %s4759_s21 = smov (!%p314_p2), 102  }
   0x9   : > { %431 = vperm.xlu0 (!%p314_p2), %4745, %v4451_v1   ;;  %529 = vperm.xlu1 (!%p314_p2), %4746, %v4453_v2   ;;  %361 = vst [vmem:[#allocation2 + $0x18] sm:$0xff] (!%p314_p2), %v4758_v5  ;;  %362 = vst [vmem:[#allocation2 + $0x20] sm:$0xff] (!%p314_p2), %v4758_v5  ;;  %vm4866_vm0 = vcmp.lt.s32.totalorder (!%p314_p2), %v368_v4, 600  ;;  %v4870_v9 = vshrl.u32 (!%p314_p2), %v368_v4, 7  ;;  %v4456_v11 = vld [vmem:[%s6065_s2 + $0x30] sm:$0xff] (!%p314_p2)  ;;  %v4457_v14 = vld [vmem:[%s6065_s2 + $0x38] sm:$0xff] (!%p314_p2) }
   0xa   : > { %363 = vst [vmem:[#allocation2 + $0x28] sm:$0xff] (!%p314_p2), %v4758_v5  ;;  %358 = vst [vmem:[#allocation2] sm:$0xff] (!%p314_p2), %v4758_v5  ;;  %1018 = vmatprep.mubr.bf16.mxu0 (!%p314_p2), %v4757_v3  ;;  %1059 = vmatprep.mubr.bf16.mxu1 (!%p314_p2), %v4757_v3  ;;  %v4458_v15 = vld [vmem:[%s6065_s2 + $0x40] sm:$0xff] (!%p314_p2)  ;;  %s4760_s25 = smov (!%p314_p2), 127   ;;  %s4761_s26 = smov (!%p314_p2), 126   ;;  %vm458_vm1 = vcmask (!%p314_p2), 1039360  }
   0xb   : > { %v4888_v13 = vsub.s32 (!%p314_p2), 0, %v4870_v9  ;;  %v4899_v16 = vld [vmem:[%s6064_s1] sm:$0x1f] (!%p314_p2)  ;;  %v4914_v23 = vsub.s32 (!%p314_p2), 1, %v4870_v9  ;;  %v4923_v26 = vsub.s32 (!%p314_p2), 3, %v4870_v9  ;;  %v4926_v27 = vsub.s32 (!%p314_p2), 2, %v4870_v9 }
   0xc   : > { %v378_v18 = vld [vmem:[%s6065_s2] sm:$0xff] (!%p314_p2)  ;;  %v407_v43 = vsub.s32 (!%p314_p2), 5, %v4870_v9  ;;  %v4954_v44 = vsub.s32 (!%p314_p2), 4, %v4870_v9  ;;  %s4763_s28 = smov (!%p314_p2), 101   ;;  %s4764_s29 = smov (!%p314_p2), 78   ;;  %vm507_vm2 = vcmask (!%p314_p2), 1031168  }
   0xd   : > { %480 = vperm.xlu0 (!%p314_p2), %4745, %v4452_v6   ;;  %581 = vperm.xlu1 (!%p314_p2), %4746, %v4454_v7   ;;  %v4903_v17 = vrot.slane (!%p314_p2), %v4899_v16, %v4888_v13  ;;  %v823_v19 = vld [vmem:[%s6066_s3] sm:$0xff] (!%p314_p2)  ;;  %s4765_s30 = smov (!%p314_p2), 77   ;;  %s4766_s11 = smov (!%p314_p2), 76   ;;  %vm556_vm3 = vcmask (!%p314_p2), 842752   ;;  %vm630_vm4 = vcmask (!%p314_p2), 834560   ;;  %vm674_vm5 = vcmask (!%p314_p2), 826368  }
   0xe   : > { %vm718_vm6 = vcmask (!%p314_p2), 637952   ;;  %vm6075_vm7 = vcmask (!%p314_p2), 629760   ;;  %vm6074_vm8 = vcmask (!%p314_p2), 621568   ;;  %s4767_s12 = smov (!%p314_p2), 26   ;;  %vm364_vm9 = vcmask (!%p314_p2), 719872   ;;  %s4769_s13 = smov (!%p314_p2), 25  }
   0xf   : > { %s6089_s16 = smov (!%p349_p3, %s4446_s16), 1  ;;  %vm911_vm10 = vcmask 211968   ;;  %s4770_s14 = smov 24   ;;  %vm960_vm11 = vcmask 203776   ;;  %vm970_vm12 = vcmask 1043456   ;;  %vm966_vm13 = vcmask 64512  }
  0x10   : > { %s6076_s24 = smul.u32 5, %s6089_s16  ;;  %s4771_s17 = smov 1   ;;  %vm4773_vm14 = vmmov 0   ;;  %vm1280_vm15 = vcmask 195584  }
  0x11   : > { %651 = vperm.xlu0 %4745, %v4455_v10   ;;  %695 = vperm.xlu1 %4746, %v4456_v11   ;;  %s4772_s18 = smov 104  }
  0x12   : > { %s352_s27 = scalar_lea.vmem %s6063_s0, %s6076_s24 }
  0x13   : > { %v367_v12 = vld [vmem:[%s352_s27] sm:$0x1f]  ;;  %s4762_s27 = smov 103  }
  0x14   : > { %373 = vst.msk [vmem:[#allocation2 + $0x8] ss:$8 sm:$0xf] %vm4866_vm0, %v367_v12  ;;  %374 = vst.msk [vmem:[#allocation2 + $0x8] ss:$8 sm:$0x10] %vm4866_vm0, %v367_v12 }
  0x15   : > { %739 = vperm.xlu0 %4745, %v4457_v14   ;;  %783 = vperm.xlu1 %4746, %v4458_v15  }
  0x19   : > { %381 = vperm.xlu0 %4745, %v378_v18   ;;  %867 = vrot.lane.b32.xlu1 %v4903_v17, %s4759_s21 }
  0x1b   : > { %v375_v20 = vld [vmem:[#allocation2] ss:$8 sm:$0xf] }
  0x1c   : > { %v376_v21 = vld [vmem:[#allocation2] ss:$8 sm:$0x30] }
  0x1d   : > { %826 = vperm.xlu0 %4745, %v823_v19   ;;  %v377_v22 = vor.u32 %v376_v21, %v375_v20  ;;  %v574_v45 = vld [vmem:[#allocation2 + $0x8] ss:$8 sm:$0xf] }
  0x1e   : > { %v575_v46 = vld [vmem:[#allocation2 + $0x8] ss:$8 sm:$0x10] }
  0x1f   : > { %v4917_v24 = vrot.slane %v377_v22, %v4914_v23  ;;  %v4920_v25 = vrot.slane %v377_v22, %v4888_v13  ;;  %v4931_v31 = vrot.slane %v377_v22, %v4923_v26  ;;  %v4934_v32 = vrot.slane %v377_v22, %v4926_v27 }
  0x20   : > { %v4960_v49 = vrot.slane %v377_v22, %v407_v43  ;;  %v4963_v50 = vrot.slane %v377_v22, %v4954_v44  ;;  %v576_v51 = vor.u32 %v575_v46, %v574_v45  ;;  %v5017_v45 = vrot.slane %v4899_v16, %v4923_v26 }
  0x21   : > { %v5021_v46 = vrot.slane %v4899_v16, %v4926_v27 }
  0x22   : > { %v592_v54 = vrot.slane %v576_v51, %v4914_v23  ;;  %v588_v55 = vrot.slane %v576_v51, %v4888_v13  ;;  %v596_v59 = vrot.slane %v576_v51, %v4926_v27  ;;  %v604_v12 = vrot.slane %v576_v51, %v4954_v44 }
  0x23   : > { %v600_v19 = vrot.slane %v576_v51, %v4923_v26 }
  0x88   : > { %v432_v28 = vpop.permute.xlu0 %431  ;;  %v530_v40 = vpop.permute.xlu1 %529 }
  0x89   : > { %v435_v29 = vmul.f32 %v432_v28, %v4917_v24  ;;  %v434_v30 = vmul.f32 %v432_v28, %v4920_v25  ;;  %v437_v33 = vmul.f32 %v432_v28, %v4931_v31  ;;  %v436_v34 = vmul.f32 %v432_v28, %v4934_v32 }
  0x8a   : > { %v533_v41 = vmul.f32 %v530_v40, %v4917_v24  ;;  %v532_v42 = vmul.f32 %v530_v40, %v4920_v25  ;;  %v535_v47 = vmul.f32 %v530_v40, %v4931_v31  ;;  %v534_v48 = vmul.f32 %v530_v40, %v4934_v32 }
  0x8b   : > { %448 = vrot.lane.b32.xlu0 %v435_v29, %s4760_s25  ;;  %446 = vrot.lane.b32.xlu1 %v434_v30, %s4760_s25  ;;  %v439_v52 = vmul.f32 %v432_v28, %v4960_v49  ;;  %v438_v53 = vmul.f32 %v432_v28, %v4963_v50  ;;  %v537_v4 = vmul.f32 %v530_v40, %v4960_v49 }
  0x8c   : > { %v481_v35 = vpop.permute.xlu0 %480  ;;  %v582_v56 = vpop.permute.xlu1 %581  ;;  %v536_v6 = vmul.f32 %v530_v40, %v4963_v50 }
  0x8d   : > { %v484_v36 = vmul.f32 %v481_v35, %v4917_v24  ;;  %v483_v37 = vmul.f32 %v481_v35, %v4920_v25  ;;  %v486_v38 = vmul.f32 %v481_v35, %v4931_v31  ;;  %v485_v39 = vmul.f32 %v481_v35, %v4934_v32 }
  0x8e   : > { %v611_v57 = vmul.f32 %v592_v54, %v582_v56  ;;  %v610_v58 = vmul.f32 %v588_v55, %v582_v56  ;;  %v487_v60 = vmul.f32 %v481_v35, %v4963_v50  ;;  %v612_v61 = vmul.f32 %v596_v59, %v582_v56 }
  0x8f   : > { %452 = vrot.lane.b32.xlu0 %v437_v33, %s4760_s25  ;;  %450 = vrot.lane.b32.xlu1 %v436_v34, %s4760_s25  ;;  %v488_v0 = vmul.f32 %v481_v35, %v4960_v49  ;;  %v614_v14 = vmul.f32 %v604_v12, %v582_v56  ;;  %v613_v21 = vmul.f32 %v600_v19, %v582_v56 }
  0x90   : > { %v652_v62 = vpop.permute.xlu0 %651  ;;  %v696_v7 = vpop.permute.xlu1 %695 }
  0x91   : > { %v654_v63 = vmul.f32 %v652_v62, %v588_v55  ;;  %v656_v1 = vmul.f32 %v652_v62, %v596_v59  ;;  %v655_v2 = vmul.f32 %v652_v62, %v592_v54  ;;  %v699_v10 = vmul.f32 %v696_v7, %v592_v54 }
  0x92   : > { %v698_v11 = vmul.f32 %v696_v7, %v588_v55  ;;  %v700_v15 = vmul.f32 %v696_v7, %v596_v59  ;;  %v657_v22 = vmul.f32 %v652_v62, %v600_v19  ;;  %v658_v35 = vmul.f32 %v652_v62, %v604_v12 }
  0x93   : > { %497 = vrot.lane.b32.xlu0 %v484_v36, %s4761_s26  ;;  %495 = vrot.lane.b32.xlu1 %v483_v37, %s4761_s26  ;;  %v702_v36 = vmul.f32 %v696_v7, %v604_v12 }
  0x94   : > { %v740_v18 = vpop.permute.xlu0 %739  ;;  %v784_v29 = vpop.permute.xlu1 %783 }
  0x95   : > { %v743_v20 = vmul.f32 %v740_v18, %v592_v54  ;;  %v742_v28 = vmul.f32 %v740_v18, %v588_v55  ;;  %v786_v30 = vmul.f32 %v784_v29, %v588_v55  ;;  %v744_v33 = vmul.f32 %v740_v18, %v596_v59 }
  0x96   : > { %v788_v34 = vmul.f32 %v784_v29, %v596_v59  ;;  %v787_v37 = vmul.f32 %v784_v29, %v592_v54  ;;  %v790_v40 = vmul.f32 %v784_v29, %v604_v12  ;;  %v789_v43 = vmul.f32 %v784_v29, %v600_v19 }
  0x97   : > { %501 = vrot.lane.b32.xlu0 %v486_v38, %s4761_s26  ;;  %499 = vrot.lane.b32.xlu1 %v485_v39, %s4761_s26  ;;  %v746_v38 = vmul.f32 %v740_v18, %v604_v12  ;;  %v701_v39 = vmul.f32 %v696_v7, %v600_v19 }
  0x98   : > { %v5035_v26 = vpop.permute.xlu1 %867 }
  0x9b   : > { %546 = vrot.lane.b32.xlu0 %v533_v41, %s4762_s27  ;;  %544 = vrot.lane.b32.xlu1 %v532_v42, %s4762_s27  ;;  %v745_v41 = vmul.f32 %v740_v18, %v600_v19  ;;  %v5010_v42 = vrot.slane %v4899_v16, %v4914_v23  ;;  %v5029_v23 = vrot.slane %v4899_v16, %v4954_v44 }
  0x9f   : > { %550 = vrot.lane.b32.xlu0 %v535_v47, %s4762_s27  ;;  %548 = vrot.lane.b32.xlu1 %v534_v48, %s4762_s27  ;;  %v5033_v47 = vpop.permute.xlu0 %381 }
  0xa0   : > { %v415_v18 = vmul.f32 %v4920_v25, %v5033_v47 }
  0xa3   : > { %456 = vrot.lane.b32.xlu0 %v439_v52, %s4760_s25  ;;  %454 = vrot.lane.b32.xlu1 %v438_v53, %s4760_s25  ;;  %v5037_v48 = vpop.permute.xlu0 %826 }
  0xa7   : > { %622 = vrot.lane.b32.xlu0 %v611_v57, %s4759_s21  ;;  %620 = vrot.lane.b32.xlu1 %v610_v58, %s4759_s21 }
  0xab   : > { %503 = vrot.lane.b32.xlu0 %v487_v60, %s4761_s26  ;;  %624 = vrot.lane.b32.xlu1 %v612_v61, %s4759_s21 }
  0xaf   : > { %664 = vrot.lane.b32.xlu0 %v654_v63, %s4763_s28  ;;  %505 = vrot.lane.b32.xlu1 %v488_v0, %s4761_s26 }
  0xb3   : > { %668 = vrot.lane.b32.xlu0 %v656_v1, %s4763_s28  ;;  %666 = vrot.lane.b32.xlu1 %v655_v2, %s4763_s28 }
  0xb7   : > { %554 = vrot.lane.b32.xlu0 %v537_v4, %s4762_s27  ;;  %552 = vrot.lane.b32.xlu1 %v536_v6, %s4762_s27 }
  0xbb   : > { %710 = vrot.lane.b32.xlu0 %v699_v10, %s4764_s29  ;;  %708 = vrot.lane.b32.xlu1 %v698_v11, %s4764_s29 }
  0xbf   : > { %628 = vrot.lane.b32.xlu0 %v614_v14, %s4759_s21  ;;  %712 = vrot.lane.b32.xlu1 %v700_v15, %s4764_s29 }
  0xc3   : > { %754 = vrot.lane.b32.xlu0 %v743_v20, %s4765_s30  ;;  %626 = vrot.lane.b32.xlu1 %v613_v21, %s4759_s21 }
  0xc7   : > { %670 = vrot.lane.b32.xlu0 %v657_v22, %s4763_s28  ;;  %752 = vrot.lane.b32.xlu1 %v742_v28, %s4765_s30 }
  0xcb   : > { %796 = vrot.lane.b32.xlu0 %v786_v30, %s4766_s11  ;;  %756 = vrot.lane.b32.xlu1 %v744_v33, %s4765_s30 }
  0xcf   : > { %800 = vrot.lane.b32.xlu0 %v788_v34, %s4766_s11  ;;  %672 = vrot.lane.b32.xlu1 %v658_v35, %s4763_s28 }
  0xd3   : > { %716 = vrot.lane.b32.xlu0 %v702_v36, %s4764_s29  ;;  %798 = vrot.lane.b32.xlu1 %v787_v37, %s4766_s11  ;;  %v416_v37 = vmul.f32 %v4917_v24, %v5033_v47 }
  0xd7   : > { %760 = vrot.lane.b32.xlu0 %v746_v38, %s4765_s30  ;;  %714 = vrot.lane.b32.xlu1 %v701_v39, %s4764_s29 }
  0xdb   : > { %804 = vrot.lane.b32.xlu0 %v790_v40, %s4766_s11  ;;  %758 = vrot.lane.b32.xlu1 %v745_v41, %s4765_s30 }
  0xdf   : > { %869 = vrot.lane.b32.xlu0 %v5010_v42, %s4759_s21  ;;  %802 = vrot.lane.b32.xlu1 %v789_v43, %s4766_s11 }
  0xe3   : > { %873 = vrot.lane.b32.xlu0 %v5017_v45, %s4759_s21  ;;  %871 = vrot.lane.b32.xlu1 %v5021_v46, %s4759_s21 }
  0xe7   : > { %875 = vrot.lane.b32.xlu1 %v5029_v23, %s4759_s21 }
  0xfd   : > { %v449_v27 = vpop.permute.xlu0 %448  ;;  %v447_v51 = vpop.permute.xlu1 %446 }
  0xfe   : > { %v459_v12 = vsel %vm458_vm1, %v447_v51, %v449_v27  ;;  %v417_v51 = vmul.f32 %v4934_v32, %v5033_v47 }
  0xff   : > { %v470_v20 = vadd.f32 %v459_v12, %v415_v18 }
 0x101   : > { %v5039_v52 = vpop.permute.xlu0 %452  ;;  %v451_v53 = vpop.permute.xlu1 %450 }
 0x102   : > { %v460_v36 = vsel %vm458_vm1, %v449_v27, %v451_v53  ;;  %v461_v40 = vsel %vm458_vm1, %v451_v53, %v5039_v52 }
 0x103   : > { %v472_v12 = vadd.f32 %v461_v40, %v417_v51 }
 0x105   : > { %v498_v54 = vpop.permute.xlu0 %497  ;;  %v496_v55 = vpop.permute.xlu1 %495 }
 0x106   : > { %v508_v19 = vsel %vm507_vm2, %v496_v55, %v498_v54  ;;  %v471_v55 = vadd.f32 %v460_v36, %v416_v37 }
 0x107   : > { %v519_v29 = vadd.f32 %v508_v19, %v470_v20  ;;  %v420_v19 = vmul.f32 %v4960_v49, %v5033_v47  ;;  %v418_v20 = vmul.f32 %v4931_v31, %v5033_v47 }
 0x109   : > { %v5041_v56 = vpop.permute.xlu0 %501  ;;  %v500_v16 = vpop.permute.xlu1 %499 }
 0x10a   : > { %v509_v41 = vsel %vm507_vm2, %v498_v54, %v500_v16  ;;  %v510_v27 = vsel %vm507_vm2, %v500_v16, %v5041_v56 }
 0x10b   : > { %v520_v18 = vadd.f32 %v509_v41, %v471_v55 }
 0x10d   : > { %v547_v44 = vpop.permute.xlu0 %546  ;;  %v545_v57 = vpop.permute.xlu1 %544 }
 0x10e   : > { %v557_v21 = vsel %vm556_vm3, %v545_v57, %v547_v44 }
 0x10f   : > { %v568_v30 = vadd.f32 %v557_v21, %v519_v29 }
 0x111   : > { %v5043_v58 = vpop.permute.xlu0 %550  ;;  %v549_v59 = vpop.permute.xlu1 %548 }
 0x112   : > { %v558_v57 = vsel %vm556_vm3, %v547_v44, %v549_v59  ;;  %v559_v32 = vsel %vm556_vm3, %v549_v59, %v5043_v58  ;;  %v521_v44 = vadd.f32 %v510_v27, %v472_v12 }
 0x113   : > { %v569_v29 = vadd.f32 %v558_v57, %v520_v18 }
 0x114   : > { %v570_v31 = vadd.f32 %v559_v32, %v521_v44 }
 0x115   : > { %v5045_v60 = vpop.permute.xlu0 %456  ;;  %v5047_v61 = vpop.permute.xlu1 %454 }
 0x116   : > { %v462_v49 = vsel %vm458_vm1, %v5039_v52, %v5047_v61 }
 0x117   : > { %v473_v40 = vadd.f32 %v462_v49, %v418_v20 }
 0x119   : > { %v623_v62 = vpop.permute.xlu0 %622  ;;  %v621_v63 = vpop.permute.xlu1 %620 }
 0x11a   : > { %v641_v35 = vadd.f32 %v621_v63, %v568_v30  ;;  %v631_v16 = vsel %vm630_vm4, %v621_v63, %v623_v62  ;;  %v419_v30 = vmul.f32 %v4963_v50, %v5033_v47  ;;  %v475_v50 = vadd.f32 %v5045_v60, %v420_v19 }
 0x11b   : > { %v642_v36 = vadd.f32 %v631_v16, %v569_v29  ;;  %v463_v47 = vsel %vm458_vm1, %v5047_v61, %v5045_v60 }
 0x11d   : > { %v5049_v0 = vpop.permute.xlu0 %503  ;;  %v5051_v1 = vpop.permute.xlu1 %624 }
 0x11e   : > { %v632_v63 = vsel %vm630_vm4, %v623_v62, %v5051_v1  ;;  %v511_v41 = vsel %vm507_vm2, %v5041_v56, %v5049_v0 }
 0x11f   : > { %v643_v51 = vadd.f32 %v632_v63, %v570_v31 }
 0x121   : > { %v665_v2 = vpop.permute.xlu0 %664  ;;  %v5053_v4 = vpop.permute.xlu1 %505 }
 0x122   : > { %v685_v25 = vadd.f32 %v665_v2, %v641_v35  ;;  %v512_v55 = vsel %vm507_vm2, %v5049_v0, %v5053_v4  ;;  %v524_v27 = vadd.f32 %v5053_v4, %v475_v50  ;;  %v522_v4 = vadd.f32 %v511_v41, %v473_v40 }
 0x125   : > { %v5055_v6 = vpop.permute.xlu0 %668  ;;  %v5057_v7 = vpop.permute.xlu1 %666 }
 0x126   : > { %v675_v35 = vsel %vm674_vm5, %v665_v2, %v5057_v7  ;;  %v676_v62 = vsel %vm674_vm5, %v5057_v7, %v5055_v6 }
 0x127   : > { %v687_v12 = vadd.f32 %v676_v62, %v643_v51 }
 0x129   : > { %v5059_v10 = vpop.permute.xlu0 %554  ;;  %v5061_v11 = vpop.permute.xlu1 %552 }
 0x12a   : > { %v560_v0 = vsel %vm556_vm3, %v5043_v58, %v5061_v11  ;;  %v573_v20 = vadd.f32 %v5059_v10, %v524_v27 }
 0x12d   : > { %v5064_v14 = vpop.permute.xlu0 %710  ;;  %v709_v15 = vpop.permute.xlu1 %708 }
 0x12e   : > { %v729_v43 = vadd.f32 %v709_v15, %v685_v25  ;;  %v719_v52 = vsel %vm718_vm6, %v709_v15, %v5064_v14  ;;  %v474_v15 = vadd.f32 %v463_v47, %v419_v30 }
 0x130   : > { %v523_v19 = vadd.f32 %v512_v55, %v474_v15 }
 0x131   : > { %v5070_v22 = vpop.permute.xlu0 %628  ;;  %v5072_v28 = vpop.permute.xlu1 %712 }
 0x132   : > { %v720_v56 = vsel %vm718_vm6, %v5064_v14, %v5072_v28 }
 0x133   : > { %v731_v16 = vadd.f32 %v720_v56, %v687_v12 }
 0x135   : > { %v5074_v33 = vpop.permute.xlu0 %754  ;;  %v5076_v34 = vpop.permute.xlu1 %626 }
 0x136   : > { %v633_v58 = vsel %vm630_vm4, %v5051_v1, %v5076_v34 }
 0x139   : > { %v5081_v38 = vpop.permute.xlu0 %670  ;;  %v753_v39 = vpop.permute.xlu1 %752 }
 0x13a   : > { %v773_v24 = vadd.f32 %v753_v39, %v729_v43  ;;  %v686_v43 = vadd.f32 %v675_v35, %v642_v36  ;;  %v763_v60 = vsel %vm6075_vm7, %v753_v39, %v5074_v33  ;;  %v561_v39 = vsel %vm556_vm3, %v5061_v11, %v5059_v10 }
 0x13b   : > { %v634_v11 = vsel %vm630_vm4, %v5076_v34, %v5070_v22  ;;  %v677_v10 = vsel %vm674_vm5, %v5055_v6, %v5081_v38  ;;  %v646_v35 = vadd.f32 %v5070_v22, %v573_v20 }
 0x13c   : > { %v730_v57 = vadd.f32 %v719_v52, %v686_v43 }
 0x13d   : > { %v797_v53 = vpop.permute.xlu0 %796  ;;  %v5093_v54 = vpop.permute.xlu1 %756 }
 0x13e   : > { %v817_v21 = vadd.f32 %v797_v53, %v773_v24  ;;  %v774_v32 = vadd.f32 %v763_v60, %v730_v57  ;;  %v764_v14 = vsel %vm6075_vm7, %v5074_v33, %v5093_v54 }
 0x13f   : > { %v775_v33 = vadd.f32 %v764_v14, %v731_v16 }
 0x140   : > { %v829_v59 = vadd.f32 %v5037_v48, %v817_v21  ;;  %v572_v21 = vadd.f32 %v561_v39, %v523_v19 }
 0x141   : > { %v5110_v25 = vpop.permute.xlu0 %800  ;;  %v673_v37 = vpop.permute.xlu1 %672 }
 0x142   : > { %v835_v2 = vmax.f32 %v829_v59, 0.0  ;;  %v678_v1 = vsel %vm674_vm5, %v5081_v38, %v673_v37  ;;  %v645_v34 = vadd.f32 %v634_v11, %v572_v21  ;;  %v690_v52 = vadd.f32 %v673_v37, %v646_v35 }
 0x144   : > { %v887_v61 = vmul.f32 %v5035_v26, %v835_v2  ;;  %v689_v47 = vadd.f32 %v678_v1, %v645_v34 }
 0x145   : > { %v717_v7 = vpop.permute.xlu0 %716  ;;  %v799_v24 = vpop.permute.xlu1 %798 }
 0x146   : > { %v807_v18 = vsel %vm6074_vm8, %v797_v53, %v799_v24  ;;  %899 = vrot.lane.b32.xlu0 %v887_v61, %s4767_s12  ;;  %v571_v53 = vadd.f32 %v560_v0, %v522_v4  ;;  %v808_v44 = vsel %vm6074_vm8, %v799_v24, %v5110_v25  ;;  %v734_v41 = vadd.f32 %v717_v7, %v690_v52 }
 0x147   : > { %v818_v29 = vadd.f32 %v807_v18, %v774_v32  ;;  %v819_v31 = vadd.f32 %v808_v44, %v775_v33 }
 0x148   : > { %v644_v59 = vadd.f32 %v633_v58, %v571_v53 }
 0x149   : > { %v761_v30 = vpop.permute.xlu0 %760  ;;  %v715_v49 = vpop.permute.xlu1 %714  ;;  %v830_v6 = vadd.f32 %v5037_v48, %v818_v29  ;;  %v831_v51 = vadd.f32 %v5037_v48, %v819_v31 }
 0x14a   : > { %v721_v36 = vsel %vm718_vm6, %v5072_v28, %v715_v49  ;;  %v722_v63 = vsel %vm718_vm6, %v715_v49, %v717_v7  ;;  %v688_v50 = vadd.f32 %v677_v10, %v644_v59  ;;  %v778_v28 = vadd.f32 %v761_v30, %v734_v41 }
 0x14b   : > { %v733_v43 = vadd.f32 %v722_v63, %v689_v47  ;;  %v836_v15 = vmax.f32 %v830_v6, 0.0  ;;  %v837_v18 = vmax.f32 %v831_v51, 0.0 }
 0x14c   : > { %v732_v62 = vadd.f32 %v721_v36, %v688_v50 }
 0x14d   : > { %v805_v2 = vpop.permute.xlu0 %804  ;;  %v759_v40 = vpop.permute.xlu1 %758 }
 0x14e   : > { %v765_v38 = vsel %vm6075_vm7, %v5093_v54, %v759_v40  ;;  %v766_v22 = vsel %vm6075_vm7, %v759_v40, %v761_v30  ;;  %v822_v56 = vadd.f32 %v805_v2, %v778_v28  ;;  %v4768_v30 = vmov 0.0|0.0  }
 0x14f   : > { %v776_v55 = vadd.f32 %v765_v38, %v732_v62  ;;  %v777_v60 = vadd.f32 %v766_v22, %v733_v43  ;;  %v2391_v38 = vld [vmem:[%s6068_s5] sm:$0xff]  ;;  %vm1917_vm7 = vcmask 850944  }
 0x151   : > { %v870_v61 = vpop.permute.xlu0 %869  ;;  %v803_v37 = vpop.permute.xlu1 %802 }
 0x152   : > { %v877_v27 = vsel %vm630_vm4, %v5035_v26, %v870_v61  ;;  %v809_v54 = vsel %vm6074_vm8, %v5110_v25, %v803_v37  ;;  %v810_v57 = vsel %vm6074_vm8, %v803_v37, %v805_v2  ;;  %v834_v25 = vadd.f32 %v5037_v48, %v822_v56 }
 0x153   : > { %v820_v7 = vadd.f32 %v809_v54, %v776_v55  ;;  %v821_v24 = vadd.f32 %v810_v57, %v777_v60  ;;  %v888_v12 = vmul.f32 %v877_v27, %v836_v15  ;;  %v4459_v60 = vld [vmem:[%s6067_s4 + $0x4] sm:$0xf]  ;;  %vm1445_vm8 = vcmask 7168  }
 0x154   : > { %v840_v21 = vmax.f32 %v834_v25, 0.0 }
 0x155   : > { %v874_v0 = vpop.permute.xlu0 %873  ;;  %901 = vrot.lane.b32.xlu1 %v888_v12, %s4767_s12  ;;  %v872_v39 = vpop.permute.xlu1 %871  ;;  %v832_v4 = vadd.f32 %v5037_v48, %v820_v7  ;;  %v833_v19 = vadd.f32 %v5037_v48, %v821_v24 }
 0x156   : > { %v878_v26 = vsel %vm630_vm4, %v870_v61, %v872_v39  ;;  %v879_v32 = vsel %vm630_vm4, %v872_v39, %v874_v0 }
 0x157   : > { %v889_v14 = vmul.f32 %v878_v26, %v837_v18  ;;  %v838_v20 = vmax.f32 %v832_v4, 0.0  ;;  %v839_v11 = vmax.f32 %v833_v19, 0.0  ;;  %v939_v26 = vld [vmem:[%s6067_s4] sm:$0xf] }
 0x159   : > { %v876_v16 = vpop.permute.xlu1 %875  ;;  %903 = vrot.lane.b32.xlu0 %v889_v14, %s4767_s12  ;;  %v890_v58 = vmul.f32 %v879_v32, %v838_v20 }
 0x15a   : > { %v880_v53 = vsel %vm630_vm4, %v874_v0, %v876_v16  ;;  %v892_v29 = vmul.f32 %v876_v16, %v840_v21 }
 0x15b   : > { %905 = vrot.lane.b32.xlu1 %v890_v58, %s4767_s12  ;;  %v891_v44 = vmul.f32 %v880_v53, %v839_v11 }
 0x15d   : > { %907 = vrot.lane.b32.xlu0 %v891_v44, %s4767_s12 }
 0x15f   : > { %909 = vrot.lane.b32.xlu1 %v892_v29, %s4767_s12 }
 0x161   : > { %948 = vrot.lane.b32.xlu0 %v4768_v30, %s4769_s13 }
 0x1b8   : > { %v900_v48 = vpop.permute.xlu0 %899 }
 0x1c7   : > { %v902_v49 = vpop.permute.xlu1 %901 }
 0x1c8   : > { %v5187_v10 = vsel %vm911_vm10, %v900_v48, %v902_v49 }
 0x1c9   : > { %v5191_v33 = vpack.c.bf16 %v5187_v10, %v5187_v10 }
 0x1cb   : > { %v904_v1 = vpop.permute.xlu0 %903  ;;  %950 = vrot.lane.b32.xlu1 %v5191_v33, %s4769_s13 }
 0x1cc   : > { %v5196_v35 = vsel %vm911_vm10, %v902_v49, %v904_v1 }
 0x1cd   : > { %v906_v59 = vpop.permute.xlu1 %905  ;;  %v5200_v34 = vpack.c.bf16 %v5196_v35, %v5196_v35 }
 0x1ce   : > { %v5203_v31 = vsel %vm911_vm10, %v904_v1, %v906_v59 }
 0x1cf   : > { %v908_v36 = vpop.permute.xlu0 %907  ;;  %952 = vrot.lane.b32.xlu0 %v5200_v34, %s4769_s13  ;;  %v5209_v63 = vpack.c.bf16 %v5203_v31, %v5203_v31 }
 0x1d0   : > { %v5212_v50 = vsel %vm911_vm10, %v906_v59, %v908_v36  ;;  %v4470_v59 = vld [vmem:[%s6067_s4 + $0x8] sm:$0xf] }
 0x1d1   : > { %v910_v47 = vpop.permute.xlu1 %909  ;;  %954 = vrot.lane.b32.xlu1 %v5209_v63, %s4769_s13  ;;  %v5218_v52 = vpack.c.bf16 %v5212_v50, %v5212_v50 }
 0x1d2   : > { %v5221_v2 = vsel %vm911_vm10, %v908_v36, %v910_v47 }
 0x1d3   : > { %926 = vst.msk [vmem:[#allocation2 + $0x28] sm:$0xff] %vm364_vm9, %v5221_v2  ;;  %956 = vrot.lane.b32.xlu0 %v5218_v52, %s4769_s13  ;;  %v949_v22 = vpop.permute.xlu0 %948 }
 0x1d7   : > { %1108 = vrot.lane.b32.xlu0 %v4768_v30, %s4767_s12 }
 0x1da   : > { %v932_v40 = vld [vmem:[#allocation2 + $0x28] sm:$0xff] }
 0x1db   : > { %v5229_v6 = vpack.c.bf16 %v932_v40, %v932_v40  ;;  %1112 = vrot.lane.b32.xlu0 %v5200_v34, %s4767_s12 }
 0x1dd   : > { %958 = vrot.lane.b32.xlu1 %v5229_v6, %s4769_s13 }
 0x1df   : > { %1116 = vrot.lane.b32.xlu0 %v5218_v52, %s4767_s12 }
 0x1e1   : > { %1110 = vrot.lane.b32.xlu1 %v5191_v33, %s4767_s12 }
 0x1e3   : > { %1268 = vrot.lane.b32.xlu0 %v4768_v30, %s4770_s14 }
 0x1e5   : > { %1114 = vrot.lane.b32.xlu1 %v5209_v63, %s4767_s12 }
 0x1e7   : > { %1272 = vrot.lane.b32.xlu0 %v5200_v34, %s4770_s14 }
 0x1e9   : > { %1118 = vrot.lane.b32.xlu1 %v5229_v6, %s4767_s12 }
 0x1eb   : > { %1276 = vrot.lane.b32.xlu0 %v5218_v52, %s4770_s14 }
 0x1ed   : > { %1270 = vrot.lane.b32.xlu1 %v5191_v33, %s4770_s14 }
 0x1ef   : > { %1433 = vrot.lane.b32.xlu0 %v4768_v30, %s4771_s17 }
 0x1f1   : > { %1274 = vrot.lane.b32.xlu1 %v5209_v63, %s4770_s14 }
 0x1f3   : > { %1437 = vrot.lane.b32.xlu0 %v5200_v34, %s4771_s17 }
 0x1f5   : > { %1278 = vrot.lane.b32.xlu1 %v5229_v6, %s4770_s14 }
 0x1f7   : > { %1441 = vrot.lane.b32.xlu0 %v5218_v52, %s4771_s17 }
 0x1f9   : > { %1435 = vrot.lane.b32.xlu1 %v5191_v33, %s4771_s17 }
 0x1fb   : > { %1745 = vrot.lane.b32.xlu0 %v5191_v33, %s4760_s25 }
 0x1fd   : > { %1439 = vrot.lane.b32.xlu1 %v5209_v63, %s4771_s17 }
 0x1ff   : > { %1749 = vrot.lane.b32.xlu0 %v5209_v63, %s4760_s25 }
 0x201   : > { %1443 = vrot.lane.b32.xlu1 %v5229_v6, %s4771_s17 }
 0x203   : > { %1753 = vrot.lane.b32.xlu0 %v5229_v6, %s4760_s25 }
 0x205   : > { %1747 = vrot.lane.b32.xlu1 %v5200_v34, %s4760_s25 }
 0x207   : > { %1909 = vrot.lane.b32.xlu0 %v5200_v34, %s4772_s18 }
 0x209   : > { %1751 = vrot.lane.b32.xlu1 %v5218_v52, %s4760_s25 }
 0x20b   : > { %1913 = vrot.lane.b32.xlu0 %v5218_v52, %s4772_s18 }
 0x20d   : > { %1907 = vrot.lane.b32.xlu1 %v5191_v33, %s4772_s18 }
 0x20f   : > { %2069 = vrot.lane.b32.xlu0 %v5191_v33, %s4762_s27 }
 0x211   : > { %1911 = vrot.lane.b32.xlu1 %v5209_v63, %s4772_s18 }
 0x213   : > { %2073 = vrot.lane.b32.xlu0 %v5209_v63, %s4762_s27 }
 0x215   : > { %1915 = vrot.lane.b32.xlu1 %v5229_v6, %s4772_s18 }
 0x217   : > { %2077 = vrot.lane.b32.xlu0 %v5229_v6, %s4762_s27 }
 0x219   : > { %2071 = vrot.lane.b32.xlu1 %v5200_v34, %s4762_s27 }
 0x21b   : > { %2233 = vrot.lane.b32.xlu0 %v5200_v34, %s4759_s21 }
 0x21d   : > { %2075 = vrot.lane.b32.xlu1 %v5218_v52, %s4762_s27 }
 0x21f   : > { %2237 = vrot.lane.b32.xlu0 %v5218_v52, %s4759_s21 }
 0x221   : > { %2231 = vrot.lane.b32.xlu1 %v5191_v33, %s4759_s21 }
 0x223   : > { %2394 = vperm.xlu0 %4745, %v2391_v38  }
 0x225   : > { %2235 = vrot.lane.b32.xlu1 %v5209_v63, %s4759_s21 }
 0x229   : > { %2239 = vrot.lane.b32.xlu1 %v5229_v6, %s4759_s21 }
 0x22d   : > { %2438 = vrot.lane.b32.xlu1 %v4768_v30, %s4769_s13 }
 0x23d   : > { %v951_v41 = vpop.permute.xlu1 %950 }
 0x23e   : > { %v961_v62 = vsel %vm960_vm11, %v949_v22, %v951_v41 }
 0x23f   : > { %v972_v55 = vsel %vm970_vm12, %v961_v62, 0 }
 0x241   : > { %v953_v43 = vpop.permute.xlu0 %952 }
 0x242   : > { %v962_v51 = vsel %vm960_vm11, %v951_v41, %v953_v43 }
 0x243   : > { %v955_v28 = vpop.permute.xlu1 %954  ;;  %4460 = vmatprep.subr.msk.bf16.mxu0 %vm970_vm12, %v962_v51 }
 0x244   : > { %987 = vmatpush1.bf16.msra.mxu0 %v972_v55  ;;  %v963_v61 = vsel %vm960_vm11, %v953_v43, %v955_v28 }
 0x245   : > { %v957_v37 = vpop.permute.xlu0 %956  ;;  %4611 = vmatprep.subr.bf16.mxu0 %v4758_v5  ;;  %v978_v27 = vsel %vm970_vm12, %v963_v61, 0 }
 0x246   : > { %v964_v15 = vsel %vm960_vm11, %v955_v28, %v957_v37 }
 0x247   : > { %4461 = vmatmul.mubr.msk.bf16.vlgmr.msra.gmra.mrb[0].mxu0 %vm966_vm13, %v4459_v60  ;;  %4462 = vmatprep.subr.msk.bf16.mxu1 %vm970_vm12, %v964_v15  ;;  %v4476_v15 = vld [vmem:[%s6067_s4 + $0xc] sm:$0xf] }
 0x248   : > { %1028 = vmatpush1.bf16.msra.mxu1 %v978_v27  ;;  %4613 = vmatprep.mubr.msk.bf16.mxu0 %vm4773_vm14, %v4758_v5 }
 0x249   : > { %v1109_v54 = vpop.permute.xlu0 %1108 }
 0x24b   : > { %4463 = vmatmul.mubr.msk.bf16.vlgmr.msra.gmra.mrb[0].mxu1 %vm966_vm13, %v4459_v60 }
 0x24c   : > { %1176 = vmatprep.mubr.bf16.mxu1 %v4757_v3 }
 0x24d   : > { %v1113_v57 = vpop.permute.xlu0 %1112 }
 0x24f   : > { %v959_v56 = vpop.permute.xlu1 %958 }
 0x250   : > { %v965_v7 = vsel %vm960_vm11, %v957_v37, %v959_v56 }
 0x251   : > { %v984_v24 = vsel %vm970_vm12, %v965_v7, 0  ;;  %v1117_v12 = vpop.permute.xlu0 %1116 }
 0x252   : > { %4612 = vmatpush3.bf16.msra.mxu0 %v984_v24  ;;  %v5388_v24 = vld [vmem:[#allocation2] sm:$0xff] }
 0x253   : > { %v1111_v0 = vpop.permute.xlu1 %1110 }
 0x254   : > { %v1121_v39 = vsel %vm911_vm10, %v1109_v54, %v1111_v0  ;;  %v1122_v18 = vsel %vm911_vm10, %v1111_v0, %v1113_v57 }
 0x255   : > { %4614 = vmatmul.mubr.msk.bf16.vlgmr.msra.gmra.mrb[4].mxu0 %vm966_vm13, %v4459_v60  ;;  %4465 = vmatprep.subr.msk.bf16.mxu1 %vm970_vm12, %v1122_v18  ;;  %v1130_v4 = vsel %vm970_vm12, %v1121_v39, 0  ;;  %v1269_v19 = vpop.permute.xlu0 %1268  ;;  %v1602_v39 = vsel %vm970_vm12, %v5191_v33, 0  ;;  %v4482_v33 = vld [vmem:[%s6067_s4 + $0x10] sm:$0xf] }
 0x256   : > { %1145 = vmatpush1.bf16.msra.mxu1 %v1130_v4  ;;  %1217 = vmatprep.mubr.bf16.mxu0 %v4757_v3 }
 0x257   : > { %v1115_v32 = vpop.permute.xlu1 %1114  ;;  %4617 = vmatprep.subr.bf16.mxu1 %v4758_v5 }
 0x258   : > { %v1123_v25 = vsel %vm911_vm10, %v1113_v57, %v1115_v32  ;;  %v1124_v14 = vsel %vm911_vm10, %v1115_v32, %v1117_v12  ;;  %v1614_v32 = vsel %vm970_vm12, %v5229_v6, 0 }
 0x259   : > { %4466 = vmatmul.mubr.msk.bf16.vlgmr.msra.gmra.mrb[4].mxu1 %vm966_vm13, %v939_v26  ;;  %4467 = vmatprep.subr.msk.bf16.mxu0 %vm970_vm12, %v1124_v14  ;;  %v1136_v20 = vsel %vm970_vm12, %v1123_v25, 0  ;;  %v1273_v16 = vpop.permute.xlu0 %1272 }
 0x25a   : > { %1186 = vmatpush1.bf16.msra.mxu0 %v1136_v20  ;;  %4619 = vmatprep.mubr.msk.bf16.mxu1 %vm4773_vm14, %v4758_v5 }
 0x25b   : > { %v1119_v58 = vpop.permute.xlu1 %1118 }
 0x25c   : > { %v1125_v11 = vsel %vm911_vm10, %v1117_v12, %v1119_v58 }
 0x25d   : > { %v1142_v53 = vsel %vm970_vm12, %v1125_v11, 0  ;;  %4468 = vmatmul.mubr.msk.bf16.vlgmr.msra.gmra.mrb[8].mxu0 %vm966_vm13, %v939_v26  ;;  %v1277_v21 = vpop.permute.xlu0 %1276 }
 0x25e   : > { %4618 = vmatpush3.bf16.msra.mxu1 %v1142_v53  ;;  %1336 = vmatprep.mubr.bf16.mxu0 %v4757_v3 }
 0x25f   : > { %v1271_v44 = vpop.permute.xlu1 %1270 }
 0x260   : > { %v1281_v29 = vsel %vm1280_vm15, %v1269_v19, %v1271_v44  ;;  %v1282_v48 = vsel %vm1280_vm15, %v1271_v44, %v1273_v16 }
 0x261   : > { %4620 = vmatmul.mubr.msk.bf16.vlgmr.msra.gmra.mrb[8].mxu1 %vm966_vm13, %v939_v26  ;;  %4471 = vmatprep.subr.msk.bf16.mxu0 %vm970_vm12, %v1282_v48  ;;  %v1290_v49 = vsel %vm970_vm12, %v1281_v29, 0  ;;  %v1434_v1 = vpop.permute.xlu0 %1433 }
 0x262   : > { %1305 = vmatpush1.bf16.msra.mxu0 %v1290_v49  ;;  %1377 = vmatprep.mubr.bf16.mxu1 %v4757_v3 }
 0x263   : > { %v1275_v36 = vpop.permute.xlu1 %1274  ;;  %4623 = vmatprep.subr.bf16.mxu0 %v4758_v5 }
 0x264   : > { %v1283_v47 = vsel %vm1280_vm15, %v1273_v16, %v1275_v36  ;;  %v1284_v40 = vsel %vm1280_vm15, %v1275_v36, %v1277_v21 }
 0x265   : > { %4472 = vmatmul.mubr.msk.bf16.vlgmr.msra.gmra.mrb[12].mxu0 %vm966_vm13, %v4470_v59  ;;  %4473 = vmatprep.subr.msk.bf16.mxu1 %vm970_vm12, %v1284_v40  ;;  %v1296_v38 = vsel %vm970_vm12, %v1283_v47, 0  ;;  %v1438_v22 = vpop.permute.xlu0 %1437 }
 0x266   : > { %1346 = vmatpush1.bf16.msra.mxu1 %v1296_v38  ;;  %4625 = vmatprep.mubr.msk.bf16.mxu0 %vm4773_vm14, %v4758_v5 }
 0x267   : > { %v1279_v41 = vpop.permute.xlu1 %1278 }
 0x268   : > { %v1285_v62 = vsel %vm1280_vm15, %v1277_v21, %v1279_v41  ;;  %v4488_v21 = vld [vmem:[%s6067_s4 + $0x14] sm:$0xf] }
 0x269   : > { %v1302_v43 = vsel %vm970_vm12, %v1285_v62, 0  ;;  %4474 = vmatmul.mubr.msk.bf16.vlgmr.msra.gmra.mrb[12].mxu1 %vm966_vm13, %v4470_v59  ;;  %v1442_v51 = vpop.permute.xlu0 %1441  ;;  %v4494_v62 = vld [vmem:[%s6067_s4 + $0x18] sm:$0xf] }
 0x26a   : > { %4624 = vmatpush3.bf16.msra.mxu0 %v1302_v43  ;;  %1501 = vmatprep.mubr.bf16.mxu1 %v4757_v3 }
 0x26b   : > { %v1436_v28 = vpop.permute.xlu1 %1435 }
 0x26c   : > { %v1446_v55 = vsel %vm1445_vm8, %v1434_v1, %v1436_v28  ;;  %v1447_v60 = vsel %vm1445_vm8, %v1436_v28, %v1438_v22 }
 0x26d   : > { %4626 = vmatmul.mubr.msk.bf16.vlgmr.msra.gmra.mrb[16].mxu0 %vm966_vm13, %v4470_v59  ;;  %4477 = vmatprep.subr.msk.bf16.mxu1 %vm970_vm12, %v1447_v60  ;;  %v1455_v61 = vsel %vm970_vm12, %v1446_v55, 0  ;;  %v1746_v37 = vpop.permute.xlu0 %1745 }
 0x26e   : > { %1470 = vmatpush1.bf16.msra.mxu1 %v1455_v61  ;;  %1542 = vmatprep.mubr.bf16.mxu0 %v4757_v3 }
 0x26f   : > { %v1440_v27 = vpop.permute.xlu1 %1439  ;;  %4629 = vmatprep.subr.bf16.mxu1 %v4758_v5 }
 0x270   : > { %v1448_v54 = vsel %vm1445_vm8, %v1438_v22, %v1440_v27  ;;  %v1449_v57 = vsel %vm1445_vm8, %v1440_v27, %v1442_v51 }
 0x271   : > { %4478 = vmatmul.mubr.msk.bf16.vlgmr.msra.gmra.mrb[16].mxu1 %vm966_vm13, %v4476_v15  ;;  %4479 = vmatprep.subr.msk.bf16.mxu0 %vm970_vm12, %v1449_v57  ;;  %v1461_v56 = vsel %vm970_vm12, %v1448_v54, 0  ;;  %v1750_v7 = vpop.permute.xlu0 %1749 }
 0x272   : > { %1511 = vmatpush1.bf16.msra.mxu0 %v1461_v56  ;;  %4631 = vmatprep.mubr.msk.bf16.mxu1 %vm4773_vm14, %v5388_v24  ;;  %v4500_v56 = vld [vmem:[%s6067_s4 + $0x1c] sm:$0xf] }
 0x273   : > { %v1444_v12 = vpop.permute.xlu1 %1443  ;;  %4483 = vmatprep.subr.msk.bf16.mxu0 %vm970_vm12, %v5200_v34  ;;  %v1608_v34 = vsel %vm970_vm12, %v5209_v63, 0 }
 0x274   : > { %v1450_v5 = vsel %vm1445_vm8, %v1442_v51, %v1444_v12 }
 0x275   : > { %v1467_v0 = vsel %vm970_vm12, %v1450_v5, 0  ;;  %4480 = vmatmul.mubr.msk.bf16.vlgmr.msra.gmra.mrb[20].mxu0 %vm966_vm13, %v4476_v15  ;;  %v1754_v4 = vpop.permute.xlu0 %1753 }
 0x276   : > { %4630 = vmatpush3.bf16.msra.mxu1 %v1467_v0  ;;  %1617 = vmatpush1.bf16.msra.mxu0 %v1602_v39  ;;  %v1776_v49 = vsel %vm970_vm12, %v1754_v4, 0 }
 0x277   : > { %v1748_v18 = vpop.permute.xlu1 %1747  ;;  %4485 = vmatprep.subr.msk.bf16.mxu1 %vm970_vm12, %v5218_v52  ;;  %1648 = vmatprep.mubr.bf16.mxu0 %v4757_v3 }
 0x278   : > { %4635 = vmatprep.subr.bf16.mxu0 %v5388_v24  ;;  %v1757_v19 = vsel %vm458_vm1, %v1748_v18, %v1750_v7  ;;  %v1756_v25 = vsel %vm458_vm1, %v1746_v37, %v1748_v18 }
 0x279   : > { %4632 = vmatmul.mubr.msk.bf16.vlgmr.msra.gmra.mrb[20].mxu1 %vm966_vm13, %v4476_v15  ;;  %v1910_v63 = vpop.permute.xlu0 %1909  ;;  %v1764_v20 = vsel %vm970_vm12, %v1756_v25, 0 }
 0x27a   : > { %1658 = vmatpush1.bf16.msra.mxu1 %v1608_v34  ;;  %1689 = vmatprep.mubr.bf16.mxu1 %v4757_v3 }
 0x27b   : > { %v1752_v52 = vpop.permute.xlu1 %1751  ;;  %4489 = vmatprep.subr.msk.bf16.mxu1 %vm970_vm12, %v1757_v19  ;;  %v4506_v19 = vld [vmem:[%s6067_s4 + $0x20] sm:$0xf] }
 0x27c   : > { %v1759_v26 = vsel %vm458_vm1, %v1752_v52, %v1754_v4  ;;  %v1758_v16 = vsel %vm458_vm1, %v1750_v7, %v1752_v52 }
 0x27d   : > { %4484 = vmatmul.mubr.msk.bf16.vlgmr.msra.gmra.mrb[24].mxu0 %vm966_vm13, %v4482_v33  ;;  %v1914_v58 = vpop.permute.xlu0 %1913  ;;  %v1770_v53 = vsel %vm970_vm12, %v1758_v16, 0 }
 0x27e   : > { %4636 = vmatpush3.bf16.msra.mxu0 %v1614_v32  ;;  %4637 = vmatprep.mubr.msk.bf16.mxu0 %vm4773_vm14, %v5388_v24 }
 0x27f   : > { %v1908_v14 = vpop.permute.xlu1 %1907  ;;  %4491 = vmatprep.subr.msk.bf16.mxu0 %vm970_vm12, %v1759_v26 }
 0x280   : > { %v1918_v1 = vsel %vm1917_vm7, %v1908_v14, %v1910_v63 }
 0x281   : > { %4486 = vmatmul.mubr.msk.bf16.vlgmr.msra.gmra.mrb[24].mxu1 %vm966_vm13, %v4482_v33  ;;  %v2070_v48 = vpop.permute.xlu0 %2069  ;;  %v1926_v36 = vsel %vm970_vm12, %v1918_v1, 0 }
 0x282   : > { %1779 = vmatpush1.bf16.msra.mxu1 %v1764_v20  ;;  %1810 = vmatprep.mubr.bf16.mxu1 %v4757_v3 }
 0x283   : > { %v1912_v6 = vpop.permute.xlu1 %1911  ;;  %4641 = vmatprep.subr.bf16.mxu1 %v5388_v24 }
 0x284   : > { %v1919_v11 = vsel %vm1917_vm7, %v1910_v63, %v1912_v6  ;;  %v1920_v47 = vsel %vm1917_vm7, %v1912_v6, %v1914_v58 }
 0x285   : > { %4638 = vmatmul.mubr.msk.bf16.vlgmr.msra.gmra.mrb[28].mxu0 %vm966_vm13, %v4482_v33  ;;  %v2074_v40 = vpop.permute.xlu0 %2073  ;;  %v1932_v22 = vsel %vm970_vm12, %v1920_v47, 0 }
 0x286   : > { %1820 = vmatpush1.bf16.msra.mxu0 %v1770_v53  ;;  %1851 = vmatprep.mubr.bf16.mxu0 %v4757_v3 }
 0x287   : > { %v1916_v44 = vpop.permute.xlu1 %1915  ;;  %4495 = vmatprep.subr.msk.bf16.mxu0 %vm970_vm12, %v1919_v11 }
 0x288   : > { %v1921_v29 = vsel %vm1917_vm7, %v1914_v58, %v1916_v44  ;;  %v1938_v28 = vsel %vm970_vm12, %v1916_v44, 0 }
 0x289   : > { %4490 = vmatmul.mubr.msk.bf16.vlgmr.msra.gmra.mrb[28].mxu1 %vm966_vm13, %v4488_v21  ;;  %v2078_v51 = vpop.permute.xlu0 %2077 }
 0x28a   : > { %4642 = vmatpush3.bf16.msra.mxu1 %v1776_v49  ;;  %4643 = vmatprep.mubr.msk.bf16.mxu1 %vm4773_vm14, %v5388_v24  ;;  %v2100_v5 = vsel %vm970_vm12, %v2078_v51, 0 }
 0x28b   : > { %v2072_v59 = vpop.permute.xlu1 %2071  ;;  %4497 = vmatprep.subr.msk.bf16.mxu1 %vm970_vm12, %v1921_v29 }
 0x28c   : > { %v2081_v41 = vsel %vm556_vm3, %v2072_v59, %v2074_v40  ;;  %v2080_v55 = vsel %vm556_vm3, %v2070_v48, %v2072_v59 }
 0x28d   : > { %4492 = vmatmul.mubr.msk.bf16.vlgmr.msra.gmra.mrb[32].mxu0 %vm966_vm13, %v4488_v21  ;;  %v2088_v37 = vsel %vm970_vm12, %v2080_v55, 0  ;;  %v2234_v27 = vpop.permute.xlu0 %2233 }
 0x28e   : > { %1941 = vmatpush1.bf16.msra.mxu0 %v1926_v36  ;;  %1972 = vmatprep.mubr.bf16.mxu0 %v4757_v3 }
 0x28f   : > { %v2076_v38 = vpop.permute.xlu1 %2075  ;;  %4647 = vmatprep.subr.bf16.mxu0 %v5388_v24 }
 0x290   : > { %v2083_v60 = vsel %vm556_vm3, %v2076_v38, %v2078_v51  ;;  %v2082_v15 = vsel %vm556_vm3, %v2074_v40, %v2076_v38 }
 0x291   : > { %4644 = vmatmul.mubr.msk.bf16.vlgmr.msra.gmra.mrb[32].mxu1 %vm966_vm13, %v4488_v21  ;;  %v2094_v54 = vsel %vm970_vm12, %v2082_v15, 0  ;;  %v2238_v12 = vpop.permute.xlu0 %2237 }
 0x292   : > { %1982 = vmatpush1.bf16.msra.mxu1 %v1932_v22  ;;  %2013 = vmatprep.mubr.bf16.mxu1 %v4757_v3 }
 0x293   : > { %v2232_v43 = vpop.permute.xlu1 %2231  ;;  %4501 = vmatprep.subr.msk.bf16.mxu1 %vm970_vm12, %v2081_v41 }
 0x294   : > { %v2242_v0 = vsel %vm630_vm4, %v2232_v43, %v2234_v27 }
 0x295   : > { %4496 = vmatmul.mubr.msk.bf16.vlgmr.msra.gmra.mrb[36].mxu0 %vm966_vm13, %v4494_v62  ;;  %v2250_v18 = vsel %vm970_vm12, %v2242_v0, 0 }
 0x296   : > { %4648 = vmatpush3.bf16.msra.mxu0 %v1938_v28  ;;  %4649 = vmatprep.mubr.msk.bf16.mxu0 %vm4773_vm14, %v5388_v24 }
 0x297   : > { %4503 = vmatprep.subr.msk.bf16.mxu0 %vm970_vm12, %v2083_v60  ;;  %v2236_v61 = vpop.permute.xlu1 %2235 }
 0x298   : > { %v2243_v57 = vsel %vm630_vm4, %v2234_v27, %v2236_v61  ;;  %v2244_v4 = vsel %vm630_vm4, %v2236_v61, %v2238_v12 }
 0x299   : > { %4498 = vmatmul.mubr.msk.bf16.vlgmr.msra.gmra.mrb[36].mxu1 %vm966_vm13, %v4494_v62  ;;  %v2256_v34 = vsel %vm970_vm12, %v2244_v4, 0 }
 0x29a   : > { %2103 = vmatpush1.bf16.msra.mxu1 %v2088_v37  ;;  %2134 = vmatprep.mubr.bf16.mxu1 %v4757_v3 }
 0x29b   : > { %4653 = vmatprep.subr.bf16.mxu1 %v5388_v24  ;;  %v2240_v7 = vpop.permute.xlu1 %2239 }
 0x29c   : > { %v2245_v39 = vsel %vm630_vm4, %v2238_v12, %v2240_v7  ;;  %v2262_v33 = vsel %vm970_vm12, %v2240_v7, 0 }
 0x29d   : > { %4650 = vmatmul.mubr.msk.bf16.vlgmr.msra.gmra.mrb[40].mxu0 %vm966_vm13, %v4494_v62 }
 0x29e   : > { %2144 = vmatpush1.bf16.msra.mxu0 %v2094_v54  ;;  %2175 = vmatprep.mubr.bf16.mxu0 %v4757_v3 }
 0x29f   : > { %4507 = vmatprep.subr.msk.bf16.mxu0 %vm970_vm12, %v2243_v57 }
 0x2a1   : > { %4502 = vmatmul.mubr.msk.bf16.vlgmr.msra.gmra.mrb[40].mxu1 %vm966_vm13, %v4500_v56 }
 0x2a2   : > { %4654 = vmatpush3.bf16.msra.mxu1 %v2100_v5  ;;  %4655 = vmatprep.mubr.msk.bf16.mxu1 %vm4773_vm14, %v5388_v24 }
 0x2a3   : > { %4509 = vmatprep.subr.msk.bf16.mxu1 %vm970_vm12, %v2245_v39 }
 0x2a5   : > { %4504 = vmatmul.mubr.msk.bf16.vlgmr.msra.gmra.mrb[44].mxu0 %vm966_vm13, %v4500_v56 }
 0x2a6   : > { %2265 = vmatpush1.bf16.msra.mxu0 %v2250_v18  ;;  %2296 = vmatprep.mubr.bf16.mxu0 %v4757_v3 }
 0x2a7   : > { %4659 = vmatprep.subr.bf16.mxu0 %v5388_v24 }
 0x2a9   : > { %4656 = vmatmul.mubr.msk.bf16.vlgmr.msra.gmra.mrb[44].mxu1 %vm966_vm13, %v4500_v56 }
 0x2aa   : > { %2306 = vmatpush1.bf16.msra.mxu1 %v2256_v34  ;;  %2337 = vmatprep.mubr.bf16.mxu1 %v4757_v3 }
 0x2ad   : > { %4508 = vmatmul.mubr.msk.bf16.vlgmr.msra.gmra.mrb[48].mxu0 %vm966_vm13, %v4506_v19 }
 0x2ae   : > { %4660 = vmatpush3.bf16.msra.mxu0 %v2262_v33  ;;  %4661 = vmatprep.mubr.msk.bf16.mxu0 %vm4773_vm14, %v5388_v24 }
 0x2b1   : > { %4510 = vmatmul.mubr.msk.bf16.vlgmr.msra.gmra.mrb[48].mxu1 %vm966_vm13, %v4506_v19 }
 0x2b2   : > { %2505 = vmatprep.mubr.bf16.mxu1 %v4757_v3 }
 0x2b5   : > { %4662 = vmatmul.mubr.msk.bf16.vlgmr.msra.gmra.mrb[52].mxu0 %vm966_vm13, %v4506_v19 }
 0x2b6   : > { %2546 = vmatprep.mubr.bf16.mxu0 %v4757_v3 }
 0x31a   : > { %v1020_v52 = vpop.f32.mrb[0].mxu0 }
 0x31b   : > { %v1022_v26 = vpop.f32.mrb[1].mxu0 }
 0x31c   : > { %v1024_v32 = vpop.f32.mrb[2].mxu0 }
 0x31d   : > { %v1025_v63 = vpop.f32.mrb[3].mxu0 }
 0x31e   : > { %v1061_v25 = vpop.f32.mrb[0].mxu1 }
 0x31f   : > { %v1063_v14 = vpop.f32.mrb[1].mxu1 }
 0x320   : > { %v1065_v20 = vpop.f32.mrb[2].mxu1 }
 0x321   : > { %v1066_v16 = vpop.f32.mrb[3].mxu1 }
 0x328   : > { %v1102_v6 = vpop.f32.mrb[4].mxu0 }
 0x329   : > { %v4615_v58 = vpop.f32.mrb[5].mxu0 }
 0x32a   : > { %v1105_v11 = vpop.f32.mrb[6].mxu0 }
 0x32b   : > { %v4616_v53 = vpop.f32.mrb[7].mxu0 }
 0x32c   : > { %v1178_v21 = vpop.f32.mrb[4].mxu1 }
 0x32d   : > { %v1179_v44 = vadd.f32 %v1178_v21, %v1020_v52  ;;  %v1180_v29 = vpop.f32.mrb[5].mxu1 }
 0x32e   : > { %v1181_v48 = vadd.f32 %v1180_v29, %v1022_v26  ;;  %v1182_v49 = vpop.f32.mrb[6].mxu1 }
 0x32f   : > { %v1183_v1 = vpop.f32.mrb[7].mxu1 }
 0x330   : > { %v1219_v59 = vpop.f32.mrb[8].mxu0 }
 0x331   : > { %v1220_v36 = vadd.f32 %v1219_v59, %v1061_v25  ;;  %v1221_v47 = vpop.f32.mrb[9].mxu0 }
 0x332   : > { %v1222_v40 = vadd.f32 %v1221_v47, %v1063_v14  ;;  %v1223_v38 = vpop.f32.mrb[10].mxu0 }
 0x333   : > { %v1224_v22 = vpop.f32.mrb[11].mxu0 }
 0x334   : > { %v1260_v41 = vpop.f32.mrb[8].mxu1 }
 0x335   : > { %v1261_v62 = vadd.f32 %v1260_v41, %v1102_v6  ;;  %v4621_v43 = vpop.f32.mrb[9].mxu1 }
 0x336   : > { %v1263_v51 = vpop.f32.mrb[10].mxu1 }
 0x337   : > { %v4622_v28 = vpop.f32.mrb[11].mxu1 }
 0x338   : > { %v1338_v55 = vpop.f32.mrb[12].mxu0 }
 0x339   : > { %v1426_v60 = vadd.f32 %v1338_v55, %v1179_v44  ;;  %v1340_v61 = vpop.f32.mrb[13].mxu0 }
 0x33a   : > { %v1427_v37 = vadd.f32 %v1340_v61, %v1181_v48  ;;  %v1342_v15 = vpop.f32.mrb[14].mxu0 }
 0x33b   : > { %v1343_v27 = vpop.f32.mrb[15].mxu0 }
 0x33c   : > { %v1379_v54 = vpop.f32.mrb[12].mxu1 }
 0x33d   : > { %v1428_v57 = vadd.f32 %v1379_v54, %v1220_v36  ;;  %v1381_v56 = vpop.f32.mrb[13].mxu1 }
 0x33e   : > { %v1429_v7 = vadd.f32 %v1381_v56, %v1222_v40  ;;  %v1383_v12 = vpop.f32.mrb[14].mxu1 }
 0x33f   : > { %v1384_v5 = vpop.f32.mrb[15].mxu1 }
 0x340   : > { %v1420_v0 = vpop.f32.mrb[16].mxu0 }
 0x341   : > { %v1430_v39 = vadd.f32 %v1420_v0, %v1261_v62  ;;  %v4627_v18 = vpop.f32.mrb[17].mxu0 }
 0x342   : > { %v1423_v4 = vpop.f32.mrb[18].mxu0 }
 0x343   : > { %v4628_v34 = vpop.f32.mrb[19].mxu0 }
 0x344   : > { %v1503_v19 = vpop.f32.mrb[16].mxu1 }
 0x345   : > { %v1591_v33 = vadd.f32 %v1503_v19, %v1426_v60  ;;  %v1505_v52 = vpop.f32.mrb[17].mxu1 }
 0x346   : > { %v1592_v26 = vadd.f32 %v1505_v52, %v1427_v37  ;;  %v1507_v32 = vpop.f32.mrb[18].mxu1 }
 0x347   : > { %v1508_v63 = vpop.f32.mrb[19].mxu1 }
 0x348   : > { %v1544_v25 = vpop.f32.mrb[20].mxu0 }
 0x349   : > { %v1593_v14 = vadd.f32 %v1544_v25, %v1428_v57  ;;  %v1546_v20 = vpop.f32.mrb[21].mxu0 }
 0x34a   : > { %v1594_v16 = vadd.f32 %v1546_v20, %v1429_v7  ;;  %v1548_v6 = vpop.f32.mrb[22].mxu0 }
 0x34b   : > { %v1549_v58 = vpop.f32.mrb[23].mxu0 }
 0x34c   : > { %v1585_v11 = vpop.f32.mrb[20].mxu1 }
 0x34d   : > { %v1595_v53 = vadd.f32 %v1585_v11, %v1430_v39  ;;  %v4633_v21 = vpop.f32.mrb[21].mxu1 }
 0x34e   : > { %v1588_v44 = vpop.f32.mrb[22].mxu1 }
 0x34f   : > { %v4634_v29 = vpop.f32.mrb[23].mxu1 }
 0x350   : > { %v1650_v48 = vpop.f32.mrb[24].mxu0 }
 0x351   : > { %v1738_v49 = vadd.f32 %v1650_v48, %v1591_v33  ;;  %v1652_v1 = vpop.f32.mrb[25].mxu0 }
 0x352   : > { %v1739_v59 = vadd.f32 %v1652_v1, %v1592_v26  ;;  %v1654_v36 = vpop.f32.mrb[26].mxu0 }
 0x353   : > { %v1655_v47 = vpop.f32.mrb[27].mxu0 }
 0x354   : > { %v1691_v40 = vpop.f32.mrb[24].mxu1 }
 0x355   : > { %v1740_v38 = vadd.f32 %v1691_v40, %v1593_v14  ;;  %v1693_v22 = vpop.f32.mrb[25].mxu1 }
 0x356   : > { %v1741_v41 = vadd.f32 %v1693_v22, %v1594_v16  ;;  %v1695_v62 = vpop.f32.mrb[26].mxu1 }
 0x357   : > { %v1696_v43 = vpop.f32.mrb[27].mxu1 }
 0x358   : > { %v1732_v51 = vpop.f32.mrb[28].mxu0 }
 0x359   : > { %v1742_v28 = vadd.f32 %v1732_v51, %v1595_v53  ;;  %v4639_v55 = vpop.f32.mrb[29].mxu0 }
 0x35a   : > { %v1735_v60 = vpop.f32.mrb[30].mxu0 }
 0x35b   : > { %v4640_v61 = vpop.f32.mrb[31].mxu0 }
 0x35c   : > { %v1812_v37 = vpop.f32.mrb[28].mxu1 }
 0x35d   : > { %v1900_v15 = vadd.f32 %v1812_v37, %v1738_v49  ;;  %v1814_v27 = vpop.f32.mrb[29].mxu1 }
 0x35e   : > { %v1901_v54 = vadd.f32 %v1814_v27, %v1739_v59  ;;  %v1816_v57 = vpop.f32.mrb[30].mxu1 }
 0x35f   : > { %v1817_v56 = vpop.f32.mrb[31].mxu1 }
 0x360   : > { %v1853_v7 = vpop.f32.mrb[32].mxu0 }
 0x361   : > { %v1902_v12 = vadd.f32 %v1853_v7, %v1740_v38  ;;  %v1855_v5 = vpop.f32.mrb[33].mxu0  ;;  %v2395_v7 = vpop.permute.xlu0 %2394 }
 0x362   : > { %v1903_v0 = vadd.f32 %v1855_v5, %v1741_v41  ;;  %v1857_v39 = vpop.f32.mrb[34].mxu0 }
 0x363   : > { %v1858_v18 = vpop.f32.mrb[35].mxu0 }
 0x364   : > { %v1894_v4 = vpop.f32.mrb[32].mxu1 }
 0x365   : > { %v1904_v34 = vadd.f32 %v1894_v4, %v1742_v28  ;;  %v4645_v19 = vpop.f32.mrb[33].mxu1 }
 0x366   : > { %v1897_v33 = vpop.f32.mrb[34].mxu1 }
 0x367   : > { %v4646_v52 = vpop.f32.mrb[35].mxu1 }
 0x368   : > { %v1974_v26 = vpop.f32.mrb[36].mxu0 }
 0x369   : > { %v2062_v32 = vadd.f32 %v1974_v26, %v1900_v15  ;;  %v1976_v63 = vpop.f32.mrb[37].mxu0 }
 0x36a   : > { %v2063_v25 = vadd.f32 %v1976_v63, %v1901_v54  ;;  %v1978_v14 = vpop.f32.mrb[38].mxu0 }
 0x36b   : > { %v1979_v20 = vpop.f32.mrb[39].mxu0 }
 0x36c   : > { %v2015_v16 = vpop.f32.mrb[36].mxu1 }
 0x36d   : > { %v2064_v6 = vadd.f32 %v2015_v16, %v1902_v12  ;;  %v2017_v58 = vpop.f32.mrb[37].mxu1 }
 0x36e   : > { %v2065_v11 = vadd.f32 %v2017_v58, %v1903_v0  ;;  %v2019_v53 = vpop.f32.mrb[38].mxu1 }
 0x36f   : > { %v2020_v21 = vpop.f32.mrb[39].mxu1 }
 0x370   : > { %v2056_v44 = vpop.f32.mrb[40].mxu0 }
 0x371   : > { %v2066_v29 = vadd.f32 %v2056_v44, %v1904_v34  ;;  %v4651_v48 = vpop.f32.mrb[41].mxu0 }
 0x372   : > { %v2059_v49 = vpop.f32.mrb[42].mxu0 }
 0x373   : > { %v4652_v1 = vpop.f32.mrb[43].mxu0 }
 0x374   : > { %v2136_v59 = vpop.f32.mrb[40].mxu1 }
 0x375   : > { %v2224_v36 = vadd.f32 %v2136_v59, %v2062_v32  ;;  %v2138_v47 = vpop.f32.mrb[41].mxu1 }
 0x376   : > { %v2225_v40 = vadd.f32 %v2138_v47, %v2063_v25  ;;  %v2140_v38 = vpop.f32.mrb[42].mxu1 }
 0x377   : > { %v2141_v22 = vpop.f32.mrb[43].mxu1 }
 0x378   : > { %v2177_v41 = vpop.f32.mrb[44].mxu0 }
 0x379   : > { %v2226_v62 = vadd.f32 %v2177_v41, %v2064_v6  ;;  %v2179_v43 = vpop.f32.mrb[45].mxu0 }
 0x37a   : > { %v2227_v51 = vadd.f32 %v2179_v43, %v2065_v11  ;;  %v2181_v28 = vpop.f32.mrb[46].mxu0  ;;  %v4566_v43 = vld [vmem:[%s6071_s8 + $0x10] sm:$0xff] }
 0x37b   : > { %v2182_v55 = vpop.f32.mrb[47].mxu0  ;;  %v4565_v28 = vld [vmem:[%s6071_s8 + $0x8] sm:$0xff] }
 0x37c   : > { %v2218_v60 = vpop.f32.mrb[44].mxu1  ;;  %v4570_v55 = vld [vmem:[%s6071_s8 + $0x30] sm:$0xff] }
 0x37d   : > { %v2228_v61 = vadd.f32 %v2218_v60, %v2066_v29  ;;  %v4657_v37 = vpop.f32.mrb[45].mxu1  ;;  %v4567_v60 = vld [vmem:[%s6071_s8 + $0x18] sm:$0xff] }
 0x37e   : > { %v2221_v15 = vpop.f32.mrb[46].mxu1  ;;  %v4569_v37 = vld [vmem:[%s6071_s8 + $0x28] sm:$0xff] }
 0x37f   : > { %v4658_v27 = vpop.f32.mrb[47].mxu1  ;;  %v4571_v15 = vld [vmem:[%s6071_s8 + $0x38] sm:$0xff] }
 0x380   : > { %v2298_v54 = vpop.f32.mrb[48].mxu0  ;;  %v3908_v27 = vld [vmem:[%s6071_s8] sm:$0xff] }
 0x381   : > { %v2386_v57 = vadd.f32 %v2298_v54, %v2224_v36  ;;  %v2300_v56 = vpop.f32.mrb[49].mxu0  ;;  %v2439_v54 = vpop.permute.xlu1 %2438 }
 0x382   : > { %v2387_v12 = vadd.f32 %v2300_v56, %v2225_v40  ;;  %v2302_v5 = vpop.f32.mrb[50].mxu0 }
 0x383   : > { %v2397_v0 = vadd.f32 %v2395_v7, %v2386_v57  ;;  %v2303_v39 = vpop.f32.mrb[51].mxu0 }
 0x384   : > { %v2398_v18 = vadd.f32 %v2395_v7, %v2387_v12  ;;  %v2339_v4 = vpop.f32.mrb[48].mxu1  ;;  %v4512_v39 = vld [vmem:[%s6069_s6 + $0x4] sm:$0xf] }
 0x385   : > { %v2402_v34 = vmax.f32 %v2397_v0, 0.0  ;;  %v2388_v19 = vadd.f32 %v2339_v4, %v2226_v62  ;;  %v2341_v33 = vpop.f32.mrb[49].mxu1 }
 0x386   : > { %v2403_v52 = vmax.f32 %v2398_v18, 0.0  ;;  %v2389_v26 = vadd.f32 %v2341_v33, %v2227_v51  ;;  %v2343_v32 = vpop.f32.mrb[50].mxu1  ;;  %v4568_v51 = vld [vmem:[%s6071_s8 + $0x20] sm:$0xff] }
 0x387   : > { %v2407_v63 = vmul.f32 %v2402_v34, %v4903_v17  ;;  %v2399_v25 = vadd.f32 %v2395_v7, %v2388_v19  ;;  %v2344_v14 = vpop.f32.mrb[51].mxu1 }
 0x388   : > { %v2408_v20 = vmul.f32 %v2403_v52, %v5010_v42  ;;  %v2400_v16 = vadd.f32 %v2395_v7, %v2389_v26  ;;  %v2380_v6 = vpop.f32.mrb[52].mxu0 }
 0x389   : > { %v2404_v58 = vmax.f32 %v2399_v25, 0.0  ;;  %v2390_v11 = vadd.f32 %v2380_v6, %v2228_v61  ;;  %v4663_v53 = vpop.f32.mrb[53].mxu0  ;;  %v5501_v21 = vpack.c.bf16 %v2407_v63, %v2407_v63  ;;  %v4572_v61 = vld [vmem:[%s6071_s8 + $0x40] sm:$0xff] }
 0x38a   : > { %v2405_v44 = vmax.f32 %v2400_v16, 0.0  ;;  %v2383_v29 = vpop.f32.mrb[54].mxu0  ;;  %v5503_v48 = vpack.c.bf16 %v2408_v20, %v2408_v20 }
 0x38b   : > { %v2409_v49 = vmul.f32 %v2404_v58, %v5021_v46  ;;  %v2401_v1 = vadd.f32 %v2395_v7, %v2390_v11  ;;  %v4664_v59 = vpop.f32.mrb[55].mxu0  ;;  %2440 = vrot.lane.b32.xlu0 %v5501_v21, %s4769_s13  ;;  %v2429_v11 = vld [vmem:[%s6069_s6] sm:$0xf] }
 0x38c   : > { %v2410_v36 = vmul.f32 %v2405_v44, %v5017_v45  ;;  %2442 = vrot.lane.b32.xlu1 %v5503_v48, %s4769_s13 }
 0x38d   : > { %v2406_v47 = vmax.f32 %v2401_v1, 0.0  ;;  %v5511_v40 = vpack.c.bf16 %v2409_v49, %v2409_v49 }
 0x38e   : > { %v5513_v38 = vpack.c.bf16 %v2410_v36, %v2410_v36 }
 0x38f   : > { %v2411_v22 = vmul.f32 %v2406_v47, %v5029_v23  ;;  %2444 = vrot.lane.b32.xlu0 %v5511_v40, %s4769_s13 }
 0x390   : > { %2446 = vrot.lane.b32.xlu1 %v5513_v38, %s4769_s13 }
 0x391   : > { %2416 = vst.msk [vmem:[#allocation2 + $0x28] sm:$0xff] %vm364_vm9, %v2411_v22 }
 0x394   : > { %2595 = vrot.lane.b32.xlu1 %v4768_v30, %s4767_s12 }
 0x398   : > { %v2422_v41 = vld [vmem:[#allocation2 + $0x28] sm:$0xff]  ;;  %2599 = vrot.lane.b32.xlu1 %v5503_v48, %s4767_s12 }
 0x399   : > { %v5525_v62 = vpack.c.bf16 %v2422_v41, %v2422_v41 }
 0x39b   : > { %2448 = vrot.lane.b32.xlu0 %v5525_v62, %s4769_s13 }
 0x39c   : > { %2603 = vrot.lane.b32.xlu1 %v5513_v38, %s4767_s12 }
 0x39f   : > { %2597 = vrot.lane.b32.xlu0 %v5501_v21, %s4767_s12 }
 0x3a0   : > { %2754 = vrot.lane.b32.xlu1 %v4768_v30, %s4770_s14 }
 0x3a3   : > { %2601 = vrot.lane.b32.xlu0 %v5511_v40, %s4767_s12 }
 0x3a4   : > { %2758 = vrot.lane.b32.xlu1 %v5503_v48, %s4770_s14 }
 0x3a7   : > { %2605 = vrot.lane.b32.xlu0 %v5525_v62, %s4767_s12 }
 0x3a8   : > { %2762 = vrot.lane.b32.xlu1 %v5513_v38, %s4770_s14 }
 0x3ab   : > { %2756 = vrot.lane.b32.xlu0 %v5501_v21, %s4770_s14 }
 0x3ac   : > { %2918 = vrot.lane.b32.xlu1 %v4768_v30, %s4771_s17  ;;  %v3871_v30 = vld [vmem:[%s6070_s7] sm:$0xff] }
 0x3af   : > { %2760 = vrot.lane.b32.xlu0 %v5511_v40, %s4770_s14 }
 0x3b0   : > { %2922 = vrot.lane.b32.xlu1 %v5503_v48, %s4771_s17 }
 0x3b3   : > { %2764 = vrot.lane.b32.xlu0 %v5525_v62, %s4770_s14 }
 0x3b4   : > { %2926 = vrot.lane.b32.xlu1 %v5513_v38, %s4771_s17 }
 0x3b7   : > { %2920 = vrot.lane.b32.xlu0 %v5501_v21, %s4771_s17 }
 0x3b8   : > { %3229 = vrot.lane.b32.xlu1 %v5501_v21, %s4760_s25 }
 0x3bb   : > { %2924 = vrot.lane.b32.xlu0 %v5511_v40, %s4771_s17 }
 0x3bc   : > { %3233 = vrot.lane.b32.xlu1 %v5511_v40, %s4760_s25 }
 0x3bf   : > { %2928 = vrot.lane.b32.xlu0 %v5525_v62, %s4771_s17 }
 0x3c0   : > { %3237 = vrot.lane.b32.xlu1 %v5525_v62, %s4760_s25 }
 0x3c3   : > { %3231 = vrot.lane.b32.xlu0 %v5503_v48, %s4760_s25 }
 0x3c4   : > { %3392 = vrot.lane.b32.xlu1 %v5503_v48, %s4772_s18 }
 0x3c7   : > { %3235 = vrot.lane.b32.xlu0 %v5513_v38, %s4760_s25 }
 0x3c8   : > { %3396 = vrot.lane.b32.xlu1 %v5513_v38, %s4772_s18 }
 0x3cb   : > { %3390 = vrot.lane.b32.xlu0 %v5501_v21, %s4772_s18 }
 0x3cc   : > { %3551 = vrot.lane.b32.xlu1 %v5501_v21, %s4762_s27 }
 0x3cf   : > { %3394 = vrot.lane.b32.xlu0 %v5511_v40, %s4772_s18 }
 0x3d0   : > { %3555 = vrot.lane.b32.xlu1 %v5511_v40, %s4762_s27 }
 0x3d3   : > { %3398 = vrot.lane.b32.xlu0 %v5525_v62, %s4772_s18 }
 0x3d4   : > { %3559 = vrot.lane.b32.xlu1 %v5525_v62, %s4762_s27 }
 0x3d7   : > { %3553 = vrot.lane.b32.xlu0 %v5503_v48, %s4762_s27 }
 0x3d8   : > { %3714 = vrot.lane.b32.xlu1 %v5503_v48, %s4759_s21 }
 0x3db   : > { %3557 = vrot.lane.b32.xlu0 %v5513_v38, %s4762_s27 }
 0x3dc   : > { %3718 = vrot.lane.b32.xlu1 %v5513_v38, %s4759_s21 }
 0x3df   : > { %3712 = vrot.lane.b32.xlu0 %v5501_v21, %s4759_s21 }
 0x3e0   : > { %3874 = vperm.xlu1 %4746, %v3871_v30  }
 0x3e3   : > { %3716 = vrot.lane.b32.xlu0 %v5511_v40, %s4759_s21 }
 0x3e4   : > { %3978 = vperm.xlu1 %4746, %v4566_v43  }
 0x3e7   : > { %3720 = vrot.lane.b32.xlu0 %v5525_v62, %s4759_s21 }
 0x3e8   : > { %4074 = vperm.xlu1 %4746, %v4568_v51  }
 0x3eb   : > { %3930 = vperm.xlu0 %4745, %v4565_v28  }
 0x3ec   : > { %4160 = vperm.xlu1 %4746, %v4570_v55   ;;  %v4523_v55 = vld [vmem:[%s6069_s6 + $0x8] sm:$0xf] }
 0x3ef   : > { %4026 = vperm.xlu0 %4745, %v4567_v60  }
 0x3f0   : > { %4246 = vperm.xlu1 %4746, %v4572_v61  }
 0x3f3   : > { %4117 = vperm.xlu0 %4745, %v4569_v37  }
 0x3f7   : > { %4203 = vperm.xlu0 %4745, %v4571_v15  }
 0x3fb   : > { %3911 = vperm.xlu0 %4745, %v3908_v27  }
 0x3fd   : > { %v2441_v57 = vpop.permute.xlu0 %2440 }
 0x3fe   : > { %v2450_v56 = vsel %vm960_vm11, %v2439_v54, %v2441_v57  ;;  %v2443_v7 = vpop.permute.xlu1 %2442 }
 0x3ff   : > { %v2459_v12 = vsel %vm970_vm12, %v2450_v56, 0  ;;  %v2451_v5 = vsel %vm960_vm11, %v2441_v57, %v2443_v7 }
 0x400   : > { %4513 = vmatprep.subr.msk.bf16.mxu1 %vm970_vm12, %v2451_v5 }
 0x401   : > { %2474 = vmatpush1.bf16.msra.mxu1 %v2459_v12  ;;  %v2445_v0 = vpop.permute.xlu0 %2444 }
 0x402   : > { %v2452_v18 = vsel %vm960_vm11, %v2443_v7, %v2445_v0  ;;  %v2447_v4 = vpop.permute.xlu1 %2446  ;;  %4665 = vmatprep.subr.bf16.mxu1 %v5388_v24 }
 0x403   : > { %v2465_v34 = vsel %vm970_vm12, %v2452_v18, 0  ;;  %v2453_v19 = vsel %vm960_vm11, %v2445_v0, %v2447_v4 }
 0x404   : > { %4514 = vmatmul.mubr.msk.bf16.vlgmr.msra.gmra.mrb[52].mxu1 %vm966_vm13, %v4512_v39  ;;  %4515 = vmatprep.subr.msk.bf16.mxu0 %vm970_vm12, %v2453_v19 }
 0x405   : > { %2515 = vmatpush1.bf16.msra.mxu0 %v2465_v34  ;;  %4667 = vmatprep.mubr.msk.bf16.mxu1 %vm4773_vm14, %v5388_v24 }
 0x406   : > { %v2596_v33 = vpop.permute.xlu1 %2595 }
 0x408   : > { %4516 = vmatmul.mubr.msk.bf16.vlgmr.msra.gmra.mrb[56].mxu0 %vm966_vm13, %v4512_v39 }
 0x409   : > { %2662 = vmatprep.mubr.bf16.mxu0 %v4757_v3 }
 0x40a   : > { %v2600_v52 = vpop.permute.xlu1 %2599 }
 0x40d   : > { %v2449_v26 = vpop.permute.xlu0 %2448 }
 0x40e   : > { %v2454_v32 = vsel %vm960_vm11, %v2447_v4, %v2449_v26  ;;  %v2604_v63 = vpop.permute.xlu1 %2603  ;;  %v4529_v4 = vld [vmem:[%s6069_s6 + $0xc] sm:$0xf]  ;;  %vm6081_vm11 = vcmask 621568  }
 0x40f   : > { %v2471_v25 = vsel %vm970_vm12, %v2454_v32, 0 }
 0x410   : > { %4666 = vmatpush3.bf16.msra.mxu1 %v2471_v25 }
 0x411   : > { %v2598_v14 = vpop.permute.xlu0 %2597 }
 0x412   : > { %v2607_v20 = vsel %vm911_vm10, %v2596_v33, %v2598_v14  ;;  %v2608_v16 = vsel %vm911_vm10, %v2598_v14, %v2600_v52  ;;  %v2755_v6 = vpop.permute.xlu1 %2754 }
 0x413   : > { %v2616_v58 = vsel %vm970_vm12, %v2607_v20, 0  ;;  %4668 = vmatmul.mubr.msk.bf16.vlgmr.msra.gmra.mrb[56].mxu1 %vm966_vm13, %v4512_v39  ;;  %4518 = vmatprep.subr.msk.bf16.mxu0 %vm970_vm12, %v2608_v16  ;;  %v3086_v20 = vsel %vm970_vm12, %v5501_v21, 0  ;;  %v4535_v21 = vld [vmem:[%s6069_s6 + $0x10] sm:$0xf] }
 0x414   : > { %2631 = vmatpush1.bf16.msra.mxu0 %v2616_v58  ;;  %2703 = vmatprep.mubr.bf16.mxu1 %v4757_v3 }
 0x415   : > { %v2602_v53 = vpop.permute.xlu0 %2601  ;;  %4671 = vmatprep.subr.bf16.mxu0 %v5388_v24 }
 0x416   : > { %v2609_v44 = vsel %vm911_vm10, %v2600_v52, %v2602_v53  ;;  %v2610_v29 = vsel %vm911_vm10, %v2602_v53, %v2604_v63  ;;  %v2759_v49 = vpop.permute.xlu1 %2758 }
 0x417   : > { %v2622_v1 = vsel %vm970_vm12, %v2609_v44, 0  ;;  %4519 = vmatmul.mubr.msk.bf16.vlgmr.msra.gmra.mrb[60].mxu0 %vm966_vm13, %v2429_v11  ;;  %4520 = vmatprep.subr.msk.bf16.mxu1 %vm970_vm12, %v2610_v29 }
 0x418   : > { %2672 = vmatpush1.bf16.msra.mxu1 %v2622_v1  ;;  %4673 = vmatprep.mubr.msk.bf16.mxu0 %vm4773_vm14, %v5388_v24 }
 0x419   : > { %v2606_v59 = vpop.permute.xlu0 %2605 }
 0x41a   : > { %v2611_v36 = vsel %vm911_vm10, %v2604_v63, %v2606_v59  ;;  %v2763_v47 = vpop.permute.xlu1 %2762 }
 0x41b   : > { %v2628_v22 = vsel %vm970_vm12, %v2611_v36, 0  ;;  %4521 = vmatmul.mubr.msk.bf16.vlgmr.msra.gmra.mrb[60].mxu1 %vm966_vm13, %v2429_v11 }
 0x41c   : > { %4672 = vmatpush3.bf16.msra.mxu0 %v2628_v22  ;;  %2821 = vmatprep.mubr.bf16.mxu1 %v4757_v3  ;;  %v4541_v22 = vld [vmem:[%s6069_s6 + $0x14] sm:$0xf] }
 0x41d   : > { %v2757_v41 = vpop.permute.xlu0 %2756 }
 0x41e   : > { %v2766_v30 = vsel %vm1280_vm15, %v2755_v6, %v2757_v41  ;;  %v2767_v43 = vsel %vm1280_vm15, %v2757_v41, %v2759_v49  ;;  %v2919_v51 = vpop.permute.xlu1 %2918 }
 0x41f   : > { %v2775_v28 = vsel %vm970_vm12, %v2766_v30, 0  ;;  %4674 = vmatmul.mubr.msk.bf16.vlgmr.msra.gmra.mrb[64].mxu0 %vm966_vm13, %v2429_v11  ;;  %4524 = vmatprep.subr.msk.bf16.mxu1 %vm970_vm12, %v2767_v43 }
 0x420   : > { %2790 = vmatpush1.bf16.msra.mxu1 %v2775_v28  ;;  %2862 = vmatprep.mubr.bf16.mxu0 %v4757_v3 }
 0x421   : > { %v2761_v60 = vpop.permute.xlu0 %2760  ;;  %4677 = vmatprep.subr.bf16.mxu1 %v5388_v24 }
 0x422   : > { %v2768_v61 = vsel %vm1280_vm15, %v2759_v49, %v2761_v60  ;;  %v2769_v37 = vsel %vm1280_vm15, %v2761_v60, %v2763_v47  ;;  %v2923_v15 = vpop.permute.xlu1 %2922 }
 0x423   : > { %v2781_v27 = vsel %vm970_vm12, %v2768_v61, 0  ;;  %4525 = vmatmul.mubr.msk.bf16.vlgmr.msra.gmra.mrb[64].mxu1 %vm966_vm13, %v4523_v55  ;;  %4526 = vmatprep.subr.msk.bf16.mxu0 %vm970_vm12, %v2769_v37 }
 0x424   : > { %2831 = vmatpush1.bf16.msra.mxu0 %v2781_v27  ;;  %4679 = vmatprep.mubr.msk.bf16.mxu1 %vm4773_vm14, %v5388_v24 }
 0x425   : > { %v2765_v54 = vpop.permute.xlu0 %2764 }
 0x426   : > { %v2770_v57 = vsel %vm1280_vm15, %v2763_v47, %v2765_v54  ;;  %v2927_v56 = vpop.permute.xlu1 %2926 }
 0x427   : > { %v2787_v7 = vsel %vm970_vm12, %v2770_v57, 0  ;;  %4527 = vmatmul.mubr.msk.bf16.vlgmr.msra.gmra.mrb[68].mxu0 %vm966_vm13, %v4523_v55  ;;  %v4547_v57 = vld [vmem:[%s6069_s6 + $0x18] sm:$0xf] }
 0x428   : > { %4678 = vmatpush3.bf16.msra.mxu1 %v2787_v7  ;;  %2985 = vmatprep.mubr.bf16.mxu0 %v4757_v3 }
 0x429   : > { %v2921_v12 = vpop.permute.xlu0 %2920 }
 0x42a   : > { %v2930_v5 = vsel %vm1445_vm8, %v2919_v51, %v2921_v12  ;;  %v2931_v0 = vsel %vm1445_vm8, %v2921_v12, %v2923_v15  ;;  %v3230_v39 = vpop.permute.xlu1 %3229  ;;  %v5754_v51 = vld [vmem:[#allocation2] sm:$0xff] }
 0x42b   : > { %v2939_v18 = vsel %vm970_vm12, %v2930_v5, 0  ;;  %4680 = vmatmul.mubr.msk.bf16.vlgmr.msra.gmra.mrb[68].mxu1 %vm966_vm13, %v4523_v55  ;;  %4530 = vmatprep.subr.msk.bf16.mxu0 %vm970_vm12, %v2931_v0 }
 0x42c   : > { %2954 = vmatpush1.bf16.msra.mxu0 %v2939_v18  ;;  %3026 = vmatprep.mubr.bf16.mxu1 %v4757_v3 }
 0x42d   : > { %v2925_v34 = vpop.permute.xlu0 %2924  ;;  %4683 = vmatprep.subr.bf16.mxu0 %v5388_v24 }
 0x42e   : > { %v2932_v19 = vsel %vm1445_vm8, %v2923_v15, %v2925_v34  ;;  %v2933_v33 = vsel %vm1445_vm8, %v2925_v34, %v2927_v56  ;;  %v3234_v52 = vpop.permute.xlu1 %3233 }
 0x42f   : > { %v2945_v26 = vsel %vm970_vm12, %v2932_v19, 0  ;;  %4531 = vmatmul.mubr.msk.bf16.vlgmr.msra.gmra.mrb[72].mxu0 %vm966_vm13, %v4529_v4  ;;  %4532 = vmatprep.subr.msk.bf16.mxu1 %vm970_vm12, %v2933_v33 }
 0x430   : > { %2995 = vmatpush1.bf16.msra.mxu1 %v2945_v26  ;;  %4685 = vmatprep.mubr.msk.bf16.mxu0 %vm4773_vm14, %v5388_v24 }
 0x431   : > { %v2929_v32 = vpop.permute.xlu0 %2928  ;;  %4536 = vmatprep.subr.msk.bf16.mxu1 %vm970_vm12, %v5503_v48  ;;  %v3092_v48 = vsel %vm970_vm12, %v5511_v40, 0  ;;  %v3098_v40 = vsel %vm970_vm12, %v5525_v62, 0 }
 0x432   : > { %v2934_v63 = vsel %vm1445_vm8, %v2927_v56, %v2929_v32  ;;  %v3238_v25 = vpop.permute.xlu1 %3237  ;;  %vm6079_vm8 = vcmask 629760  }
 0x433   : > { %v2951_v14 = vsel %vm970_vm12, %v2934_v63, 0  ;;  %4533 = vmatmul.mubr.msk.bf16.vlgmr.msra.gmra.mrb[72].mxu1 %vm966_vm13, %v4529_v4 }
 0x434   : > { %4684 = vmatpush3.bf16.msra.mxu0 %v2951_v14  ;;  %3101 = vmatpush1.bf16.msra.mxu1 %v3086_v20 }
 0x435   : > { %4538 = vmatprep.subr.msk.bf16.mxu0 %vm970_vm12, %v5513_v38  ;;  %v3232_v16 = vpop.permute.xlu0 %3231  ;;  %3132 = vmatprep.mubr.bf16.mxu1 %v4757_v3 }
 0x436   : > { %4689 = vmatprep.subr.bf16.mxu1 %v5388_v24  ;;  %v3393_v6 = vpop.permute.xlu1 %3392  ;;  %v3240_v58 = vsel %vm458_vm1, %v3232_v16, %v3234_v52  ;;  %v3239_v53 = vsel %vm458_vm1, %v3230_v39, %v3232_v16 }
 0x437   : > { %4686 = vmatmul.mubr.msk.bf16.vlgmr.msra.gmra.mrb[76].mxu0 %vm966_vm13, %v4529_v4  ;;  %v3247_v49 = vsel %vm970_vm12, %v3239_v53, 0 }
 0x438   : > { %3142 = vmatpush1.bf16.msra.mxu0 %v3092_v48  ;;  %3173 = vmatprep.mubr.bf16.mxu0 %v4757_v3 }
 0x439   : > { %4542 = vmatprep.subr.msk.bf16.mxu0 %vm970_vm12, %v3240_v58  ;;  %v3236_v38 = vpop.permute.xlu0 %3235 }
 0x43a   : > { %v3242_v11 = vsel %vm458_vm1, %v3236_v38, %v3238_v25  ;;  %v3397_v29 = vpop.permute.xlu1 %3396  ;;  %v3241_v1 = vsel %vm458_vm1, %v3234_v52, %v3236_v38  ;;  %v4553_v52 = vld [vmem:[%s6069_s6 + $0x1c] sm:$0xf] }
 0x43b   : > { %4537 = vmatmul.mubr.msk.bf16.vlgmr.msra.gmra.mrb[76].mxu1 %vm966_vm13, %v4535_v21  ;;  %v3253_v36 = vsel %vm970_vm12, %v3241_v1, 0 }
 0x43c   : > { %4690 = vmatpush3.bf16.msra.mxu1 %v3098_v40  ;;  %4691 = vmatprep.mubr.msk.bf16.mxu1 %vm4773_vm14, %v5388_v24 }
 0x43d   : > { %v3391_v44 = vpop.permute.xlu0 %3390  ;;  %4544 = vmatprep.subr.msk.bf16.mxu1 %vm970_vm12, %v3242_v11 }
 0x43e   : > { %v3552_v47 = vpop.permute.xlu1 %3551  ;;  %v3400_v43 = vsel %vm1917_vm7, %v3391_v44, %v3393_v6 }
 0x43f   : > { %4539 = vmatmul.mubr.msk.bf16.vlgmr.msra.gmra.mrb[80].mxu0 %vm966_vm13, %v4535_v21  ;;  %v3408_v60 = vsel %vm970_vm12, %v3400_v43, 0 }
 0x440   : > { %3262 = vmatpush1.bf16.msra.mxu0 %v3247_v49  ;;  %3293 = vmatprep.mubr.bf16.mxu0 %v4757_v3 }
 0x441   : > { %v3395_v62 = vpop.permute.xlu0 %3394  ;;  %4695 = vmatprep.subr.bf16.mxu0 %v5388_v24  ;;  %v3259_v24 = vsel %vm970_vm12, %v3238_v25, 0 }
 0x442   : > { %v3401_v59 = vsel %vm1917_vm7, %v3393_v6, %v3395_v62  ;;  %v3556_v55 = vpop.permute.xlu1 %3555  ;;  %v3402_v61 = vsel %vm1917_vm7, %v3395_v62, %v3397_v29 }
 0x443   : > { %4692 = vmatmul.mubr.msk.bf16.vlgmr.msra.gmra.mrb[80].mxu1 %vm966_vm13, %v4535_v21  ;;  %v3414_v15 = vsel %vm970_vm12, %v3402_v61, 0  ;;  %v4559_v21 = vld [vmem:[%s6069_s6 + $0x20] sm:$0xf] }
 0x444   : > { %3303 = vmatpush1.bf16.msra.mxu1 %v3253_v36  ;;  %3334 = vmatprep.mubr.bf16.mxu1 %v4757_v3 }
 0x445   : > { %v3399_v41 = vpop.permute.xlu0 %3398  ;;  %4548 = vmatprep.subr.msk.bf16.mxu1 %vm970_vm12, %v3401_v59 }
 0x446   : > { %v3403_v30 = vsel %vm1917_vm7, %v3397_v29, %v3399_v41  ;;  %v3560_v27 = vpop.permute.xlu1 %3559  ;;  %v3420_v7 = vsel %vm970_vm12, %v3399_v41, 0  ;;  %vm4285_vm7 = vcmask 1048368  }
 0x447   : > { %4543 = vmatmul.mubr.msk.bf16.vlgmr.msra.gmra.mrb[84].mxu0 %vm966_vm13, %v4541_v22  ;;  %v3581_v32 = vsel %vm970_vm12, %v3560_v27, 0 }
 0x448   : > { %4696 = vmatpush3.bf16.msra.mxu0 %v3259_v24  ;;  %4697 = vmatprep.mubr.msk.bf16.mxu0 %vm4773_vm14, %v5754_v51 }
 0x449   : > { %4550 = vmatprep.subr.msk.bf16.mxu0 %vm970_vm12, %v3403_v30  ;;  %v3554_v28 = vpop.permute.xlu0 %3553 }
 0x44a   : > { %v3562_v54 = vsel %vm556_vm3, %v3554_v28, %v3556_v55  ;;  %v3561_v12 = vsel %vm556_vm3, %v3552_v47, %v3554_v28  ;;  %v3715_v0 = vpop.permute.xlu1 %3714 }
 0x44b   : > { %4545 = vmatmul.mubr.msk.bf16.vlgmr.msra.gmra.mrb[84].mxu1 %vm966_vm13, %v4541_v22  ;;  %v3569_v39 = vsel %vm970_vm12, %v3561_v12, 0 }
 0x44c   : > { %3423 = vmatpush1.bf16.msra.mxu1 %v3408_v60  ;;  %3454 = vmatprep.mubr.bf16.mxu1 %v4757_v3 }
 0x44d   : > { %v3558_v37 = vpop.permute.xlu0 %3557  ;;  %4701 = vmatprep.subr.bf16.mxu1 %v5754_v51 }
 0x44e   : > { %v3564_v5 = vsel %vm556_vm3, %v3558_v37, %v3560_v27  ;;  %v3563_v4 = vsel %vm556_vm3, %v3556_v55, %v3558_v37  ;;  %v3719_v19 = vpop.permute.xlu1 %3718 }
 0x44f   : > { %4698 = vmatmul.mubr.msk.bf16.vlgmr.msra.gmra.mrb[88].mxu0 %vm966_vm13, %v4541_v22  ;;  %v3575_v34 = vsel %vm970_vm12, %v3563_v4, 0 }
 0x450   : > { %3464 = vmatpush1.bf16.msra.mxu0 %v3414_v15  ;;  %3495 = vmatprep.mubr.bf16.mxu0 %v4757_v3 }
 0x451   : > { %4554 = vmatprep.subr.msk.bf16.mxu0 %vm970_vm12, %v3562_v54  ;;  %v3713_v56 = vpop.permute.xlu0 %3712 }
 0x452   : > { %v3722_v25 = vsel %vm630_vm4, %v3713_v56, %v3715_v0 }
 0x453   : > { %4549 = vmatmul.mubr.msk.bf16.vlgmr.msra.gmra.mrb[88].mxu1 %vm966_vm13, %v4547_v57  ;;  %v3730_v20 = vsel %vm970_vm12, %v3722_v25, 0 }
 0x454   : > { %4702 = vmatpush3.bf16.msra.mxu1 %v3420_v7  ;;  %4703 = vmatprep.mubr.msk.bf16.mxu1 %vm4773_vm14, %v5754_v51 }
 0x455   : > { %4556 = vmatprep.subr.msk.bf16.mxu1 %vm970_vm12, %v3564_v5  ;;  %v3717_v18 = vpop.permute.xlu0 %3716 }
 0x456   : > { %v3723_v33 = vsel %vm630_vm4, %v3715_v0, %v3717_v18  ;;  %v3724_v48 = vsel %vm630_vm4, %v3717_v18, %v3719_v19 }
 0x457   : > { %4551 = vmatmul.mubr.msk.bf16.vlgmr.msra.gmra.mrb[92].mxu0 %vm966_vm13, %v4547_v57  ;;  %v3736_v58 = vsel %vm970_vm12, %v3724_v48, 0 }
 0x458   : > { %3584 = vmatpush1.bf16.msra.mxu0 %v3569_v39  ;;  %3615 = vmatprep.mubr.bf16.mxu0 %v4757_v3 }
 0x459   : > { %4707 = vmatprep.subr.bf16.mxu0 %v5754_v51  ;;  %v3721_v26 = vpop.permute.xlu0 %3720 }
 0x45a   : > { %v3725_v14 = vsel %vm630_vm4, %v3719_v19, %v3721_v26  ;;  %v3742_v11 = vsel %vm970_vm12, %v3721_v26, 0 }
 0x45b   : > { %4704 = vmatmul.mubr.msk.bf16.vlgmr.msra.gmra.mrb[92].mxu1 %vm966_vm13, %v4547_v57 }
 0x45c   : > { %3625 = vmatpush1.bf16.msra.mxu1 %v3575_v34  ;;  %3656 = vmatprep.mubr.bf16.mxu1 %v4757_v3 }
 0x45d   : > { %4560 = vmatprep.subr.msk.bf16.mxu1 %vm970_vm12, %v3723_v33 }
 0x45f   : > { %4555 = vmatmul.mubr.msk.bf16.vlgmr.msra.gmra.mrb[96].mxu0 %vm966_vm13, %v4553_v52  ;;  %v5794_v63 = vpop.permute.xlu1 %3874 }
 0x460   : > { %4708 = vmatpush3.bf16.msra.mxu0 %v3581_v32  ;;  %4709 = vmatprep.mubr.msk.bf16.mxu0 %vm4773_vm14, %v5754_v51 }
 0x461   : > { %4562 = vmatprep.subr.msk.bf16.mxu0 %vm970_vm12, %v3725_v14  ;;  %vm6082_vm12 = vmmov %vm6081_vm11 }
 0x463   : > { %4557 = vmatmul.mubr.msk.bf16.vlgmr.msra.gmra.mrb[96].mxu1 %vm966_vm13, %v4553_v52  ;;  %v5803_v16 = vpop.permute.xlu1 %3978 }
 0x464   : > { %3745 = vmatpush1.bf16.msra.mxu1 %v3730_v20  ;;  %3776 = vmatprep.mubr.bf16.mxu1 %v4757_v3  ;;  %v3981_v6 = vmul.f32 %v5754_v51, %v5803_v16 }
 0x465   : > { %4713 = vmatprep.subr.bf16.mxu1 %v5754_v51 }
 0x466   : > { %3993 = vrot.lane.b32.xlu0 %v3981_v6, %s4761_s26 }
 0x467   : > { %4710 = vmatmul.mubr.msk.bf16.vlgmr.msra.gmra.mrb[100].mxu0 %vm966_vm13, %v4553_v52 }
 0x468   : > { %3786 = vmatpush1.bf16.msra.mxu0 %v3736_v58  ;;  %3817 = vmatprep.mubr.bf16.mxu0 %v4757_v3 }
 0x46a   : > { %v5817_v38 = vpop.permute.xlu0 %3930 }
 0x46b   : > { %4561 = vmatmul.mubr.msk.bf16.vlgmr.msra.gmra.mrb[100].mxu1 %vm966_vm13, %v4559_v21  ;;  %v3933_v40 = vmul.f32 %v5754_v51, %v5817_v38 }
 0x46c   : > { %4714 = vmatpush3.bf16.msra.mxu1 %v3742_v11  ;;  %4715 = vmatprep.mubr.msk.bf16.mxu1 %vm4773_vm14, %v5754_v51 }
 0x46d   : > { %3945 = vrot.lane.b32.xlu1 %v3933_v40, %s4760_s25 }
 0x46e   : > { %v5826_v53 = vpop.permute.xlu0 %4026 }
 0x46f   : > { %4563 = vmatmul.mubr.msk.bf16.vlgmr.msra.gmra.mrb[104].mxu0 %vm966_vm13, %v4559_v21  ;;  %v4029_v3 = vmul.f32 %v5754_v51, %v5826_v53 }
 0x471   : > { %4041 = vrot.lane.b32.xlu0 %v4029_v3, %s4762_s27 }
 0x473   : > { %4716 = vmatmul.mubr.msk.bf16.vlgmr.msra.gmra.mrb[104].mxu1 %vm966_vm13, %v4559_v21 }
 0x4d7   : > { %v2507_v44 = vpop.f32.mrb[52].mxu1 }
 0x4d8   : > { %v2509_v29 = vpop.f32.mrb[53].mxu1 }
 0x4d9   : > { %v2511_v49 = vpop.f32.mrb[54].mxu1 }
 0x4da   : > { %v2512_v1 = vpop.f32.mrb[55].mxu1 }
 0x4db   : > { %v2548_v62 = vpop.f32.mrb[56].mxu0 }
 0x4dc   : > { %v2550_v59 = vpop.f32.mrb[57].mxu0 }
 0x4dd   : > { %v2552_v36 = vpop.f32.mrb[58].mxu0 }
 0x4de   : > { %v2553_v47 = vpop.f32.mrb[59].mxu0 }
 0x4e6   : > { %v2589_v22 = vpop.f32.mrb[56].mxu1 }
 0x4e7   : > { %v4669_v41 = vpop.f32.mrb[57].mxu1 }
 0x4e8   : > { %v2592_v30 = vpop.f32.mrb[58].mxu1 }
 0x4e9   : > { %v4670_v24 = vpop.f32.mrb[59].mxu1 }
 0x4ea   : > { %v2664_v43 = vpop.f32.mrb[60].mxu0 }
 0x4eb   : > { %v2665_v28 = vadd.f32 %v2664_v43, %v2507_v44  ;;  %v2666_v55 = vpop.f32.mrb[61].mxu0 }
 0x4ec   : > { %v2667_v60 = vadd.f32 %v2666_v55, %v2509_v29  ;;  %v2668_v61 = vpop.f32.mrb[62].mxu0 }
 0x4ed   : > { %v2669_v37 = vpop.f32.mrb[63].mxu0 }
 0x4ee   : > { %v2705_v15 = vpop.f32.mrb[60].mxu1 }
 0x4ef   : > { %v2706_v27 = vadd.f32 %v2705_v15, %v2548_v62  ;;  %v2707_v54 = vpop.f32.mrb[61].mxu1 }
 0x4f0   : > { %v2708_v57 = vadd.f32 %v2707_v54, %v2550_v59  ;;  %v2709_v56 = vpop.f32.mrb[62].mxu1 }
 0x4f1   : > { %v2710_v7 = vpop.f32.mrb[63].mxu1 }
 0x4f2   : > { %v2746_v12 = vpop.f32.mrb[64].mxu0 }
 0x4f3   : > { %v2747_v5 = vadd.f32 %v2746_v12, %v2589_v22  ;;  %v4675_v0 = vpop.f32.mrb[65].mxu0 }
 0x4f4   : > { %v2749_v39 = vpop.f32.mrb[66].mxu0 }
 0x4f5   : > { %v4676_v18 = vpop.f32.mrb[67].mxu0 }
 0x4f6   : > { %v2823_v4 = vpop.f32.mrb[64].mxu1 }
 0x4f7   : > { %v2911_v34 = vadd.f32 %v2823_v4, %v2665_v28  ;;  %v2825_v19 = vpop.f32.mrb[65].mxu1 }
 0x4f8   : > { %v2912_v33 = vadd.f32 %v2825_v19, %v2667_v60  ;;  %v2827_v52 = vpop.f32.mrb[66].mxu1 }
 0x4f9   : > { %v2828_v26 = vpop.f32.mrb[67].mxu1 }
 0x4fa   : > { %v2864_v32 = vpop.f32.mrb[68].mxu0 }
 0x4fb   : > { %v2913_v25 = vadd.f32 %v2864_v32, %v2706_v27  ;;  %v2866_v14 = vpop.f32.mrb[69].mxu0 }
 0x4fc   : > { %v2914_v20 = vadd.f32 %v2866_v14, %v2708_v57  ;;  %v2868_v48 = vpop.f32.mrb[70].mxu0 }
 0x4fd   : > { %v2869_v6 = vpop.f32.mrb[71].mxu0 }
 0x4fe   : > { %v2905_v58 = vpop.f32.mrb[68].mxu1 }
 0x4ff   : > { %v2915_v21 = vadd.f32 %v2905_v58, %v2747_v5  ;;  %v4681_v11 = vpop.f32.mrb[69].mxu1 }
 0x500   : > { %v2908_v40 = vpop.f32.mrb[70].mxu1 }
 0x501   : > { %v4682_v3 = vpop.f32.mrb[71].mxu1 }
 0x502   : > { %v2987_v44 = vpop.f32.mrb[72].mxu0 }
 0x503   : > { %v3075_v29 = vadd.f32 %v2987_v44, %v2911_v34  ;;  %v2989_v49 = vpop.f32.mrb[73].mxu0 }
 0x504   : > { %v3076_v1 = vadd.f32 %v2989_v49, %v2912_v33  ;;  %v2991_v62 = vpop.f32.mrb[74].mxu0 }
 0x505   : > { %v2992_v59 = vpop.f32.mrb[75].mxu0 }
 0x506   : > { %v3028_v36 = vpop.f32.mrb[72].mxu1 }
 0x507   : > { %v3077_v47 = vadd.f32 %v3028_v36, %v2913_v25  ;;  %v3030_v22 = vpop.f32.mrb[73].mxu1 }
 0x508   : > { %v3078_v41 = vadd.f32 %v3030_v22, %v2914_v20  ;;  %v3032_v30 = vpop.f32.mrb[74].mxu1 }
 0x509   : > { %v3033_v24 = vpop.f32.mrb[75].mxu1 }
 0x50a   : > { %v3069_v43 = vpop.f32.mrb[76].mxu0 }
 0x50b   : > { %v3079_v28 = vadd.f32 %v3069_v43, %v2915_v21  ;;  %v4687_v55 = vpop.f32.mrb[77].mxu0 }
 0x50c   : > { %v3072_v60 = vpop.f32.mrb[78].mxu0 }
 0x50d   : > { %v4688_v61 = vpop.f32.mrb[79].mxu0 }
 0x50e   : > { %v3134_v37 = vpop.f32.mrb[76].mxu1 }
 0x50f   : > { %v3222_v15 = vadd.f32 %v3134_v37, %v3075_v29  ;;  %v3136_v27 = vpop.f32.mrb[77].mxu1 }
 0x510   : > { %v3223_v54 = vadd.f32 %v3136_v27, %v3076_v1  ;;  %v3138_v57 = vpop.f32.mrb[78].mxu1 }
 0x511   : > { %v3139_v56 = vpop.f32.mrb[79].mxu1 }
 0x512   : > { %v3175_v7 = vpop.f32.mrb[80].mxu0 }
 0x513   : > { %v3224_v12 = vadd.f32 %v3175_v7, %v3077_v47  ;;  %v3177_v5 = vpop.f32.mrb[81].mxu0 }
 0x514   : > { %v3225_v0 = vadd.f32 %v3177_v5, %v3078_v41  ;;  %v3179_v39 = vpop.f32.mrb[82].mxu0 }
 0x515   : > { %v3180_v18 = vpop.f32.mrb[83].mxu0 }
 0x516   : > { %v3216_v4 = vpop.f32.mrb[80].mxu1 }
 0x517   : > { %v3226_v34 = vadd.f32 %v3216_v4, %v3079_v28  ;;  %v4693_v19 = vpop.f32.mrb[81].mxu1 }
 0x518   : > { %v3219_v33 = vpop.f32.mrb[82].mxu1 }
 0x519   : > { %v4694_v52 = vpop.f32.mrb[83].mxu1 }
 0x51a   : > { %v3295_v26 = vpop.f32.mrb[84].mxu0 }
 0x51b   : > { %v3383_v32 = vadd.f32 %v3295_v26, %v3222_v15  ;;  %v3297_v25 = vpop.f32.mrb[85].mxu0 }
 0x51c   : > { %v3384_v14 = vadd.f32 %v3297_v25, %v3223_v54  ;;  %v3299_v20 = vpop.f32.mrb[86].mxu0 }
 0x51d   : > { %v3300_v48 = vpop.f32.mrb[87].mxu0 }
 0x51e   : > { %v3336_v6 = vpop.f32.mrb[84].mxu1 }
 0x51f   : > { %v3385_v58 = vadd.f32 %v3336_v6, %v3224_v12  ;;  %v3338_v21 = vpop.f32.mrb[85].mxu1 }
 0x520   : > { %v3386_v11 = vadd.f32 %v3338_v21, %v3225_v0  ;;  %v3340_v40 = vpop.f32.mrb[86].mxu1 }
 0x521   : > { %v3341_v3 = vpop.f32.mrb[87].mxu1 }
 0x522   : > { %v3377_v44 = vpop.f32.mrb[88].mxu0 }
 0x523   : > { %v3387_v29 = vadd.f32 %v3377_v44, %v3226_v34  ;;  %v4699_v49 = vpop.f32.mrb[89].mxu0 }
 0x524   : > { %v3380_v1 = vpop.f32.mrb[90].mxu0 }
 0x525   : > { %v4700_v62 = vpop.f32.mrb[91].mxu0 }
 0x526   : > { %v3456_v59 = vpop.f32.mrb[88].mxu1 }
 0x527   : > { %v3544_v36 = vadd.f32 %v3456_v59, %v3383_v32  ;;  %v3458_v47 = vpop.f32.mrb[89].mxu1 }
 0x528   : > { %v3545_v22 = vadd.f32 %v3458_v47, %v3384_v14  ;;  %v3460_v41 = vpop.f32.mrb[90].mxu1 }
 0x529   : > { %v3461_v30 = vpop.f32.mrb[91].mxu1 }
 0x52a   : > { %v3497_v24 = vpop.f32.mrb[92].mxu0 }
 0x52b   : > { %v3546_v43 = vadd.f32 %v3497_v24, %v3385_v58  ;;  %v3499_v28 = vpop.f32.mrb[93].mxu0 }
 0x52c   : > { %v3547_v55 = vadd.f32 %v3499_v28, %v3386_v11  ;;  %v3501_v60 = vpop.f32.mrb[94].mxu0 }
 0x52d   : > { %v3502_v61 = vpop.f32.mrb[95].mxu0 }
 0x52e   : > { %v3538_v37 = vpop.f32.mrb[92].mxu1 }
 0x52f   : > { %v3548_v15 = vadd.f32 %v3538_v37, %v3387_v29  ;;  %v4705_v27 = vpop.f32.mrb[93].mxu1 }
 0x530   : > { %v3541_v54 = vpop.f32.mrb[94].mxu1 }
 0x531   : > { %v4706_v57 = vpop.f32.mrb[95].mxu1 }
 0x532   : > { %v3617_v56 = vpop.f32.mrb[96].mxu0 }
 0x533   : > { %v3705_v7 = vadd.f32 %v3617_v56, %v3544_v36  ;;  %v3619_v12 = vpop.f32.mrb[97].mxu0 }
 0x534   : > { %v3706_v5 = vadd.f32 %v3619_v12, %v3545_v22  ;;  %v3621_v0 = vpop.f32.mrb[98].mxu0 }
 0x535   : > { %v3622_v39 = vpop.f32.mrb[99].mxu0 }
 0x536   : > { %v3658_v18 = vpop.f32.mrb[96].mxu1 }
 0x537   : > { %v3707_v4 = vadd.f32 %v3658_v18, %v3546_v43  ;;  %v3660_v34 = vpop.f32.mrb[97].mxu1  ;;  %v4118_v18 = vpop.permute.xlu0 %4117 }
 0x538   : > { %v3708_v19 = vadd.f32 %v3660_v34, %v3547_v55  ;;  %v3662_v33 = vpop.f32.mrb[98].mxu1 }
 0x539   : > { %v3663_v52 = vpop.f32.mrb[99].mxu1 }
 0x53a   : > { %v3699_v26 = vpop.f32.mrb[100].mxu0 }
 0x53b   : > { %v3709_v32 = vadd.f32 %v3699_v26, %v3548_v15  ;;  %v4711_v25 = vpop.f32.mrb[101].mxu0  ;;  %v4204_v26 = vpop.permute.xlu0 %4203 }
 0x53c   : > { %v3702_v14 = vpop.f32.mrb[102].mxu0 }
 0x53d   : > { %v4712_v20 = vpop.f32.mrb[103].mxu0 }
 0x53e   : > { %v3778_v48 = vpop.f32.mrb[100].mxu1 }
 0x53f   : > { %v3866_v6 = vadd.f32 %v3778_v48, %v3705_v7  ;;  %v3780_v58 = vpop.f32.mrb[101].mxu1 }
 0x540   : > { %v3867_v21 = vadd.f32 %v3780_v58, %v3706_v5  ;;  %v3782_v11 = vpop.f32.mrb[102].mxu1 }
 0x541   : > { %v3877_v40 = vadd.f32 %v5794_v63, %v3866_v6  ;;  %v3783_v3 = vpop.f32.mrb[103].mxu1 }
 0x542   : > { %v3878_v44 = vadd.f32 %v5794_v63, %v3867_v21  ;;  %v3819_v29 = vpop.f32.mrb[104].mxu0 }
 0x543   : > { %v3882_v49 = vadd.f32 %v3877_v40, %v5187_v10  ;;  %v3868_v1 = vadd.f32 %v3819_v29, %v3707_v4  ;;  %v3821_v62 = vpop.f32.mrb[105].mxu0 }
 0x544   : > { %v3883_v59 = vadd.f32 %v3878_v44, %v5196_v35  ;;  %v3869_v36 = vadd.f32 %v3821_v62, %v3708_v19  ;;  %v3823_v47 = vpop.f32.mrb[106].mxu0 }
 0x545   : > { %v3887_v22 = vmax.f32 %v3882_v49, 0.0  ;;  %v3879_v41 = vadd.f32 %v5794_v63, %v3868_v1  ;;  %v3824_v30 = vpop.f32.mrb[107].mxu0 }
 0x546   : > { %v3888_v24 = vmax.f32 %v3883_v59, 0.0  ;;  %v3880_v43 = vadd.f32 %v5794_v63, %v3869_v36  ;;  %v3860_v28 = vpop.f32.mrb[104].mxu1 }
 0x547   : > { %v5840_v55 = vmul.f32 %v3887_v22, %v4903_v17  ;;  %v3884_v60 = vadd.f32 %v3879_v41, %v5203_v31  ;;  %v3870_v10 = vadd.f32 %v3860_v28, %v3709_v32  ;;  %v4717_v61 = vpop.f32.mrb[105].mxu1 }
 0x548   : > { %v5844_v37 = vmul.f32 %v3888_v24, %v5010_v42  ;;  %v3885_v35 = vadd.f32 %v3880_v43, %v5212_v50  ;;  %v3863_v15 = vpop.f32.mrb[106].mxu1 }
 0x549   : > { %3897 = vst [vmem:[#allocation2 + $0x8] sm:$0xff] %v5840_v55  ;;  %v3889_v27 = vmax.f32 %v3884_v60, 0.0  ;;  %v3881_v54 = vadd.f32 %v5794_v63, %v3870_v10  ;;  %v3982_v57 = vmul.f32 %v5803_v16, %v5840_v55  ;;  %v3934_v17 = vmul.f32 %v5817_v38, %v5840_v55  ;;  %v4718_v31 = vpop.f32.mrb[107].mxu1  ;;  %v4325_v60 = vld [vmem:[#allocation3] sm:$0x1] }
 0x54a   : > { %3898 = vst [vmem:[#allocation2 + $0x10] sm:$0xff] %v5844_v37  ;;  %v3890_v56 = vmax.f32 %v3885_v35, 0.0  ;;  %v4030_v12 = vmul.f32 %v5826_v53, %v5840_v55  ;;  %v4120_v19 = vmul.f32 %v4118_v18, %v5840_v55  ;;  %v4206_v14 = vmul.f32 %v4204_v26, %v5840_v55  ;;  %v5972_v35 = vpop.permute.xlu0 %3911 }
 0x54b   : > { %v5855_v42 = vmul.f32 %v3889_v27, %v5021_v46  ;;  %v3886_v50 = vadd.f32 %v3881_v54, %v5221_v2  ;;  %3995 = vrot.lane.b32.xlu1 %v3982_v57, %s4761_s26  ;;  %3947 = vrot.lane.b32.xlu0 %v3934_v17, %s4760_s25  ;;  %v5872_v2 = vpop.permute.xlu1 %4074  ;;  %v3935_v58 = vmul.f32 %v5817_v38, %v5844_v37 }
 0x54c   : > { %v5861_v63 = vmul.f32 %v3890_v56, %v5017_v45  ;;  %v4077_v45 = vmul.f32 %v5872_v2, %v5840_v55  ;;  %v4078_v6 = vmul.f32 %v5872_v2, %v5844_v37  ;;  %v3983_v3 = vmul.f32 %v5803_v16, %v5844_v37 }
 0x54d   : > { %3899 = vst [vmem:[#allocation2 + $0x18] sm:$0xff] %v5855_v42  ;;  %v3891_v7 = vmax.f32 %v3886_v50, 0.0  ;;  %v3936_v5 = vmul.f32 %v5817_v38, %v5855_v42  ;;  %v3984_v0 = vmul.f32 %v5803_v16, %v5855_v42  ;;  %v4032_v39 = vmul.f32 %v5826_v53, %v5855_v42 }
 0x54e   : > { %3900 = vst [vmem:[#allocation2 + $0x20] sm:$0xff] %v5861_v63  ;;  %v4122_v52 = vmul.f32 %v4118_v18, %v5855_v42  ;;  %v4208_v48 = vmul.f32 %v4204_v26, %v5855_v42  ;;  %v4080_v21 = vmul.f32 %v5872_v2, %v5861_v63  ;;  %v3937_v11 = vmul.f32 %v5817_v38, %v5861_v63  ;;  %v3994_v15 = vpop.permute.xlu0 %3993 }
 0x54f   : > { %v3896_v46 = vmul.f32 %v3891_v7, %v5029_v23  ;;  %4043 = vrot.lane.b32.xlu1 %v4030_v12, %s4762_s27  ;;  %3951 = vrot.lane.b32.xlu0 %v3936_v5, %s4760_s25  ;;  %v4079_v23 = vmul.f32 %v5872_v2, %v5855_v42  ;;  %v5887_v4 = vpop.permute.xlu1 %4160  ;;  %v3985_v29 = vmul.f32 %v5803_v16, %v5861_v63 }
 0x550   : > { %v4163_v34 = vmul.f32 %v5887_v4, %v5840_v55  ;;  %v4165_v33 = vmul.f32 %v5887_v4, %v5855_v42  ;;  %v4164_v40 = vmul.f32 %v5887_v4, %v5844_v37  ;;  %v4166_v44 = vmul.f32 %v5887_v4, %v5861_v63 }
 0x551   : > { %3901 = vst.msk [vmem:[#allocation2 + $0x28] sm:$0xff] %vm364_vm9, %v3896_v46  ;;  %v4031_v1 = vmul.f32 %v5826_v53, %v5844_v37  ;;  %v4033_v59 = vmul.f32 %v5826_v53, %v5861_v63  ;;  %v4121_v47 = vmul.f32 %v4118_v18, %v5844_v37  ;;  %v4123_v41 = vmul.f32 %v4118_v18, %v5861_v63  ;;  %vm6080_vm9 = vmmov %vm6079_vm8 }
 0x552   : > { %v4042_v54 = vpop.permute.xlu0 %4041  ;;  %v3914_v17 = vmul.f32 %v5754_v51, %v5972_v35 }
 0x553   : > { %4087 = vrot.lane.b32.xlu1 %v4077_v45, %s4759_s21  ;;  %3999 = vrot.lane.b32.xlu0 %v3984_v0, %s4761_s26  ;;  %v4247_v32 = vpop.permute.xlu1 %4246 }
 0x554   : > { %v4249_v25 = vmul.f32 %v4247_v32, %v5840_v55  ;;  %v4251_v20 = vmul.f32 %v4247_v32, %v5855_v42  ;;  %v4250_v49 = vmul.f32 %v4247_v32, %v5844_v37  ;;  %v4252_v28 = vmul.f32 %v4247_v32, %v5861_v63 }
 0x557   : > { %4091 = vrot.lane.b32.xlu1 %v4079_v23, %s4759_s21  ;;  %4047 = vrot.lane.b32.xlu0 %v4032_v39, %s4762_s27  ;;  %v3946_v27 = vpop.permute.xlu1 %3945 }
 0x558   : > { %v5934_v62 = vld [vmem:[#allocation2 + $0x28] sm:$0xff] }
 0x559   : > { %v3938_v36 = vmul.f32 %v5817_v38, %v5934_v62  ;;  %v3986_v22 = vmul.f32 %v5803_v16, %v5934_v62  ;;  %v4034_v30 = vmul.f32 %v5826_v53, %v5934_v62  ;;  %v4207_v38 = vmul.f32 %v4204_v26, %v5844_v37 }
 0x55a   : > { %v4124_v24 = vmul.f32 %v4118_v18, %v5934_v62  ;;  %v4209_v16 = vmul.f32 %v4204_v26, %v5861_v63  ;;  %v4210_v43 = vmul.f32 %v4204_v26, %v5934_v62  ;;  %v4081_v53 = vmul.f32 %v5872_v2, %v5934_v62 }
 0x55b   : > { %4173 = vrot.lane.b32.xlu1 %v4163_v34, %s4764_s29  ;;  %4130 = vrot.lane.b32.xlu0 %v4120_v19, %s4763_s28  ;;  %v4167_v10 = vmul.f32 %v5887_v4, %v5934_v62  ;;  %v4253_v61 = vmul.f32 %v4247_v32, %v5934_v62 }
 0x55f   : > { %4177 = vrot.lane.b32.xlu1 %v4165_v33, %s4764_s29  ;;  %4134 = vrot.lane.b32.xlu0 %v4122_v52, %s4763_s28 }
 0x563   : > { %4259 = vrot.lane.b32.xlu1 %v4249_v25, %s4766_s11  ;;  %4216 = vrot.lane.b32.xlu0 %v4206_v14, %s4765_s30 }
 0x567   : > { %4263 = vrot.lane.b32.xlu1 %v4251_v20, %s4766_s11  ;;  %4220 = vrot.lane.b32.xlu0 %v4208_v48, %s4765_s30 }
 0x56b   : > { %4089 = vrot.lane.b32.xlu0 %v4078_v6, %s4759_s21  ;;  %3949 = vrot.lane.b32.xlu1 %v3935_v58, %s4760_s25  ;;  %v3915_v58 = vmul.f32 %v5972_v35, %v5840_v55 }
 0x56f   : > { %4093 = vrot.lane.b32.xlu0 %v4080_v21, %s4759_s21  ;;  %3953 = vrot.lane.b32.xlu1 %v3937_v11, %s4760_s25 }
 0x573   : > { %4175 = vrot.lane.b32.xlu0 %v4164_v40, %s4764_s29  ;;  %3997 = vrot.lane.b32.xlu1 %v3983_v3, %s4761_s26 }
 0x577   : > { %4179 = vrot.lane.b32.xlu0 %v4166_v44, %s4764_s29  ;;  %4001 = vrot.lane.b32.xlu1 %v3985_v29, %s4761_s26 }
 0x57b   : > { %4261 = vrot.lane.b32.xlu0 %v4250_v49, %s4766_s11  ;;  %4045 = vrot.lane.b32.xlu1 %v4031_v1, %s4762_s27 }
 0x57f   : > { %4049 = vrot.lane.b32.xlu1 %v4033_v59, %s4762_s27  ;;  %3955 = vrot.lane.b32.xlu0 %v3938_v36, %s4760_s25  ;;  %v3916_v36 = vmul.f32 %v5972_v35, %v5844_v37  ;;  %v3917_v37 = vmul.f32 %v5972_v35, %v5855_v42 }
 0x583   : > { %4132 = vrot.lane.b32.xlu1 %v4121_v47, %s4763_s28  ;;  %4003 = vrot.lane.b32.xlu0 %v3986_v22, %s4761_s26 }
 0x587   : > { %4136 = vrot.lane.b32.xlu1 %v4123_v41, %s4763_s28  ;;  %4051 = vrot.lane.b32.xlu0 %v4034_v30, %s4762_s27 }
 0x58b   : > { %4218 = vrot.lane.b32.xlu1 %v4207_v38, %s4765_s30  ;;  %4138 = vrot.lane.b32.xlu0 %v4124_v24, %s4763_s28 }
 0x58f   : > { %4222 = vrot.lane.b32.xlu1 %v4209_v16, %s4765_s30  ;;  %4224 = vrot.lane.b32.xlu0 %v4210_v43, %s4765_s30 }
 0x593   : > { %4095 = vrot.lane.b32.xlu1 %v4081_v53, %s4759_s21  ;;  %4265 = vrot.lane.b32.xlu0 %v4252_v28, %s4766_s11  ;;  %s6087_s21 = smul.u32 5, %s6089_s16 }
 0x595   : > { %s356_s27 = scalar_lea.vmem %s6073_s10, %s6087_s21 }
 0x597   : > { %4181 = vrot.lane.b32.xlu1 %v4167_v10, %s4764_s29  ;;  %4328 = vperm.xlu0 %4745, %v4325_v60  }
 0x59b   : > { %4267 = vrot.lane.b32.xlu1 %v4253_v61, %s4766_s11 }
 0x5bd   : > { %v3996_v57 = vpop.permute.xlu1 %3995  ;;  %v3948_v31 = vpop.permute.xlu0 %3947 }
 0x5be   : > { %v4005_v56 = vsel %vm507_vm2, %v3994_v15, %v3996_v57  ;;  %v3957_v50 = vsel %vm458_vm1, %v3946_v27, %v3948_v31 }
 0x5bf   : > { %v3968_v7 = vadd.f32 %v3957_v50, %v3914_v17 }
 0x5c1   : > { %v4044_v12 = vpop.permute.xlu1 %4043  ;;  %v4016_v5 = vadd.f32 %v4005_v56, %v3968_v7  ;;  %v3952_v46 = vpop.permute.xlu0 %3951 }
 0x5c2   : > { %v4053_v2 = vsel %vm556_vm3, %v4042_v54, %v4044_v12 }
 0x5c3   : > { %v4064_v45 = vadd.f32 %v4053_v2, %v4016_v5 }
 0x5c5   : > { %v4088_v0 = vpop.permute.xlu1 %4087  ;;  %v4000_v23 = vpop.permute.xlu0 %3999 }
 0x5c6   : > { %v4107_v59 = vadd.f32 %v4088_v0, %v4064_v45 }
 0x5c9   : > { %v4092_v39 = vpop.permute.xlu1 %4091  ;;  %v4048_v18 = vpop.permute.xlu0 %4047 }
 0x5cd   : > { %v4174_v4 = vpop.permute.xlu1 %4173  ;;  %v4131_v34 = vpop.permute.xlu0 %4130 }
 0x5ce   : > { %v4150_v30 = vadd.f32 %v4131_v34, %v4107_v59 }
 0x5d0   : > { %v4193_v10 = vadd.f32 %v4174_v4, %v4150_v30 }
 0x5d1   : > { %v5979_v19 = vpop.permute.xlu1 %4177  ;;  %v4135_v51 = vpop.permute.xlu0 %4134 }
 0x5d5   : > { %v5981_v33 = vpop.permute.xlu1 %4259  ;;  %v5983_v52 = vpop.permute.xlu0 %4216 }
 0x5d6   : > { %v4236_v27 = vadd.f32 %v5983_v52, %v4193_v10 }
 0x5d9   : > { %v5985_v26 = vpop.permute.xlu1 %4263  ;;  %v5987_v32 = vpop.permute.xlu0 %4220 }
 0x5dd   : > { %v4090_v25 = vpop.permute.xlu0 %4089  ;;  %v3950_v14 = vpop.permute.xlu1 %3949 }
 0x5de   : > { %v3958_v6 = vsel %vm458_vm1, %v3948_v31, %v3950_v14  ;;  %v3959_v1 = vsel %vm458_vm1, %v3950_v14, %v3952_v46  ;;  %v4097_v54 = vsel %vm630_vm4, %v4088_v0, %v4090_v25  ;;  %v4098_v56 = vsel %vm630_vm4, %v4090_v25, %v4092_v39 }
 0x5df   : > { %v3969_v21 = vadd.f32 %v3958_v6, %v3915_v58  ;;  %v3970_v38 = vadd.f32 %v3959_v1, %v3916_v36  ;;  %v4279_v0 = vadd.f32 %v5981_v33, %v4236_v27 }
 0x5e1   : > { %v5989_v20 = vpop.permute.xlu0 %4093  ;;  %v3954_v48 = vpop.permute.xlu1 %3953  ;;  %v4286_v36 = vsel %vm4285_vm7, %v4279_v0, 0.0 }
 0x5e2   : > { %v3960_v60 = vsel %vm458_vm1, %v3952_v46, %v3954_v48  ;;  %v4099_v25 = vsel %vm630_vm4, %v4092_v39, %v5989_v20 }
 0x5e5   : > { %v4176_v11 = vpop.permute.xlu0 %4175  ;;  %v3998_v40 = vpop.permute.xlu1 %3997 }
 0x5e6   : > { %v4006_v3 = vsel %vm507_vm2, %v3996_v57, %v3998_v40  ;;  %v4007_v41 = vsel %vm507_vm2, %v3998_v40, %v4000_v23  ;;  %v3971_v57 = vadd.f32 %v3960_v60, %v3917_v37 }
 0x5e7   : > { %v4017_v44 = vadd.f32 %v4006_v3, %v3969_v21  ;;  %v4018_v43 = vadd.f32 %v4007_v41, %v3970_v38  ;;  %v3919_v21 = vmul.f32 %v5972_v35, %v5934_v62 }
 0x5e9   : > { %v5995_v29 = vpop.permute.xlu0 %4179  ;;  %v4002_v49 = vpop.permute.xlu1 %4001 }
 0x5ea   : > { %v4008_v15 = vsel %vm507_vm2, %v4000_v23, %v4002_v49 }
 0x5eb   : > { %v4019_v5 = vadd.f32 %v4008_v15, %v3971_v57 }
 0x5ed   : > { %v4262_v47 = vpop.permute.xlu0 %4261  ;;  %v4046_v22 = vpop.permute.xlu1 %4045 }
 0x5ee   : > { %v4054_v55 = vsel %vm556_vm3, %v4044_v12, %v4046_v22  ;;  %v4055_v16 = vsel %vm556_vm3, %v4046_v22, %v4048_v18  ;;  %v4270_v30 = vsel %vm6082_vm12, %v4262_v47, %v5985_v26 }
 0x5ef   : > { %v4065_v24 = vadd.f32 %v4054_v55, %v4017_v44  ;;  %v4066_v61 = vadd.f32 %v4055_v16, %v4018_v43  ;;  %v4269_v55 = vsel %vm6081_vm11, %v5981_v33, %v4262_v47 }
 0x5f1   : > { %v4050_v53 = vpop.permute.xlu1 %4049  ;;  %v3956_v28 = vpop.permute.xlu0 %3955  ;;  %v4108_v42 = vadd.f32 %v4097_v54, %v4065_v24  ;;  %v4109_v46 = vadd.f32 %v4098_v56, %v4066_v61  ;;  %v4287_v24 = vrot.slane %v4286_v36, 4 }
 0x5f2   : > { %v4056_v50 = vsel %vm556_vm3, %v4048_v18, %v4050_v53  ;;  %v4183_v18 = vsel %vm718_vm6, %v4174_v4, %v4176_v11  ;;  %v3961_v22 = vsel %vm458_vm1, %v3954_v48, %v3956_v28  ;;  %v3973_v38 = vadd.f32 %v3956_v28, %v3919_v21  ;;  %vm6083_vm1 = vmmov %vm6079_vm8 }
 0x5f3   : > { %v4067_v2 = vadd.f32 %v4056_v50, %v4019_v5  ;;  %v4288_v56 = vadd.f32 %v4287_v24, %v4286_v36 }
 0x5f5   : > { %v4133_v17 = vpop.permute.xlu1 %4132  ;;  %v4004_v31 = vpop.permute.xlu0 %4003  ;;  %v4110_v40 = vadd.f32 %v4099_v25, %v4067_v2 }
 0x5f6   : > { %v4140_v7 = vsel %vm674_vm5, %v4131_v34, %v4133_v17  ;;  %v4141_v12 = vsel %vm674_vm5, %v4133_v17, %v4135_v51  ;;  %v4184_v34 = vsel %vm718_vm6, %v4176_v11, %v5979_v19  ;;  %v4009_v48 = vsel %vm507_vm2, %v4002_v49, %v4004_v31  ;;  %vm6084_vm2 = vmmov %vm6081_vm11 }
 0x5f7   : > { %v4151_v45 = vadd.f32 %v4140_v7, %v4108_v42  ;;  %v4152_v23 = vadd.f32 %v4141_v12, %v4109_v46 }
 0x5f9   : > { %v4137_v14 = vpop.permute.xlu1 %4136  ;;  %v4052_v6 = vpop.permute.xlu0 %4051  ;;  %v4194_v3 = vadd.f32 %v4183_v18, %v4151_v45  ;;  %v4195_v1 = vadd.f32 %v4184_v34, %v4152_v23  ;;  %v4289_v23 = vrot.slane %v4288_v56, 2 }
 0x5fa   : > { %v4142_v58 = vsel %vm674_vm5, %v4135_v51, %v4137_v14  ;;  %v3918_v51 = vmul.f32 %v5972_v35, %v5861_v63  ;;  %v4185_v63 = vsel %vm718_vm6, %v5979_v19, %v5995_v29  ;;  %v4021_v35 = vadd.f32 %v4004_v31, %v3973_v38 }
 0x5fb   : > { %v4153_v11 = vadd.f32 %v4142_v58, %v4110_v40  ;;  %v4057_v37 = vsel %vm556_vm3, %v4050_v53, %v4052_v6  ;;  %vm6085_vm3 = vmmov %vm6083_vm1 }
 0x5fc   : > { %v4069_v49 = vadd.f32 %v4052_v6, %v4021_v35 }
 0x5fd   : > { %v4219_v44 = vpop.permute.xlu1 %4218  ;;  %v4139_v59 = vpop.permute.xlu0 %4138  ;;  %v4196_v61 = vadd.f32 %v4185_v63, %v4153_v11 }
 0x5fe   : > { %v4226_v39 = vsel %vm6079_vm8, %v5983_v52, %v4219_v44  ;;  %v4227_v4 = vsel %vm6080_vm9, %v4219_v44, %v5987_v32  ;;  %v3972_v52 = vadd.f32 %v3961_v22, %v3918_v51  ;;  %v4143_v5 = vsel %vm674_vm5, %v4137_v14, %v4139_v59  ;;  %vm6086_vm5 = vmmov %vm6084_vm2 }
 0x5ff   : > { %v4237_v41 = vadd.f32 %v4226_v39, %v4194_v3  ;;  %v4238_v62 = vadd.f32 %v4227_v4, %v4195_v1  ;;  %v4290_v3 = vadd.f32 %v4289_v23, %v4288_v56  ;;  %v4774_v4 = vmov 1966171168  }
 0x600   : > { %v4020_v47 = vadd.f32 %v4009_v48, %v3972_v52  ;;  %v4351_v51 = vunpack.c.l.s4 %v4774_v4 }
 0x601   : > { %v4280_v16 = vadd.f32 %v4269_v55, %v4237_v41  ;;  %v4281_v43 = vadd.f32 %v4270_v30, %v4238_v62  ;;  %v4223_v60 = vpop.permute.xlu1 %4222  ;;  %v4225_v10 = vpop.permute.xlu0 %4224  ;;  %v4291_v62 = vrot.slane %v4290_v3, 1 }
 0x602   : > { %v4228_v33 = vsel %vm6083_vm1, %v5987_v32, %v4223_v60  ;;  %v4068_v27 = vadd.f32 %v4057_v37, %v4020_v47  ;;  %v4352_v52 = vunpack.c.0.s8 %v4351_v51 }
 0x603   : > { %v4293_v28 = vrot.slane %v4280_v16, 4  ;;  %v4299_v15 = vrot.slane %v4281_v43, 4  ;;  %v4239_v54 = vadd.f32 %v4228_v33, %v4196_v61 }
 0x604   : > { %v4355_v61 = vsub.s32 %v4352_v52, %v4870_v9 }
 0x605   : > { %v4096_v57 = vpop.permute.xlu1 %4095  ;;  %v4266_v17 = vpop.permute.xlu0 %4265  ;;  %v4294_v31 = vadd.f32 %v4293_v28, %v4280_v16  ;;  %v4300_v12 = vadd.f32 %v4299_v15, %v4281_v43 }
 0x606   : > { %v4100_v50 = vsel %vm630_vm4, %v5989_v20, %v4096_v57  ;;  %v4112_v19 = vadd.f32 %v4096_v57, %v4069_v49  ;;  %v4271_v53 = vsel %vm6084_vm2, %v5985_v26, %v4266_v17  ;;  %v4229_v26 = vsel %vm6085_vm3, %v4223_v60, %v4225_v10 }
 0x607   : > { %v4111_v7 = vadd.f32 %v4100_v50, %v4068_v27  ;;  %v4282_v32 = vadd.f32 %v4271_v53, %v4239_v54  ;;  %v4295_v20 = vrot.slane %v4294_v31, 2  ;;  %v4301_v34 = vrot.slane %v4300_v12, 2 }
 0x608   : > { %v4155_v42 = vadd.f32 %v4139_v59, %v4112_v19  ;;  %vm4317_vm4 = vcmask 506880   ;;  %v4292_v60 = vadd.f32 %v4291_v62, %v4290_v3 }
 0x609   : > { %v4305_v46 = vrot.slane %v4282_v32, 4  ;;  %v4182_v2 = vpop.permute.xlu1 %4181  ;;  %v4154_v45 = vadd.f32 %v4143_v5, %v4111_v7  ;;  %v4296_v59 = vadd.f32 %v4295_v20, %v4294_v31  ;;  %v4302_v22 = vadd.f32 %v4301_v34, %v4300_v12 }
 0x60a   : > { %v4186_v6 = vsel %vm718_vm6, %v5995_v29, %v4182_v2  ;;  %v4198_v0 = vadd.f32 %v4182_v2, %v4155_v42 }
 0x60b   : > { %v4306_v25 = vadd.f32 %v4305_v46, %v4282_v32  ;;  %v4197_v18 = vadd.f32 %v4186_v6, %v4154_v45  ;;  %v4297_v55 = vrot.slane %v4296_v59, 1  ;;  %v4303_v48 = vrot.slane %v4302_v22, 1 }
 0x60c   : > { %v4241_v58 = vadd.f32 %v4225_v10, %v4198_v0 }
 0x60d   : > { %v4307_v21 = vrot.slane %v4306_v25, 2  ;;  %v4268_v40 = vpop.permute.xlu1 %4267  ;;  %v4240_v14 = vadd.f32 %v4229_v26, %v4197_v18  ;;  %v4298_v63 = vadd.f32 %v4297_v55, %v4296_v59  ;;  %v4304_v47 = vadd.f32 %v4303_v48, %v4302_v22 }
 0x60e   : > { %v4272_v44 = vsel %vm6086_vm5, %v4266_v17, %v4268_v40  ;;  %v4284_v1 = vadd.f32 %v4268_v40, %v4241_v58 }
 0x60f   : > { %v4283_v36 = vadd.f32 %v4272_v44, %v4240_v14  ;;  %v4308_v29 = vadd.f32 %v4307_v21, %v4306_v25 }
 0x610   : > { %v4318_v39 = vsel %vm4317_vm4, %v4284_v1, 0.0 }
 0x611   : > { %v4311_v11 = vrot.slane %v4283_v36, 4  ;;  %v4319_v41 = vrot.slane %v4318_v39, 4  ;;  %v4309_v24 = vrot.slane %v4308_v29, 1 }
 0x613   : > { %v4312_v30 = vadd.f32 %v4311_v11, %v4283_v36  ;;  %v4320_v38 = vadd.f32 %v4319_v41, %v4318_v39  ;;  %v4310_v28 = vadd.f32 %v4309_v24, %v4308_v29 }
 0x615   : > { %v4313_v16 = vrot.slane %v4312_v30, 2  ;;  %v4321_v43 = vrot.slane %v4320_v38, 2 }
 0x616   : > { %v4329_v10 = vpop.permute.xlu0 %4328 }
 0x617   : > { %v4314_v35 = vadd.f32 %v4313_v16, %v4312_v30  ;;  %v4322_v37 = vadd.f32 %v4321_v43, %v4320_v38  ;;  %v4334_v33 = vrot.slane %v4329_v10, %v4888_v13 }
 0x619   : > { %v4315_v49 = vrot.slane %v4314_v35, 1  ;;  %v4323_v15 = vrot.slane %v4322_v37, 1  ;;  %v4335_v27 = vadd.f32 %v4334_v33, %v4292_v60  ;;  %v4336_v54 = vadd.f32 %v4334_v33, %v4298_v63 }
 0x61a   : > { %v4337_v57 = vadd.f32 %v4334_v33, %v4304_v47  ;;  %v4338_v17 = vadd.f32 %v4334_v33, %v4310_v28 }
 0x61b   : > { %v4316_v56 = vadd.f32 %v4315_v49, %v4314_v35  ;;  %v4324_v50 = vadd.f32 %v4323_v15, %v4322_v37  ;;  %v4347_v19 = vcombine.low %v4335_v27, %v4336_v54 }
 0x61c   : > { %v4348_v53 = vcombine.low %v4337_v57, %v4338_v17 }
 0x61d   : > { %v4339_v31 = vadd.f32 %v4334_v33, %v4316_v56  ;;  %v4340_v7 = vadd.f32 %v4334_v33, %v4324_v50  ;;  %v4356_v32 = vrot.slane %v4347_v19, %v4355_v61 }
 0x61e   : > { %v4363_v12 = vrot.slane %v4348_v53, %v4355_v61 }
 0x61f   : > { %v4349_v13 = vcombine.low %v4339_v31, %v4340_v7 }
 0x620   : > { %v4371_v5 = vcombine.low %v4356_v32, %v4363_v12 }
 0x621   : > { %v4370_v42 = vrot.slane %v4349_v13, %v4355_v61 }
 0x622   : > { %v4378_v46 = vrot.slane %v4371_v5, %v4355_v61 }
 0x623   : > { %v4385_v9 = vrot.slane %v4370_v42, %v4355_v61 }
 0x625   : > { %v4386_v2 = vcombine.low %v4378_v46, %v4385_v9 }
 0x627   : > { %4387 = vrot.lane.b32.xlu1 %v4386_v2, %s4767_s12 }
 0x699   : > { %v4388_v45 = vpop.permute.xlu1 %4387 }
 0x69a   : > { %v4389_v23 = vrot.slane %v4388_v45, 1 }
 0x69c   : > { %v4390_v6 = vsel %vm911_vm10, %v4388_v45, %v4389_v23 }
 0x69d   : > { %4392 = vst.msk [vmem:[%s356_s27] sm:$0x1f] %vm4866_vm0, %v4390_v6 }
 0x69e PF: > { %s22_s15 = sadd.s32 1, %s4755_s15  }
 0x69f   : > { %p19_p4 = scmp.ge.s32.totalorder %s22_s15, 4  }
 0x6a1   :  { %21 = sbr.rel (!%p19_p4) target bundleno = 3 (0x3), region = 123 }

</bundles_post_ra>
